<compile_context>
chip_gen: v7x
topology: tpu7x:2x2x1
jax: 0.10.0
libtpu: 0.0.40
codegen_flags: <defaults>
</compile_context>

<pallas_src>
import jax
import jax.numpy as jnp
from jax.experimental import pallas as pl
from jax.experimental.pallas import tpu as pltpu

# ----------------------- hyper-params (mirrors ConRelModel.__init__) -----------------------
INPUT_SIZE = 32                    # input_size (seq encoder hidden)
ENT_SPAN_FEAT = 32                 # ent_span_feature_size
NUM_FILTERS = 8                    # args.context_cnn_output_channels
KERNEL_SIZES = (2, 3)              # args.context_cnn_kernel_sizes
CNN_OUT = NUM_FILTERS * len(KERNEL_SIZES)   # CNNSpanExtractor.get_output_dims()
CONTEXT_OUT = 16                   # args.context_output_size (> 0 branch)
OUTPUT_SIZE = 32                   # args.ent_mention_output_size (> 0 branch)
LABEL_SIZE = 5                     # vocab.get_vocab_size('span2rel')
REAL_FEAT = 2 * ENT_SPAN_FEAT + 3 * CONTEXT_OUT
W_MAX = 16                         # spans are padded/truncated to this fixed width
K_MAX = max(KERNEL_SIZES)
W_OUT = W_MAX + K_MAX - 1          # conv output positions kept (largest kernel size)
W_PAD = W_OUT + (K_MAX - 1)        # token-slab positions incl. Conv1d zero padding
LN_EPS = 1e-12


def _round_up(n, m):
    return ((n + m - 1) // m) * m


def _gelu(x):
    # BERT-style tanh-approximation gelu (matches `gelu` used by BertLinear in the repo)
    c = 0.7978845608028654  # sqrt(2/pi)
    return 0.5 * x * (1.0 + jnp.tanh(c * (x + 0.044715 * x * x * x)))


def _layer_norm(h, g, b):
    # two-pass (mean, then centered variance) for nn.LayerNorm-faithful numerics
    mu = jnp.mean(h, axis=-1, keepdims=True)
    d = h - mu
    var = jnp.mean(d * d, axis=-1, keepdims=True)
    return d * jax.lax.rsqrt(var + LN_EPS) * g + b


# =========================== the single fused forward kernel ===========================
def _fused_forward_kernel(seq_ref, tgt_ref, svalid_ref, wf_ref, bf_ref,
                          c2h_w, c2h_b, c2h_g, c2h_bt,
                          e1_ref, e2_ref,
                          mlp_w, mlp_b, mlp_g, mlp_bt,
                          dec_w, dec_b, dec_g, dec_bt,
                          labels_ref,
                          loss_ref, preds_ref):
    nsp = svalid_ref.shape[0]        # context spans (3 * padded #relations), multiple of 8
    nr = e1_ref.shape[0]             # padded #relations (multiple of 8)
    bs = seq_ref.shape[0]            # batch * seq_max (flattened token rows)
    rows_t = tgt_ref.shape[0]        # W_PAD * nsp (position-major token slab)
    rows_c = W_OUT * nsp             # conv output rows (position-major)

    # ---- in-kernel span-token gather: one-hot row-selection matmul on the MXU ----
    # tgt_ref[r, 0] = flat token index for slab row r (position-major: r = q*nsp + s), or -1
    # for zero rows (conv zero-padding, positions past the span width, padded relations).
    j = jax.lax.broadcasted_iota(jnp.int32, (rows_t, bs), 1)
    gsel = (tgt_ref[...] == j).astype(jnp.bfloat16)                    # (rows_t, bs)
    toks = jnp.dot(gsel, seq_ref[...].astype(jnp.bfloat16),
                   preferred_element_type=jnp.float32)                 # (rows_t, H), f32

    # ---- span CNN: Conv1d(padding=k-1), both kernel sizes, as K_MAX shifted matmuls ----
    conv = jnp.dot(toks[0:rows_c, :].astype(jnp.bfloat16),
                   wf_ref[0:INPUT_SIZE, :], preferred_element_type=jnp.float32)
    for t in range(1, K_MAX):
        xt = toks[t * nsp:t * nsp + rows_c, :].astype(jnp.bfloat16)    # 8-aligned row slice
        conv = conv + jnp.dot(xt, wf_ref[t * INPUT_SIZE:(t + 1) * INPUT_SIZE, :],
                              preferred_element_type=jnp.float32)
    conv = jnp.maximum(conv + bf_ref[...], 0.0)                        # ReLU, (rows_c, CNN_OUT)

    # ---- vectorized max-pool over positions (one reduce per kernel size) ----
    conv3 = conv.reshape(W_OUT, nsp, CNN_OUT)
    col = jax.lax.broadcasted_iota(jnp.int32, (nsp, CNN_OUT), 1)
    pooled = jnp.zeros((nsp, CNN_OUT), jnp.float32)
    for ci, k in enumerate(KERNEL_SIZES):
        n_pos = W_MAX + k - 1                                          # Conv1d(padding=k-1) length
        pk = jnp.max(conv3[:n_pos], axis=0)                            # (nsp, CNN_OUT)
        blk = (col >= ci * NUM_FILTERS) & (col < (ci + 1) * NUM_FILTERS)
        pooled = jnp.where(blk, pk, pooled)
    ctx = pooled * svalid_ref[...]            # zero feature for empty (start>=end) / padded spans

    # ---- context2hidden (BertLinear: gelu + LayerNorm), shared weights for L / M / R ----
    hid = jnp.dot(ctx.astype(jnp.bfloat16), c2h_w[...],
                  preferred_element_type=jnp.float32) + c2h_b[...]
    hid = _layer_norm(_gelu(hid), c2h_g[...], c2h_bt[...])             # (nsp, CONTEXT_OUT)
    feat_l = hid[0 * nr:1 * nr, :]
    feat_m = hid[1 * nr:2 * nr, :]
    feat_r = hid[2 * nr:3 * nr, :]

    # ---- mlp (BertLinear) over [L, E1, M, E2, R]: concat replaced by split row dots ----
    w = mlp_w[...]
    o0 = 0
    o1 = CONTEXT_OUT
    o2 = CONTEXT_OUT + ENT_SPAN_FEAT
    o3 = 2 * CONTEXT_OUT + ENT_SPAN_FEAT
    o4 = 2 * CONTEXT_OUT + 2 * ENT_SPAN_FEAT
    pre = jnp.dot(feat_l.astype(jnp.bfloat16), w[o0:o1, :], preferred_element_type=jnp.float32)
    pre = pre + jnp.dot(e1_ref[...].astype(jnp.bfloat16), w[o1:o2, :],
                        preferred_element_type=jnp.float32)
    pre = pre + jnp.dot(feat_m.astype(jnp.bfloat16), w[o2:o3, :],
                        preferred_element_type=jnp.float32)
    pre = pre + jnp.dot(e2_ref[...].astype(jnp.bfloat16), w[o3:o4, :],
                        preferred_element_type=jnp.float32)
    pre = pre + jnp.dot(feat_r.astype(jnp.bfloat16), w[o4:REAL_FEAT, :],
                        preferred_element_type=jnp.float32)
    rel_inputs = _layer_norm(_gelu(pre + mlp_b[...]), mlp_g[...], mlp_bt[...])   # (nr, OUT)

    # ---- VanillaSoftmaxDecoder: BertLinear(identity) -> log_softmax -> mean NLL / argmax ----
    # TODO(synk): hidden2label is assumed to be BertLinear with identity activation
    #             (matmul + bias + LayerNorm); drop the LayerNorm if the reference decoder
    #             uses a plain nn.Linear.
    dlog = jnp.dot(rel_inputs.astype(jnp.bfloat16), dec_w[...],
                   preferred_element_type=jnp.float32) + dec_b[...]
    logits = _layer_norm(dlog, dec_g[...], dec_bt[...])                # (nr, LABEL_SIZE)
    m = jnp.max(logits, axis=-1, keepdims=True)
    zc = logits - m
    lse = jnp.log(jnp.sum(jnp.exp(zc), axis=-1, keepdims=True))
    logp = zc - lse

    lbl_iota = jax.lax.broadcasted_iota(jnp.int32, (nr, LABEL_SIZE), 1)
    onehot = (labels_ref[...] == lbl_iota).astype(jnp.float32)         # padded labels (-1) -> 0 rows
    nll = -jnp.sum(onehot * logp, axis=-1, keepdims=True)              # (nr, 1)
    num = jnp.sum(nll, axis=0, keepdims=True)                          # (1, 1)
    den = jnp.sum(jnp.sum(onehot, axis=-1, keepdims=True), axis=0, keepdims=True)
    loss_ref[...] = num / jnp.maximum(den, 1.0)

    # argmax (first-max tie-break) via iota + min-reduce, stored as int32
    fl_iota = lbl_iota.astype(jnp.float32)
    mx = jnp.max(logp, axis=-1, keepdims=True)
    cand = jnp.where(logp >= mx, fl_iota, float(LABEL_SIZE))
    preds_ref[...] = jnp.min(cand, axis=-1, keepdims=True).astype(jnp.int32)


def fused_con_rel(seq_flat, tgt, svalid, wf, bf, c2h_params, e1, e2,
                  mlp_params, dec_params, labels):
    nr = e1.shape[0]
    nsp = svalid.shape[0]
    args = [seq_flat, tgt, svalid, wf, bf, *c2h_params, e1, e2,
            *mlp_params, *dec_params, labels]
    in_specs = [pl.BlockSpec(a.shape, lambda: (0, 0)) for a in args]   # everything VMEM-resident
    out_shape = (jax.ShapeDtypeStruct((1, 1), jnp.float32),
                 jax.ShapeDtypeStruct((nr, 1), jnp.int32))
    out_specs = (pl.BlockSpec((1, 1), lambda: (0, 0)),
                 pl.BlockSpec((nr, 1), lambda: (0, 0)))

    flops = 2 * (tgt.shape[0] * seq_flat.shape[0] * INPUT_SIZE          # one-hot gather matmul
                 + W_OUT * nsp * INPUT_SIZE * CNN_OUT * K_MAX           # conv shifted matmuls
                 + nsp * CNN_OUT * CONTEXT_OUT                          # context2hidden
                 + nr * REAL_FEAT * OUTPUT_SIZE                         # mlp
                 + nr * OUTPUT_SIZE * LABEL_SIZE)                       # decoder
    transcendentals = nsp * CONTEXT_OUT + nr * OUTPUT_SIZE + nr * LABEL_SIZE
    bytes_accessed = sum(a.size * a.dtype.itemsize for a in args) + 4 + nr * 4

    loss, preds = pl.pallas_call(
        _fused_forward_kernel,
        in_specs=in_specs,
        out_specs=out_specs,
        out_shape=out_shape,
        compiler_params=pltpu.CompilerParams(vmem_limit_bytes=32 * 1024 * 1024),
        cost_estimate=pl.CostEstimate(flops=flops, transcendentals=transcendentals,
                                      bytes_accessed=bytes_accessed),
    )(*args)
    return loss, preds


# ================================ wrapper-side prep (XLA) ================================
def build_fused_conv_params(conv_params):
    """Fuse both kernel sizes' Conv1d filters into one (K_MAX*H, CNN_OUT) bf16 weight."""
    wf = jnp.zeros((K_MAX * INPUT_SIZE, CNN_OUT), jnp.float32)
    bfs = []
    for ci, (k, (w, b)) in enumerate(zip(KERNEL_SIZES, conv_params)):
        for t in range(k):
            r0 = (K_MAX - k + t) * INPUT_SIZE
            wf = wf.at[r0:r0 + INPUT_SIZE, ci * NUM_FILTERS:(ci + 1) * NUM_FILTERS].set(w[t])
        bfs.append(b.reshape(1, NUM_FILTERS))
    return wf.astype(jnp.bfloat16), jnp.concatenate(bfs, axis=-1)


def init_bert_linear(key, din, dout):
    w = 0.02 * jax.random.normal(key, (din, dout), jnp.float32)
    b = jnp.zeros((1, dout), jnp.float32)
    gamma = jnp.ones((1, dout), jnp.float32)
    beta = jnp.zeros((1, dout), jnp.float32)
    return (w, b, gamma, beta)


def _cast_bert_linear(params):
    w, b, g, bt = params
    return (w.astype(jnp.bfloat16), b, g, bt)


@jax.jit
def con_rel_forward(seq_reprs, span_bse, e1_feat, e2_feat, labels,
                    conv_params, c2h_params, mlp_params, dec_params):
    """span_bse: int32 (3, n_rel, 3) = [part L/M/R][relation][(batch_idx, start, end)]."""
    batch, seq_max, _ = seq_reprs.shape
    n_rel = labels.shape[0]
    nr_pad = _round_up(max(n_rel, 8), 8)          # pad relation rows to a multiple of 8
    pad_r = nr_pad - n_rel
    nsp = 3 * nr_pad

    span_bse = jnp.pad(span_bse, ((0, 0), (0, pad_r), (0, 0)))
    e1 = jnp.pad(e1_feat, ((0, pad_r), (0, 0)))
    e2 = jnp.pad(e2_feat, ((0, pad_r), (0, 0)))
    labels_p = jnp.pad(labels, (0, pad_r), constant_values=-1).reshape(nr_pad, 1)

    bidx = span_bse[..., 0].reshape(-1).astype(jnp.int32)     # grouped: all L, then all M, then all R
    start = span_bse[..., 1].reshape(-1).astype(jnp.int32)
    width = jnp.maximum(span_bse[..., 2] - span_bse[..., 1], 0).reshape(-1).astype(jnp.int32)

    # Position-major token-slab target indices: slab row (q*nsp + s) selects
    # seq_flat[bidx[s]*seq_max + start[s] + (q - (K_MAX-1))] when inside the span, else -1
    # (conv zero padding / past-the-width / padded relations).  The gather itself happens
    # in-kernel (one-hot matmul); this is only the tiny integer bookkeeping.
    # TODO(synk): context spans longer than W_MAX tokens are truncated (reference pads to the
    #             batch-max span width instead of a fixed width).
    p_loc = (jnp.arange(W_PAD, dtype=jnp.int32) - (K_MAX - 1))[:, None]          # (W_PAD, 1)
    tgt2 = bidx[None, :] * seq_max + start[None, :] + p_loc                       # (W_PAD, nsp)
    valid2 = (p_loc >= 0) & (p_loc < width[None, :])
    tgt = jnp.where(valid2, tgt2, -1).reshape(W_PAD * nsp, 1)
    svalid = (width > 0).astype(jnp.float32).reshape(nsp, 1)

    seq_flat = seq_reprs.reshape(batch * seq_max, INPUT_SIZE)
    wf, bf = build_fused_conv_params(conv_params)

    loss, preds = fused_con_rel(
        seq_flat, tgt, svalid, wf, bf,
        _cast_bert_linear(c2h_params), e1, e2,
        _cast_bert_linear(mlp_params), _cast_bert_linear(dec_params),
        labels_p)
    return loss[0, 0], preds[:n_rel, 0]


# ===================================== main =====================================
if __name__ == "__main__":
    key = jax.random.PRNGKey(0)
    ks = jax.random.split(key, 12)

    # ---- parameters (deterministic, synthetic) ----
    conv_params = []
    for i, k in enumerate(KERNEL_SIZES):
        w = 0.1 * jax.random.normal(ks[i], (k, INPUT_SIZE, NUM_FILTERS), jnp.float32)
        b = 0.1 * jax.random.normal(ks[2 + i], (1, NUM_FILTERS), jnp.float32)
        conv_params.append((w, b))
    c2h_params = init_bert_linear(ks[4], CNN_OUT, CONTEXT_OUT)          # context2hidden
    mlp_params = init_bert_linear(ks[5], REAL_FEAT, OUTPUT_SIZE)        # mlp
    dec_params = init_bert_linear(ks[6], OUTPUT_SIZE, LABEL_SIZE)       # hidden2label

    # ---- synthetic batch inputs ----
    batch_size, seq_max = 2, 16
    seq_lens = [16, 14]
    seq_reprs = jax.random.normal(ks[7], (batch_size, seq_max, INPUT_SIZE), jnp.float32)

    # candidate relations: (batch_idx, e1_start, e1_end, e2_start, e2_end)  (end exclusive)
    candi_rels = [
        (0, 1, 3, 5, 8),
        (0, 0, 2, 10, 13),   # L = (0, 0) -> empty context span (zero-feature path)
        (1, 2, 4, 6, 9),
    ]
    n_rel = len(candi_rels)

    span_bse = [[], [], []]                    # L / M / R context spans, grouped by part
    for (bi, e1s, e1e, e2s, e2e) in candi_rels:
        sl = seq_lens[bi]
        span_bse[0].append((bi, 0, e1s))
        span_bse[1].append((bi, e1e, e2s))
        span_bse[2].append((bi, e2e, sl))
    span_bse = jnp.asarray(span_bse, jnp.int32)        # (3, n_rel, 3)

    # entity span features (precomputed in the reference, synthetic here)
    e1_feat = jax.random.normal(ks[8], (n_rel, ENT_SPAN_FEAT), jnp.float32)
    e2_feat = jax.random.normal(ks[9], (n_rel, ENT_SPAN_FEAT), jnp.float32)
    labels = jnp.asarray([1, 3, 0], jnp.int32)

    rel_loss, rel_preds = con_rel_forward(
        seq_reprs, span_bse, e1_feat, e2_feat, labels,
        conv_params, c2h_params, mlp_params, dec_params)
    jax.block_until_ready(rel_loss)
    jax.block_until_ready(rel_preds)
    print("KERNEL_OK")
</pallas_src>

<mosaic_0001>
module attributes {stable_mosaic.version = 11 : i64} {
  func.func @_fused_forward_kernel(%arg0: memref<32x32xf32, #tpu.memory_space<vmem>>, %arg1: memref<480x1xi32, #tpu.memory_space<vmem>>, %arg2: memref<24x1xf32, #tpu.memory_space<vmem>>, %arg3: memref<96x16xbf16, #tpu.memory_space<vmem>>, %arg4: memref<1x16xf32, #tpu.memory_space<vmem>>, %arg5: memref<16x16xbf16, #tpu.memory_space<vmem>>, %arg6: memref<1x16xf32, #tpu.memory_space<vmem>>, %arg7: memref<1x16xf32, #tpu.memory_space<vmem>>, %arg8: memref<1x16xf32, #tpu.memory_space<vmem>>, %arg9: memref<8x32xf32, #tpu.memory_space<vmem>>, %arg10: memref<8x32xf32, #tpu.memory_space<vmem>>, %arg11: memref<112x32xbf16, #tpu.memory_space<vmem>>, %arg12: memref<1x32xf32, #tpu.memory_space<vmem>>, %arg13: memref<1x32xf32, #tpu.memory_space<vmem>>, %arg14: memref<1x32xf32, #tpu.memory_space<vmem>>, %arg15: memref<32x5xbf16, #tpu.memory_space<vmem>>, %arg16: memref<1x5xf32, #tpu.memory_space<vmem>>, %arg17: memref<1x5xf32, #tpu.memory_space<vmem>>, %arg18: memref<1x5xf32, #tpu.memory_space<vmem>>, %arg19: memref<8x1xi32, #tpu.memory_space<vmem>>, %arg20: memref<1x1xf32, #tpu.memory_space<vmem>>, %arg21: memref<8x1xi32, #tpu.memory_space<vmem>>) attributes {dimension_semantics = [], scalar_prefetch = 0 : i64, scratch_operands = 0 : i64, tpu.core_type = #tpu.core_type<tc>} {
    %0 = tpu.iota {dimensions = array<i32: 1>} : vector<480x32xi32>
    %c0 = arith.constant 0 : index
    %c0_0 = arith.constant 0 : index
    %1 = vector.load %arg1[%c0, %c0_0] : memref<480x1xi32, #tpu.memory_space<vmem>>, vector<480x1xi32>
    %2 = vector.broadcast %1 : vector<480x1xi32> to vector<480x32xi32>
    %3 = arith.cmpi eq, %2, %0 : vector<480x32xi32>
    %4 = arith.extui %3 : vector<480x32xi1> to vector<480x32xi32>
    %5 = arith.sitofp %4 : vector<480x32xi32> to vector<480x32xf32>
    %6 = arith.truncf %5 : vector<480x32xf32> to vector<480x32xbf16>
    %c0_1 = arith.constant 0 : index
    %c0_2 = arith.constant 0 : index
    %7 = vector.load %arg0[%c0_1, %c0_2] : memref<32x32xf32, #tpu.memory_space<vmem>>, vector<32x32xf32>
    %8 = arith.truncf %7 : vector<32x32xf32> to vector<32x32xbf16>
    %cst = arith.constant dense<0.000000e+00> : vector<480x32xf32>
    %9 = tpu.matmul %6, %8, %cst {dimension_numbers = #tpu.dot_dimension_numbers<[1], [0], [0], [1], [0, 0, 1, 1], [], []>} : vector<480x32xbf16>, vector<32x32xbf16>, vector<480x32xf32> -> vector<480x32xf32>
    %10 = vector.extract_strided_slice %9 {offsets = [0, 0], sizes = [432, 32], strides = [1, 1]} : vector<480x32xf32> to vector<432x32xf32>
    %11 = arith.truncf %10 : vector<432x32xf32> to vector<432x32xbf16>
    %c0_3 = arith.constant 0 : index
    %c0_4 = arith.constant 0 : index
    %12 = vector.load %arg3[%c0_3, %c0_4] : memref<96x16xbf16, #tpu.memory_space<vmem>>, vector<32x16xbf16>
    %cst_5 = arith.constant dense<0.000000e+00> : vector<432x16xf32>
    %13 = tpu.matmul %11, %12, %cst_5 {dimension_numbers = #tpu.dot_dimension_numbers<[1], [0], [0], [1], [0, 0, 1, 1], [], []>} : vector<432x32xbf16>, vector<32x16xbf16>, vector<432x16xf32> -> vector<432x16xf32>
    %14 = vector.extract_strided_slice %9 {offsets = [24, 0], sizes = [432, 32], strides = [1, 1]} : vector<480x32xf32> to vector<432x32xf32>
    %15 = arith.truncf %14 : vector<432x32xf32> to vector<432x32xbf16>
    %c32 = arith.constant 32 : index
    %c0_6 = arith.constant 0 : index
    %16 = vector.load %arg3[%c32, %c0_6] : memref<96x16xbf16, #tpu.memory_space<vmem>>, vector<32x16xbf16>
    %cst_7 = arith.constant dense<0.000000e+00> : vector<432x16xf32>
    %17 = tpu.matmul %15, %16, %cst_7 {dimension_numbers = #tpu.dot_dimension_numbers<[1], [0], [0], [1], [0, 0, 1, 1], [], []>} : vector<432x32xbf16>, vector<32x16xbf16>, vector<432x16xf32> -> vector<432x16xf32>
    %18 = arith.addf %13, %17 : vector<432x16xf32>
    %19 = vector.extract_strided_slice %9 {offsets = [48, 0], sizes = [432, 32], strides = [1, 1]} : vector<480x32xf32> to vector<432x32xf32>
    %20 = arith.truncf %19 : vector<432x32xf32> to vector<432x32xbf16>
    %c64 = arith.constant 64 : index
    %c0_8 = arith.constant 0 : index
    %21 = vector.load %arg3[%c64, %c0_8] : memref<96x16xbf16, #tpu.memory_space<vmem>>, vector<32x16xbf16>
    %cst_9 = arith.constant dense<0.000000e+00> : vector<432x16xf32>
    %22 = tpu.matmul %20, %21, %cst_9 {dimension_numbers = #tpu.dot_dimension_numbers<[1], [0], [0], [1], [0, 0, 1, 1], [], []>} : vector<432x32xbf16>, vector<32x16xbf16>, vector<432x16xf32> -> vector<432x16xf32>
    %23 = arith.addf %18, %22 : vector<432x16xf32>
    %c0_10 = arith.constant 0 : index
    %c0_11 = arith.constant 0 : index
    %24 = vector.load %arg4[%c0_10, %c0_11] : memref<1x16xf32, #tpu.memory_space<vmem>>, vector<1x16xf32>
    %25 = vector.broadcast %24 : vector<1x16xf32> to vector<432x16xf32>
    %26 = arith.addf %23, %25 : vector<432x16xf32>
    %cst_12 = arith.constant 0.000000e+00 : f32
    %27 = vector.broadcast %cst_12 : f32 to vector<432x16xf32>
    %28 = arith.maximumf %26, %27 : vector<432x16xf32>
    %29 = vector.shape_cast %28 : vector<432x16xf32> to vector<18x24x16xf32>
    %30 = tpu.iota {dimensions = array<i32: 1>} : vector<24x16xi32>
    %cst_13 = arith.constant 0.000000e+00 : f32
    %31 = vector.broadcast %cst_13 : f32 to vector<24x16xf32>
    %32 = vector.extract_strided_slice %29 {offsets = [0, 0, 0], sizes = [17, 24, 16], strides = [1, 1, 1]} : vector<18x24x16xf32> to vector<17x24x16xf32>
    %cst_14 = arith.constant dense<0xFF800000> : vector<24x16xf32>
    %33 = vector.multi_reduction <maximumf>, %32, %cst_14 [0] : vector<17x24x16xf32> to vector<24x16xf32>
    %c0_i32 = arith.constant 0 : i32
    %34 = vector.broadcast %c0_i32 : i32 to vector<24x16xi32>
    %35 = arith.cmpi sge, %30, %34 : vector<24x16xi32>
    %c8_i32 = arith.constant 8 : i32
    %36 = vector.broadcast %c8_i32 : i32 to vector<24x16xi32>
    %37 = arith.cmpi slt, %30, %36 : vector<24x16xi32>
    %38 = arith.andi %35, %37 : vector<24x16xi1>
    %39 = arith.select %38, %33, %31 : vector<24x16xi1>, vector<24x16xf32>
    %cst_15 = arith.constant dense<0xFF800000> : vector<24x16xf32>
    %40 = vector.multi_reduction <maximumf>, %29, %cst_15 [0] : vector<18x24x16xf32> to vector<24x16xf32>
    %c8_i32_16 = arith.constant 8 : i32
    %41 = vector.broadcast %c8_i32_16 : i32 to vector<24x16xi32>
    %42 = arith.cmpi sge, %30, %41 : vector<24x16xi32>
    %c16_i32 = arith.constant 16 : i32
    %43 = vector.broadcast %c16_i32 : i32 to vector<24x16xi32>
    %44 = arith.cmpi slt, %30, %43 : vector<24x16xi32>
    %45 = arith.andi %42, %44 : vector<24x16xi1>
    %46 = arith.select %45, %40, %39 : vector<24x16xi1>, vector<24x16xf32>
    %c0_17 = arith.constant 0 : index
    %c0_18 = arith.constant 0 : index
    %47 = vector.load %arg2[%c0_17, %c0_18] : memref<24x1xf32, #tpu.memory_space<vmem>>, vector<24x1xf32>
    %48 = vector.broadcast %47 : vector<24x1xf32> to vector<24x16xf32>
    %49 = arith.mulf %46, %48 : vector<24x16xf32>
    %50 = arith.truncf %49 : vector<24x16xf32> to vector<24x16xbf16>
    %c0_19 = arith.constant 0 : index
    %c0_20 = arith.constant 0 : index
    %51 = vector.load %arg5[%c0_19, %c0_20] : memref<16x16xbf16, #tpu.memory_space<vmem>>, vector<16x16xbf16>
    %cst_21 = arith.constant dense<0.000000e+00> : vector<24x16xf32>
    %52 = tpu.matmul %50, %51, %cst_21 {dimension_numbers = #tpu.dot_dimension_numbers<[1], [0], [0], [1], [0, 0, 1, 1], [], []>} : vector<24x16xbf16>, vector<16x16xbf16>, vector<24x16xf32> -> vector<24x16xf32>
    %c0_22 = arith.constant 0 : index
    %c0_23 = arith.constant 0 : index
    %53 = vector.load %arg6[%c0_22, %c0_23] : memref<1x16xf32, #tpu.memory_space<vmem>>, vector<1x16xf32>
    %54 = vector.broadcast %53 : vector<1x16xf32> to vector<24x16xf32>
    %55 = arith.addf %52, %54 : vector<24x16xf32>
    %cst_24 = arith.constant 5.000000e-01 : f32
    %56 = vector.broadcast %cst_24 : f32 to vector<24x16xf32>
    %57 = arith.mulf %56, %55 : vector<24x16xf32>
    %cst_25 = arith.constant 4.471500e-02 : f32
    %58 = vector.broadcast %cst_25 : f32 to vector<24x16xf32>
    %59 = arith.mulf %58, %55 : vector<24x16xf32>
    %60 = arith.mulf %59, %55 : vector<24x16xf32>
    %61 = arith.mulf %60, %55 : vector<24x16xf32>
    %62 = arith.addf %55, %61 : vector<24x16xf32>
    %cst_26 = arith.constant 0.797884583 : f32
    %63 = vector.broadcast %cst_26 : f32 to vector<24x16xf32>
    %64 = arith.mulf %63, %62 : vector<24x16xf32>
    %65 = math.tanh %64 : vector<24x16xf32>
    %cst_27 = arith.constant 1.000000e+00 : f32
    %66 = vector.broadcast %cst_27 : f32 to vector<24x16xf32>
    %67 = arith.addf %66, %65 : vector<24x16xf32>
    %68 = arith.mulf %57, %67 : vector<24x16xf32>
    %c0_28 = arith.constant 0 : index
    %c0_29 = arith.constant 0 : index
    %69 = vector.load %arg7[%c0_28, %c0_29] : memref<1x16xf32, #tpu.memory_space<vmem>>, vector<1x16xf32>
    %c0_30 = arith.constant 0 : index
    %c0_31 = arith.constant 0 : index
    %70 = vector.load %arg8[%c0_30, %c0_31] : memref<1x16xf32, #tpu.memory_space<vmem>>, vector<1x16xf32>
    %cst_32 = arith.constant dense<0.000000e+00> : vector<24xf32>
    %71 = vector.multi_reduction <add>, %68, %cst_32 [1] : vector<24x16xf32> to vector<24xf32>
    %72 = vector.shape_cast %71 : vector<24xf32> to vector<24x1xf32>
    %cst_33 = arith.constant 1.600000e+01 : f32
    %73 = vector.broadcast %cst_33 : f32 to vector<24x1xf32>
    %74 = arith.divf %72, %73 : vector<24x1xf32>
    %75 = vector.broadcast %74 : vector<24x1xf32> to vector<24x16xf32>
    %76 = arith.subf %68, %75 : vector<24x16xf32>
    %77 = arith.mulf %76, %76 : vector<24x16xf32>
    %cst_34 = arith.constant dense<0.000000e+00> : vector<24xf32>
    %78 = vector.multi_reduction <add>, %77, %cst_34 [1] : vector<24x16xf32> to vector<24xf32>
    %79 = vector.shape_cast %78 : vector<24xf32> to vector<24x1xf32>
    %cst_35 = arith.constant 1.600000e+01 : f32
    %80 = vector.broadcast %cst_35 : f32 to vector<24x1xf32>
    %81 = arith.divf %79, %80 : vector<24x1xf32>
    %cst_36 = arith.constant 9.99999996E-13 : f32
    %82 = vector.broadcast %cst_36 : f32 to vector<24x1xf32>
    %83 = arith.addf %81, %82 : vector<24x1xf32>
    %84 = math.rsqrt %83 : vector<24x1xf32>
    %85 = vector.broadcast %84 : vector<24x1xf32> to vector<24x16xf32>
    %86 = arith.mulf %76, %85 : vector<24x16xf32>
    %87 = vector.broadcast %69 : vector<1x16xf32> to vector<24x16xf32>
    %88 = arith.mulf %86, %87 : vector<24x16xf32>
    %89 = vector.broadcast %70 : vector<1x16xf32> to vector<24x16xf32>
    %90 = arith.addf %88, %89 : vector<24x16xf32>
    %91 = vector.extract_strided_slice %90 {offsets = [0, 0], sizes = [8, 16], strides = [1, 1]} : vector<24x16xf32> to vector<8x16xf32>
    %92 = vector.extract_strided_slice %90 {offsets = [8, 0], sizes = [8, 16], strides = [1, 1]} : vector<24x16xf32> to vector<8x16xf32>
    %93 = vector.extract_strided_slice %90 {offsets = [16, 0], sizes = [8, 16], strides = [1, 1]} : vector<24x16xf32> to vector<8x16xf32>
    %c0_37 = arith.constant 0 : index
    %c0_38 = arith.constant 0 : index
    %94 = vector.load %arg11[%c0_37, %c0_38] : memref<112x32xbf16, #tpu.memory_space<vmem>>, vector<112x32xbf16>
    %95 = arith.truncf %91 : vector<8x16xf32> to vector<8x16xbf16>
    %96 = vector.extract_strided_slice %94 {offsets = [0, 0], sizes = [16, 32], strides = [1, 1]} : vector<112x32xbf16> to vector<16x32xbf16>
    %cst_39 = arith.constant dense<0.000000e+00> : vector<8x32xf32>
    %97 = tpu.matmul %95, %96, %cst_39 {dimension_numbers = #tpu.dot_dimension_numbers<[1], [0], [0], [1], [0, 0, 1, 1], [], []>} : vector<8x16xbf16>, vector<16x32xbf16>, vector<8x32xf32> -> vector<8x32xf32>
    %c0_40 = arith.constant 0 : index
    %c0_41 = arith.constant 0 : index
    %98 = vector.load %arg9[%c0_40, %c0_41] : memref<8x32xf32, #tpu.memory_space<vmem>>, vector<8x32xf32>
    %99 = arith.truncf %98 : vector<8x32xf32> to vector<8x32xbf16>
    %100 = vector.extract_strided_slice %94 {offsets = [16, 0], sizes = [32, 32], strides = [1, 1]} : vector<112x32xbf16> to vector<32x32xbf16>
    %cst_42 = arith.constant dense<0.000000e+00> : vector<8x32xf32>
    %101 = tpu.matmul %99, %100, %cst_42 {dimension_numbers = #tpu.dot_dimension_numbers<[1], [0], [0], [1], [0, 0, 1, 1], [], []>} : vector<8x32xbf16>, vector<32x32xbf16>, vector<8x32xf32> -> vector<8x32xf32>
    %102 = arith.addf %97, %101 : vector<8x32xf32>
    %103 = arith.truncf %92 : vector<8x16xf32> to vector<8x16xbf16>
    %104 = vector.extract_strided_slice %94 {offsets = [48, 0], sizes = [16, 32], strides = [1, 1]} : vector<112x32xbf16> to vector<16x32xbf16>
    %cst_43 = arith.constant dense<0.000000e+00> : vector<8x32xf32>
    %105 = tpu.matmul %103, %104, %cst_43 {dimension_numbers = #tpu.dot_dimension_numbers<[1], [0], [0], [1], [0, 0, 1, 1], [], []>} : vector<8x16xbf16>, vector<16x32xbf16>, vector<8x32xf32> -> vector<8x32xf32>
    %106 = arith.addf %102, %105 : vector<8x32xf32>
    %c0_44 = arith.constant 0 : index
    %c0_45 = arith.constant 0 : index
    %107 = vector.load %arg10[%c0_44, %c0_45] : memref<8x32xf32, #tpu.memory_space<vmem>>, vector<8x32xf32>
    %108 = arith.truncf %107 : vector<8x32xf32> to vector<8x32xbf16>
    %109 = vector.extract_strided_slice %94 {offsets = [64, 0], sizes = [32, 32], strides = [1, 1]} : vector<112x32xbf16> to vector<32x32xbf16>
    %cst_46 = arith.constant dense<0.000000e+00> : vector<8x32xf32>
    %110 = tpu.matmul %108, %109, %cst_46 {dimension_numbers = #tpu.dot_dimension_numbers<[1], [0], [0], [1], [0, 0, 1, 1], [], []>} : vector<8x32xbf16>, vector<32x32xbf16>, vector<8x32xf32> -> vector<8x32xf32>
    %111 = arith.addf %106, %110 : vector<8x32xf32>
    %112 = arith.truncf %93 : vector<8x16xf32> to vector<8x16xbf16>
    %113 = vector.extract_strided_slice %94 {offsets = [96, 0], sizes = [16, 32], strides = [1, 1]} : vector<112x32xbf16> to vector<16x32xbf16>
    %cst_47 = arith.constant dense<0.000000e+00> : vector<8x32xf32>
    %114 = tpu.matmul %112, %113, %cst_47 {dimension_numbers = #tpu.dot_dimension_numbers<[1], [0], [0], [1], [0, 0, 1, 1], [], []>} : vector<8x16xbf16>, vector<16x32xbf16>, vector<8x32xf32> -> vector<8x32xf32>
    %115 = arith.addf %111, %114 : vector<8x32xf32>
    %c0_48 = arith.constant 0 : index
    %c0_49 = arith.constant 0 : index
    %116 = vector.load %arg12[%c0_48, %c0_49] : memref<1x32xf32, #tpu.memory_space<vmem>>, vector<1x32xf32>
    %117 = vector.broadcast %116 : vector<1x32xf32> to vector<8x32xf32>
    %118 = arith.addf %115, %117 : vector<8x32xf32>
    %cst_50 = arith.constant 5.000000e-01 : f32
    %119 = vector.broadcast %cst_50 : f32 to vector<8x32xf32>
    %120 = arith.mulf %119, %118 : vector<8x32xf32>
    %cst_51 = arith.constant 4.471500e-02 : f32
    %121 = vector.broadcast %cst_51 : f32 to vector<8x32xf32>
    %122 = arith.mulf %121, %118 : vector<8x32xf32>
    %123 = arith.mulf %122, %118 : vector<8x32xf32>
    %124 = arith.mulf %123, %118 : vector<8x32xf32>
    %125 = arith.addf %118, %124 : vector<8x32xf32>
    %cst_52 = arith.constant 0.797884583 : f32
    %126 = vector.broadcast %cst_52 : f32 to vector<8x32xf32>
    %127 = arith.mulf %126, %125 : vector<8x32xf32>
    %128 = math.tanh %127 : vector<8x32xf32>
    %cst_53 = arith.constant 1.000000e+00 : f32
    %129 = vector.broadcast %cst_53 : f32 to vector<8x32xf32>
    %130 = arith.addf %129, %128 : vector<8x32xf32>
    %131 = arith.mulf %120, %130 : vector<8x32xf32>
    %c0_54 = arith.constant 0 : index
    %c0_55 = arith.constant 0 : index
    %132 = vector.load %arg13[%c0_54, %c0_55] : memref<1x32xf32, #tpu.memory_space<vmem>>, vector<1x32xf32>
    %c0_56 = arith.constant 0 : index
    %c0_57 = arith.constant 0 : index
    %133 = vector.load %arg14[%c0_56, %c0_57] : memref<1x32xf32, #tpu.memory_space<vmem>>, vector<1x32xf32>
    %cst_58 = arith.constant dense<0.000000e+00> : vector<8xf32>
    %134 = vector.multi_reduction <add>, %131, %cst_58 [1] : vector<8x32xf32> to vector<8xf32>
    %135 = vector.shape_cast %134 : vector<8xf32> to vector<8x1xf32>
    %cst_59 = arith.constant 3.200000e+01 : f32
    %136 = vector.broadcast %cst_59 : f32 to vector<8x1xf32>
    %137 = arith.divf %135, %136 : vector<8x1xf32>
    %138 = vector.broadcast %137 : vector<8x1xf32> to vector<8x32xf32>
    %139 = arith.subf %131, %138 : vector<8x32xf32>
    %140 = arith.mulf %139, %139 : vector<8x32xf32>
    %cst_60 = arith.constant dense<0.000000e+00> : vector<8xf32>
    %141 = vector.multi_reduction <add>, %140, %cst_60 [1] : vector<8x32xf32> to vector<8xf32>
    %142 = vector.shape_cast %141 : vector<8xf32> to vector<8x1xf32>
    %cst_61 = arith.constant 3.200000e+01 : f32
    %143 = vector.broadcast %cst_61 : f32 to vector<8x1xf32>
    %144 = arith.divf %142, %143 : vector<8x1xf32>
    %cst_62 = arith.constant 9.99999996E-13 : f32
    %145 = vector.broadcast %cst_62 : f32 to vector<8x1xf32>
    %146 = arith.addf %144, %145 : vector<8x1xf32>
    %147 = math.rsqrt %146 : vector<8x1xf32>
    %148 = vector.broadcast %147 : vector<8x1xf32> to vector<8x32xf32>
    %149 = arith.mulf %139, %148 : vector<8x32xf32>
    %150 = vector.broadcast %132 : vector<1x32xf32> to vector<8x32xf32>
    %151 = arith.mulf %149, %150 : vector<8x32xf32>
    %152 = vector.broadcast %133 : vector<1x32xf32> to vector<8x32xf32>
    %153 = arith.addf %151, %152 : vector<8x32xf32>
    %154 = arith.truncf %153 : vector<8x32xf32> to vector<8x32xbf16>
    %c0_63 = arith.constant 0 : index
    %c0_64 = arith.constant 0 : index
    %155 = vector.load %arg15[%c0_63, %c0_64] : memref<32x5xbf16, #tpu.memory_space<vmem>>, vector<32x5xbf16>
    %cst_65 = arith.constant dense<0.000000e+00> : vector<8x5xf32>
    %156 = tpu.matmul %154, %155, %cst_65 {dimension_numbers = #tpu.dot_dimension_numbers<[1], [0], [0], [1], [0, 0, 1, 1], [], []>} : vector<8x32xbf16>, vector<32x5xbf16>, vector<8x5xf32> -> vector<8x5xf32>
    %c0_66 = arith.constant 0 : index
    %c0_67 = arith.constant 0 : index
    %157 = vector.load %arg16[%c0_66, %c0_67] : memref<1x5xf32, #tpu.memory_space<vmem>>, vector<1x5xf32>
    %158 = vector.broadcast %157 : vector<1x5xf32> to vector<8x5xf32>
    %159 = arith.addf %156, %158 : vector<8x5xf32>
    %c0_68 = arith.constant 0 : index
    %c0_69 = arith.constant 0 : index
    %160 = vector.load %arg17[%c0_68, %c0_69] : memref<1x5xf32, #tpu.memory_space<vmem>>, vector<1x5xf32>
    %c0_70 = arith.constant 0 : index
    %c0_71 = arith.constant 0 : index
    %161 = vector.load %arg18[%c0_70, %c0_71] : memref<1x5xf32, #tpu.memory_space<vmem>>, vector<1x5xf32>
    %cst_72 = arith.constant dense<0.000000e+00> : vector<8xf32>
    %162 = vector.multi_reduction <add>, %159, %cst_72 [1] : vector<8x5xf32> to vector<8xf32>
    %163 = vector.shape_cast %162 : vector<8xf32> to vector<8x1xf32>
    %cst_73 = arith.constant 5.000000e+00 : f32
    %164 = vector.broadcast %cst_73 : f32 to vector<8x1xf32>
    %165 = arith.divf %163, %164 : vector<8x1xf32>
    %166 = vector.broadcast %165 : vector<8x1xf32> to vector<8x5xf32>
    %167 = arith.subf %159, %166 : vector<8x5xf32>
    %168 = arith.mulf %167, %167 : vector<8x5xf32>
    %cst_74 = arith.constant dense<0.000000e+00> : vector<8xf32>
    %169 = vector.multi_reduction <add>, %168, %cst_74 [1] : vector<8x5xf32> to vector<8xf32>
    %170 = vector.shape_cast %169 : vector<8xf32> to vector<8x1xf32>
    %cst_75 = arith.constant 5.000000e+00 : f32
    %171 = vector.broadcast %cst_75 : f32 to vector<8x1xf32>
    %172 = arith.divf %170, %171 : vector<8x1xf32>
    %cst_76 = arith.constant 9.99999996E-13 : f32
    %173 = vector.broadcast %cst_76 : f32 to vector<8x1xf32>
    %174 = arith.addf %172, %173 : vector<8x1xf32>
    %175 = math.rsqrt %174 : vector<8x1xf32>
    %176 = vector.broadcast %175 : vector<8x1xf32> to vector<8x5xf32>
    %177 = arith.mulf %167, %176 : vector<8x5xf32>
    %178 = vector.broadcast %160 : vector<1x5xf32> to vector<8x5xf32>
    %179 = arith.mulf %177, %178 : vector<8x5xf32>
    %180 = vector.broadcast %161 : vector<1x5xf32> to vector<8x5xf32>
    %181 = arith.addf %179, %180 : vector<8x5xf32>
    %cst_77 = arith.constant dense<0xFF800000> : vector<8xf32>
    %182 = vector.multi_reduction <maximumf>, %181, %cst_77 [1] : vector<8x5xf32> to vector<8xf32>
    %183 = vector.shape_cast %182 : vector<8xf32> to vector<8x1xf32>
    %184 = vector.broadcast %183 : vector<8x1xf32> to vector<8x5xf32>
    %185 = arith.subf %181, %184 : vector<8x5xf32>
    %186 = math.exp %185 : vector<8x5xf32>
    %cst_78 = arith.constant dense<0.000000e+00> : vector<8xf32>
    %187 = vector.multi_reduction <add>, %186, %cst_78 [1] : vector<8x5xf32> to vector<8xf32>
    %188 = vector.shape_cast %187 : vector<8xf32> to vector<8x1xf32>
    %189 = math.log %188 : vector<8x1xf32>
    %190 = vector.broadcast %189 : vector<8x1xf32> to vector<8x5xf32>
    %191 = arith.subf %185, %190 : vector<8x5xf32>
    %192 = tpu.iota {dimensions = array<i32: 1>} : vector<8x5xi32>
    %c0_79 = arith.constant 0 : index
    %c0_80 = arith.constant 0 : index
    %193 = vector.load %arg19[%c0_79, %c0_80] : memref<8x1xi32, #tpu.memory_space<vmem>>, vector<8x1xi32>
    %194 = vector.broadcast %193 : vector<8x1xi32> to vector<8x5xi32>
    %195 = arith.cmpi eq, %194, %192 : vector<8x5xi32>
    %196 = arith.extui %195 : vector<8x5xi1> to vector<8x5xi32>
    %197 = arith.sitofp %196 : vector<8x5xi32> to vector<8x5xf32>
    %198 = arith.mulf %197, %191 : vector<8x5xf32>
    %cst_81 = arith.constant dense<0.000000e+00> : vector<8xf32>
    %199 = vector.multi_reduction <add>, %198, %cst_81 [1] : vector<8x5xf32> to vector<8xf32>
    %200 = vector.shape_cast %199 : vector<8xf32> to vector<8x1xf32>
    %cst_82 = arith.constant 0.000000e+00 : f32
    %201 = vector.broadcast %cst_82 : f32 to vector<8x1xf32>
    %202 = arith.subf %201, %200 : vector<8x1xf32>
    %cst_83 = arith.constant dense<0.000000e+00> : vector<1xf32>
    %203 = vector.multi_reduction <add>, %202, %cst_83 [0] : vector<8x1xf32> to vector<1xf32>
    %204 = vector.shape_cast %203 : vector<1xf32> to vector<1x1xf32>
    %cst_84 = arith.constant dense<0.000000e+00> : vector<8xf32>
    %205 = vector.multi_reduction <add>, %197, %cst_84 [1] : vector<8x5xf32> to vector<8xf32>
    %206 = vector.shape_cast %205 : vector<8xf32> to vector<8x1xf32>
    %cst_85 = arith.constant dense<0.000000e+00> : vector<1xf32>
    %207 = vector.multi_reduction <add>, %206, %cst_85 [0] : vector<8x1xf32> to vector<1xf32>
    %208 = vector.shape_cast %207 : vector<1xf32> to vector<1x1xf32>
    %cst_86 = arith.constant 1.000000e+00 : f32
    %209 = vector.broadcast %cst_86 : f32 to vector<1x1xf32>
    %210 = arith.maximumf %208, %209 : vector<1x1xf32>
    %211 = arith.divf %204, %210 : vector<1x1xf32>
    %c0_87 = arith.constant 0 : index
    %c0_88 = arith.constant 0 : index
    %212 = vector.load %arg20[%c0_87, %c0_88] : memref<1x1xf32, #tpu.memory_space<vmem>>, vector<1x1xf32>
    tpu.vector_store %arg20[%c0_87, %c0_88], %211 {strides = array<i32>} : memref<1x1xf32, #tpu.memory_space<vmem>>, vector<1x1xf32>,
    %213 = arith.sitofp %192 : vector<8x5xi32> to vector<8x5xf32>
    %cst_89 = arith.constant dense<0xFF800000> : vector<8xf32>
    %214 = vector.multi_reduction <maximumf>, %191, %cst_89 [1] : vector<8x5xf32> to vector<8xf32>
    %215 = vector.shape_cast %214 : vector<8xf32> to vector<8x1xf32>
    %216 = vector.broadcast %215 : vector<8x1xf32> to vector<8x5xf32>
    %217 = arith.cmpf oge, %191, %216 : vector<8x5xf32>
    %cst_90 = arith.constant 5.000000e+00 : f32
    %218 = vector.broadcast %cst_90 : f32 to vector<8x5xf32>
    %219 = arith.select %217, %213, %218 : vector<8x5xi1>, vector<8x5xf32>
    %cst_91 = arith.constant dense<0x7F800000> : vector<8xf32>
    %220 = vector.multi_reduction <minimumf>, %219, %cst_91 [1] : vector<8x5xf32> to vector<8xf32>
    %221 = vector.shape_cast %220 : vector<8xf32> to vector<8x1xf32>
    %222 = arith.fptosi %221 : vector<8x1xf32> to vector<8x1xi32>
    %c0_92 = arith.constant 0 : index
    %c0_93 = arith.constant 0 : index
    %223 = vector.load %arg21[%c0_92, %c0_93] : memref<8x1xi32, #tpu.memory_space<vmem>>, vector<8x1xi32>
    tpu.vector_store %arg21[%c0_92, %c0_93], %222 {strides = array<i32>} : memref<8x1xi32, #tpu.memory_space<vmem>>, vector<8x1xi32>,
    return
  }
}

</mosaic_0001>

<bundles_post_ra>
// kernel: con_rel_forward.1
= control target key start
LH: loop header
LB: loop body
LE: loop exit
PB: predicated region body
PF: predicated region fallthrough
CT: control target
= control target key end

     0   :  { %s5226_s0 = inlined_call_operand.vmem [shape: f32[32,32], index: 0, kind: input, shape index: {}]   ;;  %s5227_s1 = inlined_call_operand.vmem [shape: s32[480,1], index: 1, kind: input, shape index: {}]   ;;  %s5228_s2 = inlined_call_operand.vmem [shape: f32[24,1], index: 2, kind: input, shape index: {}]   ;;  %s5229_s3 = inlined_call_operand.vmem [shape: bf16[96,16], index: 3, kind: input, shape index: {}]   ;;  %s5230_s4 = inlined_call_operand.vmem [shape: f32[1,16], index: 4, kind: input, shape index: {}]   ;;  %s5231_s5 = inlined_call_operand.vmem [shape: bf16[16,16], index: 5, kind: input, shape index: {}]   ;;  %s5232_s6 = inlined_call_operand.vmem [shape: f32[1,16], index: 6, kind: input, shape index: {}]   ;;  %s5233_s7 = inlined_call_operand.vmem [shape: f32[1,16], index: 7, kind: input, shape index: {}]   ;;  %s5234_s8 = inlined_call_operand.vmem [shape: f32[1,16], index: 8, kind: input, shape index: {}]   ;;  %s5235_s9 = inlined_call_operand.vmem [shape: f32[8,32], index: 9, kind: input, shape index: {}]   ;;  %s5236_s10 = inlined_call_operand.vmem [shape: f32[8,32], index: 10, kind: input, shape index: {}]   ;;  %s5237_s11 = inlined_call_operand.vmem [shape: bf16[112,32], index: 11, kind: input, shape index: {}]   ;;  %s5238_s12 = inlined_call_operand.vmem [shape: f32[1,32], index: 12, kind: input, shape index: {}]   ;;  %s5239_s13 = inlined_call_operand.vmem [shape: f32[1,32], index: 13, kind: input, shape index: {}]   ;;  %s5240_s14 = inlined_call_operand.vmem [shape: f32[1,32], index: 14, kind: input, shape index: {}]   ;;  %s5241_s15 = inlined_call_operand.vmem [shape: bf16[32,5], index: 15, kind: input, shape index: {}]   ;;  %s5242_s16 = inlined_call_operand.vmem [shape: f32[1,5], index: 16, kind: input, shape index: {}]   ;;  %s5243_s17 = inlined_call_operand.vmem [shape: f32[1,5], index: 17, kind: input, shape index: {}]   ;;  %s5244_s18 = inlined_call_operand.vmem [shape: f32[1,5], index: 18, kind: input, shape index: {}]   ;;  %s5245_s19 = inlined_call_operand.vmem [shape: s32[8,1], index: 19, kind: input, shape index: {}]   ;;  %s5246_s20 = inlined_call_operand.hbm [shape: f32[1,1], index: 20, kind: output, shape index: {0}]   ;;  %s5247_s21 = inlined_call_operand.vmem [shape: s32[8,1], index: 21, kind: output, shape index: {1}]  }
   0x1   :  { %5256 = sst [smem:[#allocation13_spill]] %s5226_s0 }
   0x2   :  { %5257 = sst [smem:[#allocation14_spill]] %s5227_s1 }
   0x3   :  { %5258 = sst [smem:[#allocation15_spill]] %s5228_s2 }
   0x4   :  { %5259 = sst [smem:[#allocation16_spill]] %s5229_s3 }
   0x5   :  { %5260 = sst [smem:[#allocation17_spill]] %s5230_s4 }
   0x6   :  { %5261 = sst [smem:[#allocation18_spill]] %s5231_s5 }
   0x7   :  { %s5262_s26 = sld [smem:[#allocation14_spill]]  ;;  %v3750_v2 = vmov 0   ;;  %v5254_v5 = vmov 0.0   ;;  %s5263_s27 = sld [smem:[#allocation13_spill]] }
   0x8   :  { %3685 = vset.pattern.permute.xlu1 %v3750_v2  ;;  %3684 = vset.pattern.permute.xlu0 %v3750_v2 }
   0x9   :  { %3674 = vmatprep.subr.bf16.mxu1 %v5254_v5 }
   0xd   :  { %v73_v0 = vld [vmem:[%s5262_s26 + $0x10] sm:$0xff]  ;;  %v71_v1 = vld [vmem:[%s5262_s26] sm:$0xff]  ;;  %v74_v3 = vld [vmem:[%s5262_s26 + $0x18] sm:$0xff] }
   0xe   :  { %138 = vperm.xlu1 %3685, %v73_v0   ;;  %132 = vperm.xlu0 %3684, %v71_v1   ;;  %v72_v4 = vld [vmem:[%s5262_s26 + $0x8] sm:$0xff]  ;;  %v75_v7 = vld [vmem:[%s5262_s26 + $0x20] sm:$0xff]  ;;  %v78_v8 = vld [vmem:[%s5262_s26 + $0x38] sm:$0xff] }
   0xf   :  { %v76_v6 = vld [vmem:[%s5262_s26 + $0x28] sm:$0xff]  ;;  %v77_v9 = vld [vmem:[%s5262_s26 + $0x30] sm:$0xff]  ;;  %v79_v11 = vld [vmem:[%s5262_s26 + $0x40] sm:$0xff] }
  0x10   :  { %v80_v10 = vld [vmem:[%s5262_s26 + $0x48] sm:$0xff]  ;;  %v82_v12 = vld [vmem:[%s5262_s26 + $0x58] sm:$0xff]  ;;  %v81_v13 = vld [vmem:[%s5262_s26 + $0x50] sm:$0xff] }
  0x11   :  { %v84_v14 = vld [vmem:[%s5262_s26 + $0x68] sm:$0xff]  ;;  %v83_v15 = vld [vmem:[%s5262_s26 + $0x60] sm:$0xff]  ;;  %v523_v18 = vld [vmem:[%s5263_s27 + $0x10] sm:$0xff] }
  0x12   :  { %141 = vperm.xlu1 %3685, %v74_v3   ;;  %135 = vperm.xlu0 %3684, %v72_v4   ;;  %v521_v16 = vld [vmem:[%s5263_s27] sm:$0xff]  ;;  %v522_v17 = vld [vmem:[%s5263_s27 + $0x8] sm:$0xff]  ;;  %v524_v20 = vld [vmem:[%s5263_s27 + $0x18] sm:$0xff] }
  0x13   :  { %v525_v19 = vpack.c.bf16 %v522_v17, %v521_v16  ;;  %v526_v21 = vpack.c.bf16 %v524_v20, %v523_v18  ;;  %v86_v22 = vld [vmem:[%s5262_s26 + $0x78] sm:$0xff]  ;;  %v85_v23 = vld [vmem:[%s5262_s26 + $0x70] sm:$0xff]  ;;  %v88_v24 = vld [vmem:[%s5262_s26 + $0x88] sm:$0xff] }
  0x14   :  { %v87_v25 = vld [vmem:[%s5262_s26 + $0x80] sm:$0xff] }
  0x15   :  { %3226 = vmatprep.subr.bf16.mxu0 %v525_v19 }
  0x16   :  { %147 = vperm.xlu1 %3685, %v76_v6   ;;  %144 = vperm.xlu0 %3684, %v75_v7  }
  0x17   :  { %3227 = vmatpush3.bf16.msra.mxu0 %v525_v19 }
  0x18   :  { %3228 = vmatprep.subr.bf16.mxu0 %v526_v21 }
  0x1a   :  { %153 = vperm.xlu1 %3685, %v78_v8   ;;  %150 = vperm.xlu0 %3684, %v77_v9  }
  0x1b   :  { %3229 = vmatpush3.bf16.msra.mxu0 %v526_v21 }
  0x1c   :  { %3290 = vmatprep.subr.bf16.mxu0 %v5254_v5 }
  0x1e   :  { %159 = vperm.xlu1 %3685, %v80_v10   ;;  %156 = vperm.xlu0 %3684, %v79_v11  }
  0x22   :  { %165 = vperm.xlu1 %3685, %v82_v12   ;;  %162 = vperm.xlu0 %3684, %v81_v13  }
  0x26   :  { %171 = vperm.xlu1 %3685, %v84_v14   ;;  %168 = vperm.xlu0 %3684, %v83_v15  }
  0x2a   :  { %177 = vperm.xlu1 %3685, %v86_v22   ;;  %174 = vperm.xlu0 %3684, %v85_v23  }
  0x2b   :  { %27 = vsyncpa [#allocation3], 0  ;;  %v90_v26 = vld [vmem:[%s5262_s26 + $0x98] sm:$0xff]  ;;  %v89_v27 = vld [vmem:[%s5262_s26 + $0x90] sm:$0xff]  ;;  %s5264_s29 = sld [smem:[#allocation15_spill]]  ;;  %v69_v8 = vlaneseq  ;;  %vm527_vm4 = vcmask 261120  }
  0x2c   :  { %v92_v28 = vld [vmem:[%s5262_s26 + $0xa8] sm:$0xff]  ;;  %v91_v29 = vld [vmem:[%s5262_s26 + $0xa0] sm:$0xff]  ;;  %v94_v30 = vld [vmem:[%s5262_s26 + $0xb8] sm:$0xff]  ;;  %s5266_s23 = sld [smem:[#allocation16_spill]]  ;;  %s5278_s1 = sld [smem:[#allocation17_spill]] }
  0x2d   :  { %v93_v31 = vld [vmem:[%s5262_s26 + $0xb0] sm:$0xff]  ;;  %v96_v32 = vld [vmem:[%s5262_s26 + $0xc8] sm:$0xff]  ;;  %v95_v33 = vld [vmem:[%s5262_s26 + $0xc0] sm:$0xff]  ;;  %v4067_v9 = vand.u32 127, %v69_v8 }
  0x2e   :  { %183 = vperm.xlu1 %3685, %v88_v24   ;;  %180 = vperm.xlu0 %3684, %v87_v25   ;;  %v98_v34 = vld [vmem:[%s5262_s26 + $0xd8] sm:$0xff]  ;;  %v97_v35 = vld [vmem:[%s5262_s26 + $0xd0] sm:$0xff]  ;;  %v100_v36 = vld [vmem:[%s5262_s26 + $0xe8] sm:$0xff] }
  0x2f   :  { %v99_v37 = vld [vmem:[%s5262_s26 + $0xe0] sm:$0xff]  ;;  %v102_v38 = vld [vmem:[%s5262_s26 + $0xf8] sm:$0xff]  ;;  %v101_v39 = vld [vmem:[%s5262_s26 + $0xf0] sm:$0xff]  ;;  %5265 = vst [vmem:[#allocation5_spill] sm:$0xff] %v4067_v9 }
  0x30   :  { %v104_v40 = vld [vmem:[%s5262_s26 + $0x108] sm:$0xff]  ;;  %v103_v41 = vld [vmem:[%s5262_s26 + $0x100] sm:$0xff]  ;;  %v106_v42 = vld [vmem:[%s5262_s26 + $0x118] sm:$0xff] }
  0x31   :  { %v105_v43 = vld [vmem:[%s5262_s26 + $0x110] sm:$0xff]  ;;  %v108_v44 = vld [vmem:[%s5262_s26 + $0x128] sm:$0xff]  ;;  %v107_v45 = vld [vmem:[%s5262_s26 + $0x120] sm:$0xff] }
  0x32   :  { %189 = vperm.xlu1 %3685, %v90_v26   ;;  %186 = vperm.xlu0 %3684, %v89_v27   ;;  %v110_v46 = vld [vmem:[%s5262_s26 + $0x138] sm:$0xff]  ;;  %v109_v47 = vld [vmem:[%s5262_s26 + $0x130] sm:$0xff]  ;;  %v112_v48 = vld [vmem:[%s5262_s26 + $0x148] sm:$0xff] }
  0x33   :  { %v111_v49 = vld [vmem:[%s5262_s26 + $0x140] sm:$0xff]  ;;  %v114_v50 = vld [vmem:[%s5262_s26 + $0x158] sm:$0xff]  ;;  %v113_v51 = vld [vmem:[%s5262_s26 + $0x150] sm:$0xff] }
  0x34   :  { %v116_v52 = vld [vmem:[%s5262_s26 + $0x168] sm:$0xff]  ;;  %v115_v53 = vld [vmem:[%s5262_s26 + $0x160] sm:$0xff]  ;;  %v118_v54 = vld [vmem:[%s5262_s26 + $0x178] sm:$0xff] }
  0x35   :  { %v117_v55 = vld [vmem:[%s5262_s26 + $0x170] sm:$0xff]  ;;  %v120_v56 = vld [vmem:[%s5262_s26 + $0x188] sm:$0xff]  ;;  %v119_v57 = vld [vmem:[%s5262_s26 + $0x180] sm:$0xff] }
  0x36   :  { %195 = vperm.xlu1 %3685, %v92_v28   ;;  %192 = vperm.xlu0 %3684, %v91_v29   ;;  %v122_v58 = vld [vmem:[%s5262_s26 + $0x198] sm:$0xff]  ;;  %v121_v59 = vld [vmem:[%s5262_s26 + $0x190] sm:$0xff]  ;;  %v124_v60 = vld [vmem:[%s5262_s26 + $0x1a8] sm:$0xff] }
  0x37   :  { %v123_v61 = vld [vmem:[%s5262_s26 + $0x1a0] sm:$0xff]  ;;  %v126_v62 = vld [vmem:[%s5262_s26 + $0x1b8] sm:$0xff]  ;;  %v125_v63 = vld [vmem:[%s5262_s26 + $0x1b0] sm:$0xff] }
  0x38   :  { %v128_v0 = vld [vmem:[%s5262_s26 + $0x1c8] sm:$0xff]  ;;  %v127_v1 = vld [vmem:[%s5262_s26 + $0x1c0] sm:$0xff]  ;;  %v130_v2 = vld [vmem:[%s5262_s26 + $0x1d8] sm:$0xff] }
  0x39   :  { %v129_v3 = vld [vmem:[%s5262_s26 + $0x1d0] sm:$0xff]  ;;  %v2205_v4 = vld [vmem:[%s5264_s29 + $0x8] sm:$0xff]  ;;  %v2204_v6 = vld [vmem:[%s5264_s29] sm:$0xff]  ;;  %s5267_s26 = sld [smem:[#allocation18_spill]] }
  0x3a   :  { %201 = vperm.xlu1 %3685, %v94_v30   ;;  %198 = vperm.xlu0 %3684, %v93_v31   ;;  %v2206_v7 = vld [vmem:[%s5264_s29 + $0x10] sm:$0xff] }
  0x3e   :  { %207 = vperm.xlu1 %3685, %v96_v32   ;;  %204 = vperm.xlu0 %3684, %v95_v33  }
  0x42   :  { %213 = vperm.xlu1 %3685, %v98_v34   ;;  %210 = vperm.xlu0 %3684, %v97_v35  }
  0x46   :  { %219 = vperm.xlu1 %3685, %v100_v36   ;;  %216 = vperm.xlu0 %3684, %v99_v37  }
  0x4a   :  { %225 = vperm.xlu1 %3685, %v102_v38   ;;  %222 = vperm.xlu0 %3684, %v101_v39  }
  0x4e   :  { %231 = vperm.xlu1 %3685, %v104_v40   ;;  %228 = vperm.xlu0 %3684, %v103_v41  }
  0x52   :  { %237 = vperm.xlu1 %3685, %v106_v42   ;;  %234 = vperm.xlu0 %3684, %v105_v43  }
  0x56   :  { %243 = vperm.xlu1 %3685, %v108_v44   ;;  %240 = vperm.xlu0 %3684, %v107_v45  }
  0x5a   :  { %249 = vperm.xlu1 %3685, %v110_v46   ;;  %246 = vperm.xlu0 %3684, %v109_v47  }
  0x5e   :  { %255 = vperm.xlu1 %3685, %v112_v48   ;;  %252 = vperm.xlu0 %3684, %v111_v49  }
  0x62   :  { %261 = vperm.xlu1 %3685, %v114_v50   ;;  %258 = vperm.xlu0 %3684, %v113_v51  }
  0x66   :  { %267 = vperm.xlu1 %3685, %v116_v52   ;;  %264 = vperm.xlu0 %3684, %v115_v53  }
  0x6a   :  { %273 = vperm.xlu1 %3685, %v118_v54   ;;  %270 = vperm.xlu0 %3684, %v117_v55  }
  0x6e   :  { %279 = vperm.xlu1 %3685, %v120_v56   ;;  %276 = vperm.xlu0 %3684, %v119_v57  }
  0x72   :  { %285 = vperm.xlu1 %3685, %v122_v58   ;;  %282 = vperm.xlu0 %3684, %v121_v59  }
  0x76   :  { %291 = vperm.xlu1 %3685, %v124_v60   ;;  %288 = vperm.xlu0 %3684, %v123_v61  }
  0x7a   :  { %297 = vperm.xlu1 %3685, %v126_v62   ;;  %294 = vperm.xlu0 %3684, %v125_v63  }
  0x7e   :  { %303 = vperm.xlu1 %3685, %v128_v0   ;;  %300 = vperm.xlu0 %3684, %v127_v1  }
  0x82   :  { %309 = vperm.xlu1 %3685, %v130_v2   ;;  %306 = vperm.xlu0 %3684, %v129_v3  }
  0x86   :  { %2214 = vperm.xlu1 %3685, %v2205_v4   ;;  %2209 = vperm.xlu0 %3684, %v2204_v6  }
  0x8a   :  { %2219 = vperm.xlu0 %3684, %v2206_v7  }
  0x8d   :  { %v139_v10 = vpop.permute.xlu1 %138  ;;  %v133_v11 = vpop.permute.xlu0 %132 }
  0x8e   :  { %vm313_vm0 = vcmp.eq.s32.totalorder %v139_v10, %v4067_v9  ;;  %vm311_vm1 = vcmp.eq.s32.totalorder %v133_v11, %v4067_v9 }
  0x8f   :  { %v2885_v14 = vsel %vm313_vm0, 1.0, %v5254_v5  ;;  %v2883_v15 = vsel %vm311_vm1, 1.0, %v5254_v5 }
  0x91   :  { %v142_v12 = vpop.permute.xlu1 %141  ;;  %v136_v13 = vpop.permute.xlu0 %135 }
  0x92   :  { %vm314_vm2 = vcmp.eq.s32.totalorder %v142_v12, %v4067_v9  ;;  %vm312_vm3 = vcmp.eq.s32.totalorder %v136_v13, %v4067_v9 }
  0x93   :  { %v2886_v16 = vsel %vm314_vm2, 1.0, %v5254_v5  ;;  %v2884_v17 = vsel %vm312_vm3, 1.0, %v5254_v5 }
  0x94   :  { %v492_v18 = vpack.c.bf16 %v2886_v16, %v2885_v14  ;;  %v491_v19 = vpack.c.bf16 %v2884_v17, %v2883_v15 }
  0x95   :  { %v148_v20 = vpop.permute.xlu1 %147  ;;  %v145_v21 = vpop.permute.xlu0 %144 }
  0x96   :  { %vm316_vm5 = vcmp.eq.s32.totalorder %v148_v20, %v4067_v9  ;;  %vm315_vm6 = vcmp.eq.s32.totalorder %v145_v21, %v4067_v9  ;;  %3230 = vmatprep.mubr.msk.bf16.mxu0 %vm527_vm4, %v491_v19 }
  0x97   :  { %v2888_v22 = vsel %vm316_vm5, 1.0, %v5254_v5  ;;  %v2887_v23 = vsel %vm315_vm6, 1.0, %v5254_v5  ;;  %3231 = vmatmul.mubr.msk.bf16.vlgmr.msra.gmra.mrb[0].mxu0 %vm527_vm4, %v492_v18 }
  0x98   :  { %v493_v24 = vpack.c.bf16 %v2888_v22, %v2887_v23 }
  0x99   :  { %v154_v25 = vpop.permute.xlu1 %153  ;;  %v151_v26 = vpop.permute.xlu0 %150 }
  0x9a   :  { %vm318_vm7 = vcmp.eq.s32.totalorder %v154_v25, %v4067_v9  ;;  %vm317_vm8 = vcmp.eq.s32.totalorder %v151_v26, %v4067_v9  ;;  %3234 = vmatprep.mubr.msk.bf16.mxu0 %vm527_vm4, %v493_v24 }
  0x9b   :  { %v2890_v27 = vsel %vm318_vm7, 1.0, %v5254_v5  ;;  %v2889_v28 = vsel %vm317_vm8, 1.0, %v5254_v5 }
  0x9c   :  { %v494_v29 = vpack.c.bf16 %v2890_v27, %v2889_v28 }
  0x9d   :  { %v160_v30 = vpop.permute.xlu1 %159  ;;  %v157_v31 = vpop.permute.xlu0 %156 }
  0x9e   :  { %vm320_vm9 = vcmp.eq.s32.totalorder %v160_v30, %v4067_v9  ;;  %vm319_vm10 = vcmp.eq.s32.totalorder %v157_v31, %v4067_v9 }
  0x9f   :  { %v2892_v32 = vsel %vm320_vm9, 1.0, %v5254_v5  ;;  %v2891_v33 = vsel %vm319_vm10, 1.0, %v5254_v5  ;;  %3235 = vmatmul.mubr.msk.bf16.gmra.mrb[4].mxu0 %vm527_vm4, %v494_v29 }
  0xa0   :  { %v495_v34 = vpack.c.bf16 %v2892_v32, %v2891_v33 }
  0xa1   :  { %v166_v35 = vpop.permute.xlu1 %165  ;;  %v163_v36 = vpop.permute.xlu0 %162 }
  0xa2   :  { %vm322_vm11 = vcmp.eq.s32.totalorder %v166_v35, %v4067_v9  ;;  %vm321_vm12 = vcmp.eq.s32.totalorder %v163_v36, %v4067_v9  ;;  %3238 = vmatprep.mubr.msk.bf16.mxu0 %vm527_vm4, %v495_v34 }
  0xa3   :  { %v2894_v37 = vsel %vm322_vm11, 1.0, %v5254_v5  ;;  %v2893_v38 = vsel %vm321_vm12, 1.0, %v5254_v5 }
  0xa4   :  { %v496_v39 = vpack.c.bf16 %v2894_v37, %v2893_v38 }
  0xa5   :  { %v172_v40 = vpop.permute.xlu1 %171  ;;  %v169_v41 = vpop.permute.xlu0 %168 }
  0xa6   :  { %vm324_vm13 = vcmp.eq.s32.totalorder %v172_v40, %v4067_v9  ;;  %vm323_vm14 = vcmp.eq.s32.totalorder %v169_v41, %v4067_v9 }
  0xa7   :  { %v2896_v42 = vsel %vm324_vm13, 1.0, %v5254_v5  ;;  %v2895_v43 = vsel %vm323_vm14, 1.0, %v5254_v5  ;;  %3239 = vmatmul.mubr.msk.bf16.gmra.mrb[8].mxu0 %vm527_vm4, %v496_v39 }
  0xa8   :  { %v497_v44 = vpack.c.bf16 %v2896_v42, %v2895_v43 }
  0xa9   :  { %v178_v45 = vpop.permute.xlu1 %177  ;;  %v175_v46 = vpop.permute.xlu0 %174 }
  0xaa   :  { %vm326_vm15 = vcmp.eq.s32.totalorder %v178_v45, %v4067_v9  ;;  %vm325_vm0 = vcmp.eq.s32.totalorder %v175_v46, %v4067_v9  ;;  %3242 = vmatprep.mubr.msk.bf16.mxu0 %vm527_vm4, %v497_v44 }
  0xab   :  { %v2898_v47 = vsel %vm326_vm15, 1.0, %v5254_v5  ;;  %v2897_v48 = vsel %vm325_vm0, 1.0, %v5254_v5 }
  0xac   :  { %v498_v49 = vpack.c.bf16 %v2898_v47, %v2897_v48 }
  0xad   :  { %v184_v50 = vpop.permute.xlu1 %183  ;;  %v181_v51 = vpop.permute.xlu0 %180 }
  0xae   :  { %vm328_vm1 = vcmp.eq.s32.totalorder %v184_v50, %v4067_v9  ;;  %vm327_vm2 = vcmp.eq.s32.totalorder %v181_v51, %v4067_v9 }
  0xaf   :  { %v2900_v52 = vsel %vm328_vm1, 1.0, %v5254_v5  ;;  %v2899_v53 = vsel %vm327_vm2, 1.0, %v5254_v5  ;;  %3243 = vmatmul.mubr.msk.bf16.gmra.mrb[12].mxu0 %vm527_vm4, %v498_v49 }
  0xb0   :  { %v499_v54 = vpack.c.bf16 %v2900_v52, %v2899_v53 }
  0xb1   :  { %v190_v55 = vpop.permute.xlu1 %189  ;;  %v187_v56 = vpop.permute.xlu0 %186 }
  0xb2   :  { %vm330_vm3 = vcmp.eq.s32.totalorder %v190_v55, %v4067_v9  ;;  %vm329_vm5 = vcmp.eq.s32.totalorder %v187_v56, %v4067_v9  ;;  %3246 = vmatprep.mubr.msk.bf16.mxu0 %vm527_vm4, %v499_v54 }
  0xb3   :  { %v2902_v57 = vsel %vm330_vm3, 1.0, %v5254_v5  ;;  %v2901_v58 = vsel %vm329_vm5, 1.0, %v5254_v5 }
  0xb4   :  { %v500_v59 = vpack.c.bf16 %v2902_v57, %v2901_v58 }
  0xb5   :  { %v196_v60 = vpop.permute.xlu1 %195  ;;  %v193_v61 = vpop.permute.xlu0 %192 }
  0xb6   :  { %vm332_vm6 = vcmp.eq.s32.totalorder %v196_v60, %v4067_v9  ;;  %vm331_vm7 = vcmp.eq.s32.totalorder %v193_v61, %v4067_v9 }
  0xb7   :  { %v2904_v62 = vsel %vm332_vm6, 1.0, %v5254_v5  ;;  %v2903_v63 = vsel %vm331_vm7, 1.0, %v5254_v5  ;;  %3247 = vmatmul.mubr.msk.bf16.gmra.mrb[16].mxu0 %vm527_vm4, %v500_v59 }
  0xb8   :  { %v501_v0 = vpack.c.bf16 %v2904_v62, %v2903_v63 }
  0xb9   :  { %v202_v1 = vpop.permute.xlu1 %201  ;;  %v199_v2 = vpop.permute.xlu0 %198 }
  0xba   :  { %vm334_vm8 = vcmp.eq.s32.totalorder %v202_v1, %v4067_v9  ;;  %vm333_vm9 = vcmp.eq.s32.totalorder %v199_v2, %v4067_v9  ;;  %3250 = vmatprep.mubr.msk.bf16.mxu0 %vm527_vm4, %v501_v0 }
  0xbb   :  { %v2906_v3 = vsel %vm334_vm8, 1.0, %v5254_v5  ;;  %v2905_v4 = vsel %vm333_vm9, 1.0, %v5254_v5 }
  0xbc   :  { %v502_v6 = vpack.c.bf16 %v2906_v3, %v2905_v4 }
  0xbd   :  { %v208_v7 = vpop.permute.xlu1 %207  ;;  %v205_v8 = vpop.permute.xlu0 %204 }
  0xbe   :  { %vm336_vm10 = vcmp.eq.s32.totalorder %v208_v7, %v4067_v9  ;;  %vm335_vm11 = vcmp.eq.s32.totalorder %v205_v8, %v4067_v9  ;;  %v3686_v7 = vld [vmem:[%s5266_s23 + $0x10] sm:$0xff]  }
  0xbf   :  { %v2908_v10 = vsel %vm336_vm10, 1.0, %v5254_v5  ;;  %v2907_v11 = vsel %vm335_vm11, 1.0, %v5254_v5  ;;  %3251 = vmatmul.mubr.msk.bf16.gmra.mrb[20].mxu0 %vm527_vm4, %v502_v6  ;;  %3676 = vmatpush3.bf16.msra.mxu1 %v3686_v7 }
  0xc0   :  { %v503_v12 = vpack.c.bf16 %v2908_v10, %v2907_v11  ;;  %3291 = vmatpush3.bf16.msra.mxu0 %v3686_v7  ;;  %3675 = vmatprep.subr.bf16.mxu1 %v5254_v5 }
  0xc1   :  { %v214_v13 = vpop.permute.xlu1 %213  ;;  %v211_v14 = vpop.permute.xlu0 %210  ;;  %3292 = vmatprep.subr.bf16.mxu0 %v5254_v5 }
  0xc2   :  { %vm338_vm12 = vcmp.eq.s32.totalorder %v214_v13, %v4067_v9  ;;  %vm337_vm13 = vcmp.eq.s32.totalorder %v211_v14, %v4067_v9  ;;  %3254 = vmatprep.mubr.msk.bf16.mxu0 %vm527_vm4, %v503_v12  ;;  %v3687_v14 = vld [vmem:[%s5266_s23 + $0x18] sm:$0xff]  }
  0xc3   :  { %v2910_v15 = vsel %vm338_vm12, 1.0, %v5254_v5  ;;  %v2909_v16 = vsel %vm337_vm13, 1.0, %v5254_v5  ;;  %3677 = vmatpush3.bf16.msra.mxu1 %v3687_v14 }
  0xc4   :  { %v504_v17 = vpack.c.bf16 %v2910_v15, %v2909_v16  ;;  %3293 = vmatpush3.bf16.msra.mxu0 %v3687_v14  ;;  %3514 = vmatprep.subr.bf16.mxu1 %v5254_v5 }
  0xc5   :  { %v220_v18 = vpop.permute.xlu1 %219  ;;  %v217_v19 = vpop.permute.xlu0 %216  ;;  %3402 = vmatprep.subr.bf16.mxu0 %v5254_v5 }
  0xc6   :  { %vm340_vm14 = vcmp.eq.s32.totalorder %v220_v18, %v4067_v9  ;;  %vm339_vm15 = vcmp.eq.s32.totalorder %v217_v19, %v4067_v9 }
  0xc7   :  { %v2912_v20 = vsel %vm340_vm14, 1.0, %v5254_v5  ;;  %v2911_v21 = vsel %vm339_vm15, 1.0, %v5254_v5  ;;  %3255 = vmatmul.mubr.msk.bf16.gmra.mrb[24].mxu0 %vm527_vm4, %v504_v17 }
  0xc8   :  { %v505_v22 = vpack.c.bf16 %v2912_v20, %v2911_v21 }
  0xc9   :  { %v226_v23 = vpop.permute.xlu1 %225  ;;  %v223_v24 = vpop.permute.xlu0 %222 }
  0xca   :  { %vm342_vm0 = vcmp.eq.s32.totalorder %v226_v23, %v4067_v9  ;;  %vm341_vm1 = vcmp.eq.s32.totalorder %v223_v24, %v4067_v9  ;;  %3258 = vmatprep.mubr.msk.bf16.mxu0 %vm527_vm4, %v505_v22 }
  0xcb   :  { %v2914_v25 = vsel %vm342_vm0, 1.0, %v5254_v5  ;;  %v2913_v26 = vsel %vm341_vm1, 1.0, %v5254_v5 }
  0xcc   :  { %v506_v27 = vpack.c.bf16 %v2914_v25, %v2913_v26 }
  0xcd   :  { %v232_v28 = vpop.permute.xlu1 %231  ;;  %v229_v29 = vpop.permute.xlu0 %228 }
  0xce   :  { %vm344_vm2 = vcmp.eq.s32.totalorder %v232_v28, %v4067_v9  ;;  %vm343_vm3 = vcmp.eq.s32.totalorder %v229_v29, %v4067_v9 }
  0xcf   :  { %v2916_v30 = vsel %vm344_vm2, 1.0, %v5254_v5  ;;  %v2915_v31 = vsel %vm343_vm3, 1.0, %v5254_v5  ;;  %3259 = vmatmul.mubr.msk.bf16.gmra.mrb[28].mxu0 %vm527_vm4, %v506_v27 }
  0xd0   :  { %v507_v32 = vpack.c.bf16 %v2916_v30, %v2915_v31 }
  0xd1   :  { %v238_v33 = vpop.permute.xlu1 %237  ;;  %v235_v34 = vpop.permute.xlu0 %234 }
  0xd2   :  { %vm346_vm5 = vcmp.eq.s32.totalorder %v238_v33, %v4067_v9  ;;  %vm345_vm6 = vcmp.eq.s32.totalorder %v235_v34, %v4067_v9  ;;  %3262 = vmatprep.mubr.msk.bf16.mxu0 %vm527_vm4, %v507_v32 }
  0xd3   :  { %v2918_v35 = vsel %vm346_vm5, 1.0, %v5254_v5  ;;  %v2917_v36 = vsel %vm345_vm6, 1.0, %v5254_v5 }
  0xd4   :  { %v508_v37 = vpack.c.bf16 %v2918_v35, %v2917_v36 }
  0xd5   :  { %v244_v38 = vpop.permute.xlu1 %243  ;;  %v241_v39 = vpop.permute.xlu0 %240 }
  0xd6   :  { %vm348_vm7 = vcmp.eq.s32.totalorder %v244_v38, %v4067_v9  ;;  %vm347_vm8 = vcmp.eq.s32.totalorder %v241_v39, %v4067_v9 }
  0xd7   :  { %v2920_v40 = vsel %vm348_vm7, 1.0, %v5254_v5  ;;  %v2919_v41 = vsel %vm347_vm8, 1.0, %v5254_v5  ;;  %3263 = vmatmul.mubr.msk.bf16.gmra.mrb[32].mxu0 %vm527_vm4, %v508_v37  ;;  %vm3752_vm8 = vmmov 0  }
  0xd8   :  { %v509_v42 = vpack.c.bf16 %v2920_v40, %v2919_v41  ;;  %3302 = vmatprep.mubr.msk.bf16.mxu1 %vm3752_vm8, %v5254_v5 }
  0xd9   :  { %v250_v43 = vpop.permute.xlu1 %249  ;;  %v247_v44 = vpop.permute.xlu0 %246 }
  0xda   :  { %vm350_vm9 = vcmp.eq.s32.totalorder %v250_v43, %v4067_v9  ;;  %vm349_vm10 = vcmp.eq.s32.totalorder %v247_v44, %v4067_v9  ;;  %3266 = vmatprep.mubr.msk.bf16.mxu0 %vm527_vm4, %v509_v42 }
  0xdb   :  { %v2922_v45 = vsel %vm350_vm9, 1.0, %v5254_v5  ;;  %v2921_v46 = vsel %vm349_vm10, 1.0, %v5254_v5 }
  0xdc   :  { %v510_v47 = vpack.c.bf16 %v2922_v45, %v2921_v46  ;;  %v3689_v46 = vld [vmem:[%s5266_s23] sm:$0xff]  }
  0xdd   :  { %v256_v48 = vpop.permute.xlu1 %255  ;;  %v253_v49 = vpop.permute.xlu0 %252 }
  0xde   :  { %vm352_vm11 = vcmp.eq.s32.totalorder %v256_v48, %v4067_v9  ;;  %vm351_vm12 = vcmp.eq.s32.totalorder %v253_v49, %v4067_v9 }
  0xdf   :  { %v2924_v50 = vsel %vm352_vm11, 1.0, %v5254_v5  ;;  %v2923_v51 = vsel %vm351_vm12, 1.0, %v5254_v5  ;;  %3267 = vmatmul.mubr.msk.bf16.gmra.mrb[36].mxu0 %vm527_vm4, %v510_v47 }
  0xe0   :  { %v511_v52 = vpack.c.bf16 %v2924_v50, %v2923_v51 }
  0xe1   :  { %v262_v53 = vpop.permute.xlu1 %261  ;;  %v259_v54 = vpop.permute.xlu0 %258 }
  0xe2   :  { %vm354_vm13 = vcmp.eq.s32.totalorder %v262_v53, %v4067_v9  ;;  %vm353_vm14 = vcmp.eq.s32.totalorder %v259_v54, %v4067_v9  ;;  %3270 = vmatprep.mubr.msk.bf16.mxu0 %vm527_vm4, %v511_v52  ;;  %v3690_v53 = vld [vmem:[%s5266_s23 + $0x8] sm:$0xff]  }
  0xe3   :  { %v2926_v55 = vsel %vm354_vm13, 1.0, %v5254_v5  ;;  %v2925_v56 = vsel %vm353_vm14, 1.0, %v5254_v5 }
  0xe4   :  { %v512_v57 = vpack.c.bf16 %v2926_v55, %v2925_v56  ;;  %v3688_v56 = vld [vmem:[%s5266_s23 + $0x20] sm:$0xff]  }
  0xe5   :  { %v268_v58 = vpop.permute.xlu1 %267  ;;  %v265_v59 = vpop.permute.xlu0 %264 }
  0xe6   :  { %vm356_vm15 = vcmp.eq.s32.totalorder %v268_v58, %v4067_v9  ;;  %vm355_vm0 = vcmp.eq.s32.totalorder %v265_v59, %v4067_v9 }
  0xe7   :  { %v2928_v60 = vsel %vm356_vm15, 1.0, %v5254_v5  ;;  %v2927_v61 = vsel %vm355_vm0, 1.0, %v5254_v5  ;;  %3271 = vmatmul.mubr.msk.bf16.gmra.mrb[40].mxu0 %vm527_vm4, %v512_v57 }
  0xe8   :  { %v513_v62 = vpack.c.bf16 %v2928_v60, %v2927_v61 }
  0xe9   :  { %v274_v63 = vpop.permute.xlu1 %273  ;;  %v271_v0 = vpop.permute.xlu0 %270 }
  0xea   :  { %vm358_vm1 = vcmp.eq.s32.totalorder %v274_v63, %v4067_v9  ;;  %vm357_vm2 = vcmp.eq.s32.totalorder %v271_v0, %v4067_v9  ;;  %3274 = vmatprep.mubr.msk.bf16.mxu0 %vm527_vm4, %v513_v62  ;;  %v3691_v63 = vld [vmem:[%s5266_s23 + $0x28] sm:$0xff]  }
  0xeb   :  { %v2930_v1 = vsel %vm358_vm1, 1.0, %v5254_v5  ;;  %v2929_v2 = vsel %vm357_vm2, 1.0, %v5254_v5  ;;  %vm2083_vm1 = vcmask 130048  }
  0xec   :  { %v514_v3 = vpack.c.bf16 %v2930_v1, %v2929_v2 }
  0xed   :  { %v280_v4 = vpop.permute.xlu1 %279  ;;  %v277_v6 = vpop.permute.xlu0 %276 }
  0xee   :  { %vm360_vm3 = vcmp.eq.s32.totalorder %v280_v4, %v4067_v9  ;;  %vm359_vm5 = vcmp.eq.s32.totalorder %v277_v6, %v4067_v9 }
  0xef   :  { %v2932_v8 = vsel %vm360_vm3, 1.0, %v5254_v5  ;;  %v2931_v10 = vsel %vm359_vm5, 1.0, %v5254_v5  ;;  %3275 = vmatmul.mubr.msk.bf16.gmra.mrb[44].mxu0 %vm527_vm4, %v514_v3 }
  0xf0   :  { %v515_v11 = vpack.c.bf16 %v2932_v8, %v2931_v10 }
  0xf1   :  { %v286_v12 = vpop.permute.xlu1 %285  ;;  %v283_v13 = vpop.permute.xlu0 %282 }
  0xf2   :  { %vm362_vm6 = vcmp.eq.s32.totalorder %v286_v12, %v4067_v9  ;;  %vm361_vm7 = vcmp.eq.s32.totalorder %v283_v13, %v4067_v9  ;;  %3278 = vmatprep.mubr.msk.bf16.mxu0 %vm527_vm4, %v515_v11 }
  0xf3   :  { %v2934_v15 = vsel %vm362_vm6, 1.0, %v5254_v5  ;;  %v2933_v16 = vsel %vm361_vm7, 1.0, %v5254_v5  ;;  %vm2780_vm7 = vcmask 39936  }
  0xf4   :  { %v516_v17 = vpack.c.bf16 %v2934_v15, %v2933_v16 }
  0xf5   :  { %v292_v18 = vpop.permute.xlu1 %291  ;;  %v289_v19 = vpop.permute.xlu0 %288 }
  0xf6   :  { %vm364_vm9 = vcmp.eq.s32.totalorder %v292_v18, %v4067_v9  ;;  %vm363_vm10 = vcmp.eq.s32.totalorder %v289_v19, %v4067_v9 }
  0xf7   :  { %v2936_v20 = vsel %vm364_vm9, 1.0, %v5254_v5  ;;  %v2935_v21 = vsel %vm363_vm10, 1.0, %v5254_v5  ;;  %3279 = vmatmul.mubr.msk.bf16.gmra.mrb[48].mxu0 %vm527_vm4, %v516_v17  ;;  %vm2851_vm9 = vcmask 0  }
  0xf8   :  { %v517_v22 = vpack.c.bf16 %v2936_v20, %v2935_v21 }
  0xf9   :  { %v298_v23 = vpop.permute.xlu1 %297  ;;  %v295_v24 = vpop.permute.xlu0 %294 }
  0xfa   :  { %vm366_vm11 = vcmp.eq.s32.totalorder %v298_v23, %v4067_v9  ;;  %vm365_vm12 = vcmp.eq.s32.totalorder %v295_v24, %v4067_v9  ;;  %3282 = vmatprep.mubr.msk.bf16.mxu0 %vm527_vm4, %v517_v22 }
  0xfb   :  { %v2938_v25 = vsel %vm366_vm11, 1.0, %v5254_v5  ;;  %v2937_v26 = vsel %vm365_vm12, 1.0, %v5254_v5 }
  0xfc   :  { %v518_v27 = vpack.c.bf16 %v2938_v25, %v2937_v26 }
  0xfd   :  { %v304_v28 = vpop.permute.xlu1 %303  ;;  %v301_v29 = vpop.permute.xlu0 %300 }
  0xfe   :  { %vm368_vm13 = vcmp.eq.s32.totalorder %v304_v28, %v4067_v9  ;;  %vm367_vm14 = vcmp.eq.s32.totalorder %v301_v29, %v4067_v9 }
  0xff   :  { %v2940_v30 = vsel %vm368_vm13, 1.0, %v5254_v5  ;;  %v2939_v31 = vsel %vm367_vm14, 1.0, %v5254_v5  ;;  %3283 = vmatmul.mubr.msk.bf16.gmra.mrb[52].mxu0 %vm527_vm4, %v518_v27 }
 0x100   :  { %v519_v32 = vpack.c.bf16 %v2940_v30, %v2939_v31 }
 0x101   :  { %v310_v33 = vpop.permute.xlu1 %309  ;;  %v307_v34 = vpop.permute.xlu0 %306 }
 0x102   :  { %vm370_vm15 = vcmp.eq.s32.totalorder %v310_v33, %v4067_v9  ;;  %vm369_vm0 = vcmp.eq.s32.totalorder %v307_v34, %v4067_v9  ;;  %3286 = vmatprep.mubr.msk.bf16.mxu0 %vm527_vm4, %v519_v32 }
 0x103   :  { %v2942_v35 = vsel %vm370_vm15, 1.0, %v5254_v5  ;;  %v2941_v36 = vsel %vm369_vm0, 1.0, %v5254_v5 }
 0x104   :  { %v520_v37 = vpack.c.bf16 %v2942_v35, %v2941_v36 }
 0x107   :  { %3287 = vmatmul.mubr.msk.bf16.gmra.mrb[56].mxu0 %vm527_vm4, %v520_v37 }
 0x108   :  { %3294 = vmatprep.mubr.msk.bf16.mxu0 %vm3752_vm8, %v5254_v5 }
 0x16a   :  { %v3232_v38 = vpop.f32.mrb[0].mxu0 }
 0x16b   :  { %v652_v39 = vpop.f32.mrb[1].mxu0 }
 0x16c   :  { %v3233_v40 = vpop.f32.mrb[2].mxu0 }
 0x16d   :  { %v892_v41 = vpack.c.bf16 %v3233_v40, %v3232_v38  ;;  %v655_v42 = vpop.f32.mrb[3].mxu0 }
 0x16e   :  { %v891_v43 = vpack.c.bf16 %v655_v42, %v652_v39 }
 0x172   :  { %v3236_v44 = vpop.f32.mrb[4].mxu0 }
 0x173   :  { %v4233_v45 = vpop.f32.mrb[5].mxu0 }
 0x174   :  { %v922_v47 = vpack.c.bf16 %v4233_v45, %v3233_v40  ;;  %v3237_v48 = vpop.f32.mrb[6].mxu0 }
 0x175   :  { %v4239_v49 = vpack.c.bf16 %v3237_v48, %v3236_v44  ;;  %v671_v50 = vpop.f32.mrb[7].mxu0 }
 0x176   :  { %v893_v51 = vpack.c.bf16 %v671_v50, %v4233_v45  ;;  %v923_v52 = vpack.c.bf16 %v3236_v44, %v671_v50  ;;  %3295 = vmatmul.mubr.msk.bf16.vlgmr.msra.gmra.mrb[60].mxu0 %vm527_vm4, %v922_v47 }
 0x177   :  { %3298 = vmatprep.mubr.msk.bf16.mxu0 %vm3752_vm8, %v5254_v5  ;;  %3403 = vmatpush3.bf16.msra.mxu0 %v3689_v46 }
 0x178   :  { %3404 = vmatprep.subr.bf16.mxu0 %v5254_v5 }
 0x17a   :  { %v3240_v54 = vpop.f32.mrb[8].mxu0 }
 0x17b   :  { %v684_v55 = vpop.f32.mrb[9].mxu0  ;;  %3405 = vmatpush3.bf16.msra.mxu0 %v3690_v53 }
 0x17c   :  { %v924_v57 = vpack.c.bf16 %v684_v55, %v3237_v48  ;;  %v3241_v58 = vpop.f32.mrb[10].mxu0 }
 0x17d   :  { %v4252_v59 = vpack.c.bf16 %v3241_v58, %v3240_v54  ;;  %v687_v60 = vpop.f32.mrb[11].mxu0 }
 0x17e   :  { %v4254_v61 = vpack.c.bf16 %v687_v60, %v684_v55  ;;  %v925_v62 = vpack.c.bf16 %v3240_v54, %v687_v60  ;;  %3299 = vmatmul.mubr.msk.bf16.gmra.mrb[64].mxu0 %vm527_vm4, %v923_v52  ;;  %3303 = vmatmul.mubr.msk.bf16.vlgmr.msra.gmra.mrb[0].mxu1 %vm527_vm4, %v924_v57 }
 0x17f   :  { %3515 = vmatpush3.bf16.msra.mxu1 %v3688_v56  ;;  %3306 = vmatprep.mubr.msk.bf16.mxu1 %vm3752_vm8, %v5254_v5 }
 0x180   :  { %3406 = vmatprep.mubr.msk.bf16.mxu0 %vm3752_vm8, %v5254_v5  ;;  %3516 = vmatprep.subr.bf16.mxu1 %v5254_v5 }
 0x182   :  { %v3244_v0 = vpop.f32.mrb[12].mxu0 }
 0x183   :  { %v700_v1 = vpop.f32.mrb[13].mxu0  ;;  %3517 = vmatpush3.bf16.msra.mxu1 %v3691_v63 }
 0x184   :  { %v926_v2 = vpack.c.bf16 %v700_v1, %v3241_v58  ;;  %v3245_v3 = vpop.f32.mrb[14].mxu0 }
 0x185   :  { %v4266_v4 = vpack.c.bf16 %v3245_v3, %v3244_v0  ;;  %v703_v6 = vpop.f32.mrb[15].mxu0 }
 0x186   :  { %v4268_v7 = vpack.c.bf16 %v703_v6, %v700_v1  ;;  %v927_v8 = vpack.c.bf16 %v3244_v0, %v703_v6  ;;  %3307 = vmatmul.mubr.msk.bf16.gmra.mrb[4].mxu1 %vm527_vm4, %v925_v62  ;;  %3407 = vmatmul.mubr.msk.bf16.vlgmr.msra.gmra.mrb[68].mxu0 %vm527_vm4, %v891_v43 }
 0x187   :  { %3310 = vmatprep.mubr.msk.bf16.mxu1 %vm3752_vm8, %v5254_v5  ;;  %3410 = vmatprep.mubr.msk.bf16.mxu0 %vm3752_vm8, %v5254_v5 }
 0x18a   :  { %v3248_v10 = vpop.f32.mrb[16].mxu0 }
 0x18b   :  { %v716_v11 = vpop.f32.mrb[17].mxu0 }
 0x18c   :  { %v928_v12 = vpack.c.bf16 %v716_v11, %v3245_v3  ;;  %v3249_v13 = vpop.f32.mrb[18].mxu0 }
 0x18d   :  { %v4276_v14 = vpack.c.bf16 %v3249_v13, %v3248_v10  ;;  %v719_v15 = vpop.f32.mrb[19].mxu0 }
 0x18e   :  { %v4278_v16 = vpack.c.bf16 %v719_v15, %v716_v11  ;;  %v929_v17 = vpack.c.bf16 %v3248_v10, %v719_v15  ;;  %3311 = vmatmul.mubr.msk.bf16.gmra.mrb[8].mxu1 %vm527_vm4, %v926_v2  ;;  %3411 = vmatmul.mubr.msk.bf16.gmra.mrb[72].mxu0 %vm527_vm4, %v892_v41 }
 0x18f   :  { %3314 = vmatprep.mubr.msk.bf16.mxu1 %vm3752_vm8, %v5254_v5  ;;  %3414 = vmatprep.mubr.msk.bf16.mxu0 %vm3752_vm8, %v5254_v5 }
 0x192   :  { %v3252_v18 = vpop.f32.mrb[20].mxu0 }
 0x193   :  { %v732_v19 = vpop.f32.mrb[21].mxu0 }
 0x194   :  { %v930_v20 = vpack.c.bf16 %v732_v19, %v3249_v13  ;;  %v4286_v21 = vpop.f32.mrb[22].mxu0 }
 0x195   :  { %v4289_v22 = vpack.c.bf16 %v4286_v21, %v3252_v18  ;;  %v735_v23 = vpop.f32.mrb[23].mxu0 }
 0x196   :  { %v4291_v24 = vpack.c.bf16 %v735_v23, %v732_v19  ;;  %v931_v25 = vpack.c.bf16 %v3252_v18, %v735_v23  ;;  %3315 = vmatmul.mubr.msk.bf16.gmra.mrb[12].mxu1 %vm527_vm4, %v927_v8  ;;  %3415 = vmatmul.mubr.msk.bf16.gmra.mrb[76].mxu0 %vm527_vm4, %v893_v51 }
 0x197   :  { %3318 = vmatprep.mubr.msk.bf16.mxu1 %vm3752_vm8, %v5254_v5  ;;  %3418 = vmatprep.mubr.msk.bf16.mxu0 %vm3752_vm8, %v5254_v5 }
 0x19a   :  { %v4299_v26 = vpop.f32.mrb[24].mxu0 }
 0x19b   :  { %v748_v27 = vpop.f32.mrb[25].mxu0 }
 0x19c   :  { %v932_v28 = vpack.c.bf16 %v748_v27, %v4286_v21  ;;  %v4302_v29 = vpop.f32.mrb[26].mxu0 }
 0x19d   :  { %v4306_v30 = vpack.c.bf16 %v4302_v29, %v4299_v26  ;;  %v4308_v31 = vpop.f32.mrb[27].mxu0 }
 0x19e   :  { %v4311_v32 = vpack.c.bf16 %v4308_v31, %v748_v27  ;;  %v933_v33 = vpack.c.bf16 %v4299_v26, %v4308_v31  ;;  %3319 = vmatmul.mubr.msk.bf16.gmra.mrb[16].mxu1 %vm527_vm4, %v928_v12  ;;  %3419 = vmatmul.mubr.msk.bf16.gmra.mrb[80].mxu0 %vm527_vm4, %v4239_v49 }
 0x19f   :  { %3322 = vmatprep.mubr.msk.bf16.mxu1 %vm3752_vm8, %v5254_v5  ;;  %3422 = vmatprep.mubr.msk.bf16.mxu0 %vm3752_vm8, %v5254_v5 }
 0x1a2   :  { %v4322_v34 = vpop.f32.mrb[28].mxu0 }
 0x1a3   :  { %v4324_v35 = vpop.f32.mrb[29].mxu0 }
 0x1a4   :  { %v934_v36 = vpack.c.bf16 %v4324_v35, %v4302_v29  ;;  %v4328_v37 = vpop.f32.mrb[30].mxu0 }
 0x1a5   :  { %v4332_v38 = vpack.c.bf16 %v4328_v37, %v4322_v34  ;;  %v4334_v39 = vpop.f32.mrb[31].mxu0 }
 0x1a6   :  { %v4338_v40 = vpack.c.bf16 %v4334_v39, %v4324_v35  ;;  %v935_v41 = vpack.c.bf16 %v4322_v34, %v4334_v39  ;;  %3323 = vmatmul.mubr.msk.bf16.gmra.mrb[20].mxu1 %vm527_vm4, %v929_v17  ;;  %3423 = vmatmul.mubr.msk.bf16.gmra.mrb[84].mxu0 %vm527_vm4, %v4254_v61 }
 0x1a7   :  { %3326 = vmatprep.mubr.msk.bf16.mxu1 %vm3752_vm8, %v5254_v5  ;;  %3426 = vmatprep.mubr.msk.bf16.mxu0 %vm3752_vm8, %v5254_v5 }
 0x1aa   :  { %v4349_v42 = vpop.f32.mrb[32].mxu0 }
 0x1ab   :  { %v4351_v43 = vpop.f32.mrb[33].mxu0 }
 0x1ac   :  { %v936_v44 = vpack.c.bf16 %v4351_v43, %v4328_v37  ;;  %v4355_v45 = vpop.f32.mrb[34].mxu0 }
 0x1ad   :  { %v4359_v46 = vpack.c.bf16 %v4355_v45, %v4349_v42  ;;  %v4361_v47 = vpop.f32.mrb[35].mxu0 }
 0x1ae   :  { %v4365_v48 = vpack.c.bf16 %v4361_v47, %v4351_v43  ;;  %v937_v50 = vpack.c.bf16 %v4349_v42, %v4361_v47  ;;  %3327 = vmatmul.mubr.msk.bf16.gmra.mrb[24].mxu1 %vm527_vm4, %v930_v20  ;;  %3427 = vmatmul.mubr.msk.bf16.gmra.mrb[88].mxu0 %vm527_vm4, %v4252_v59 }
 0x1af   :  { %3330 = vmatprep.mubr.msk.bf16.mxu1 %vm3752_vm8, %v5254_v5  ;;  %3430 = vmatprep.mubr.msk.bf16.mxu0 %vm3752_vm8, %v5254_v5 }
 0x1b2   :  { %v4376_v51 = vpop.f32.mrb[36].mxu0 }
 0x1b3   :  { %v4378_v52 = vpop.f32.mrb[37].mxu0 }
 0x1b4   :  { %v938_v53 = vpack.c.bf16 %v4378_v52, %v4355_v45  ;;  %v4382_v54 = vpop.f32.mrb[38].mxu0 }
 0x1b5   :  { %v4386_v55 = vpack.c.bf16 %v4382_v54, %v4376_v51  ;;  %v4388_v56 = vpop.f32.mrb[39].mxu0 }
 0x1b6   :  { %v4392_v57 = vpack.c.bf16 %v4388_v56, %v4378_v52  ;;  %v939_v58 = vpack.c.bf16 %v4376_v51, %v4388_v56  ;;  %3331 = vmatmul.mubr.msk.bf16.gmra.mrb[28].mxu1 %vm527_vm4, %v931_v25  ;;  %3431 = vmatmul.mubr.msk.bf16.gmra.mrb[92].mxu0 %vm527_vm4, %v4268_v7 }
 0x1b7   :  { %3334 = vmatprep.mubr.msk.bf16.mxu1 %vm3752_vm8, %v5254_v5  ;;  %3434 = vmatprep.mubr.msk.bf16.mxu0 %vm3752_vm8, %v5254_v5 }
 0x1ba   :  { %v4403_v60 = vpop.f32.mrb[40].mxu0 }
 0x1bb   :  { %v4405_v62 = vpop.f32.mrb[41].mxu0 }
 0x1bc   :  { %v940_v63 = vpack.c.bf16 %v4405_v62, %v4382_v54  ;;  %v4409_v0 = vpop.f32.mrb[42].mxu0 }
 0x1bd   :  { %v4413_v1 = vpack.c.bf16 %v4409_v0, %v4403_v60  ;;  %v4415_v2 = vpop.f32.mrb[43].mxu0 }
 0x1be   :  { %v4419_v3 = vpack.c.bf16 %v4415_v2, %v4405_v62  ;;  %v941_v6 = vpack.c.bf16 %v4403_v60, %v4415_v2  ;;  %3335 = vmatmul.mubr.msk.bf16.gmra.mrb[32].mxu1 %vm527_vm4, %v932_v28  ;;  %3435 = vmatmul.mubr.msk.bf16.gmra.mrb[96].mxu0 %vm527_vm4, %v4266_v4 }
 0x1bf   :  { %3338 = vmatprep.mubr.msk.bf16.mxu1 %vm3752_vm8, %v5254_v5  ;;  %3438 = vmatprep.mubr.msk.bf16.mxu0 %vm3752_vm8, %v5254_v5 }
 0x1c2   :  { %v4430_v8 = vpop.f32.mrb[44].mxu0 }
 0x1c3   :  { %v4432_v10 = vpop.f32.mrb[45].mxu0 }
 0x1c4   :  { %v942_v11 = vpack.c.bf16 %v4432_v10, %v4409_v0  ;;  %v4436_v12 = vpop.f32.mrb[46].mxu0 }
 0x1c5   :  { %v4440_v13 = vpack.c.bf16 %v4436_v12, %v4430_v8  ;;  %v4442_v15 = vpop.f32.mrb[47].mxu0 }
 0x1c6   :  { %v4446_v17 = vpack.c.bf16 %v4442_v15, %v4432_v10  ;;  %v943_v18 = vpack.c.bf16 %v4430_v8, %v4442_v15  ;;  %3339 = vmatmul.mubr.msk.bf16.gmra.mrb[36].mxu1 %vm527_vm4, %v933_v33  ;;  %3439 = vmatmul.mubr.msk.bf16.gmra.mrb[100].mxu0 %vm527_vm4, %v4278_v16 }
 0x1c7   :  { %3342 = vmatprep.mubr.msk.bf16.mxu1 %vm3752_vm8, %v5254_v5  ;;  %3442 = vmatprep.mubr.msk.bf16.mxu0 %vm3752_vm8, %v5254_v5 }
 0x1ca   :  { %v4457_v19 = vpop.f32.mrb[48].mxu0 }
 0x1cb   :  { %v4459_v20 = vpop.f32.mrb[49].mxu0 }
 0x1cc   :  { %v944_v21 = vpack.c.bf16 %v4459_v20, %v4436_v12  ;;  %v4463_v23 = vpop.f32.mrb[50].mxu0 }
 0x1cd   :  { %v4467_v25 = vpack.c.bf16 %v4463_v23, %v4457_v19  ;;  %v4469_v26 = vpop.f32.mrb[51].mxu0 }
 0x1ce   :  { %v4473_v27 = vpack.c.bf16 %v4469_v26, %v4459_v20  ;;  %v945_v28 = vpack.c.bf16 %v4457_v19, %v4469_v26  ;;  %3343 = vmatmul.mubr.msk.bf16.gmra.mrb[40].mxu1 %vm527_vm4, %v934_v36  ;;  %3443 = vmatmul.mubr.msk.bf16.gmra.mrb[104].mxu0 %vm527_vm4, %v4276_v14 }
 0x1cf   :  { %3346 = vmatprep.mubr.msk.bf16.mxu1 %vm3752_vm8, %v5254_v5  ;;  %3446 = vmatprep.mubr.msk.bf16.mxu0 %vm3752_vm8, %v5254_v5 }
 0x1d2   :  { %v4487_v31 = vpop.f32.mrb[52].mxu0 }
 0x1d3   :  { %v860_v33 = vpop.f32.mrb[53].mxu0 }
 0x1d4   :  { %v946_v12 = vpack.c.bf16 %v860_v33, %v4463_v23  ;;  %v4490_v19 = vpop.f32.mrb[54].mxu0 }
 0x1d5   :  { %v863_v35 = vpop.f32.mrb[55].mxu0 }
 0x1d6   :  { %v4494_v36 = vpack.c.bf16 %v863_v35, %v860_v33  ;;  %v947_v20 = vpack.c.bf16 %v4487_v31, %v863_v35  ;;  %3347 = vmatmul.mubr.msk.bf16.gmra.mrb[44].mxu1 %vm527_vm4, %v935_v41  ;;  %3447 = vmatmul.mubr.msk.bf16.gmra.mrb[108].mxu0 %vm527_vm4, %v4291_v24 }
 0x1d7   :  { %3350 = vmatprep.mubr.msk.bf16.mxu1 %vm3752_vm8, %v5254_v5  ;;  %3450 = vmatprep.mubr.msk.bf16.mxu0 %vm3752_vm8, %v5254_v5 }
 0x1da   :  { %v4507_v23 = vpop.f32.mrb[56].mxu0 }
 0x1db   :  { %v4509_v26 = vpop.f32.mrb[57].mxu0 }
 0x1dc   :  { %v948_v33 = vpack.c.bf16 %v4509_v26, %v4490_v19  ;;  %v4513_v35 = vpop.f32.mrb[58].mxu0 }
 0x1dd   :  { %v4517_v39 = vpop.f32.mrb[59].mxu0 }
 0x1de   :  { %3351 = vmatmul.mubr.msk.bf16.gmra.mrb[48].mxu1 %vm527_vm4, %v936_v44  ;;  %3451 = vmatmul.mubr.msk.bf16.gmra.mrb[112].mxu0 %vm527_vm4, %v4289_v22 }
 0x1df   :  { %3354 = vmatprep.mubr.msk.bf16.mxu1 %vm3752_vm8, %v5254_v5  ;;  %3454 = vmatprep.mubr.msk.bf16.mxu0 %vm3752_vm8, %v5254_v5 }
 0x1e6   :  { %3355 = vmatmul.mubr.msk.bf16.gmra.mrb[52].mxu1 %vm527_vm4, %v937_v50  ;;  %3455 = vmatmul.mubr.msk.bf16.gmra.mrb[116].mxu0 %vm527_vm4, %v4311_v32 }
 0x1e7   :  { %3358 = vmatprep.mubr.msk.bf16.mxu1 %vm3752_vm8, %v5254_v5  ;;  %3458 = vmatprep.mubr.msk.bf16.mxu0 %vm3752_vm8, %v5254_v5 }
 0x1ee   :  { %3359 = vmatmul.mubr.msk.bf16.gmra.mrb[56].mxu1 %vm527_vm4, %v938_v53  ;;  %3459 = vmatmul.mubr.msk.bf16.gmra.mrb[120].mxu0 %vm527_vm4, %v4306_v30 }
 0x1ef   :  { %3362 = vmatprep.mubr.msk.bf16.mxu1 %vm3752_vm8, %v5254_v5  ;;  %3462 = vmatprep.mubr.msk.bf16.mxu0 %vm3752_vm8, %v5254_v5 }
 0x1f6   :  { %3363 = vmatmul.mubr.msk.bf16.gmra.mrb[60].mxu1 %vm527_vm4, %v939_v58  ;;  %3463 = vmatmul.mubr.msk.bf16.gmra.mrb[124].mxu0 %vm527_vm4, %v4338_v40 }
 0x1f7   :  { %3366 = vmatprep.mubr.msk.bf16.mxu1 %vm3752_vm8, %v5254_v5  ;;  %3466 = vmatprep.mubr.msk.bf16.mxu0 %vm3752_vm8, %v5254_v5 }
 0x1fe   :  { %3367 = vmatmul.mubr.msk.bf16.gmra.mrb[64].mxu1 %vm527_vm4, %v940_v63  ;;  %3467 = vmatmul.mubr.msk.bf16.gmra.mrb[128].mxu0 %vm527_vm4, %v4332_v38 }
 0x1ff   :  { %3370 = vmatprep.mubr.msk.bf16.mxu1 %vm3752_vm8, %v5254_v5  ;;  %3470 = vmatprep.mubr.msk.bf16.mxu0 %vm3752_vm8, %v5254_v5 }
 0x206   :  { %3371 = vmatmul.mubr.msk.bf16.gmra.mrb[68].mxu1 %vm527_vm4, %v941_v6  ;;  %3471 = vmatmul.mubr.msk.bf16.gmra.mrb[132].mxu0 %vm527_vm4, %v4365_v48 }
 0x207   :  { %3374 = vmatprep.mubr.msk.bf16.mxu1 %vm3752_vm8, %v5254_v5  ;;  %3474 = vmatprep.mubr.msk.bf16.mxu0 %vm3752_vm8, %v5254_v5 }
 0x20e   :  { %3375 = vmatmul.mubr.msk.bf16.gmra.mrb[72].mxu1 %vm527_vm4, %v942_v11  ;;  %3475 = vmatmul.mubr.msk.bf16.gmra.mrb[136].mxu0 %vm527_vm4, %v4359_v46 }
 0x20f   :  { %3378 = vmatprep.mubr.msk.bf16.mxu1 %vm3752_vm8, %v5254_v5  ;;  %3478 = vmatprep.mubr.msk.bf16.mxu0 %vm3752_vm8, %v5254_v5 }
 0x216   :  { %3379 = vmatmul.mubr.msk.bf16.gmra.mrb[76].mxu1 %vm527_vm4, %v943_v18  ;;  %3479 = vmatmul.mubr.msk.bf16.gmra.mrb[140].mxu0 %vm527_vm4, %v4392_v57 }
 0x217   :  { %3382 = vmatprep.mubr.msk.bf16.mxu1 %vm3752_vm8, %v5254_v5  ;;  %3482 = vmatprep.mubr.msk.bf16.mxu0 %vm3752_vm8, %v5254_v5 }
 0x21e   :  { %3383 = vmatmul.mubr.msk.bf16.gmra.mrb[80].mxu1 %vm527_vm4, %v944_v21  ;;  %3483 = vmatmul.mubr.msk.bf16.gmra.mrb[144].mxu0 %vm527_vm4, %v4386_v55 }
 0x21f   :  { %3386 = vmatprep.mubr.msk.bf16.mxu1 %vm3752_vm8, %v5254_v5  ;;  %3486 = vmatprep.mubr.msk.bf16.mxu0 %vm3752_vm8, %v5254_v5 }
 0x226   :  { %3387 = vmatmul.mubr.msk.bf16.gmra.mrb[84].mxu1 %vm527_vm4, %v945_v28  ;;  %3487 = vmatmul.mubr.msk.bf16.gmra.mrb[148].mxu0 %vm527_vm4, %v4419_v3 }
 0x227   :  { %3390 = vmatprep.mubr.msk.bf16.mxu1 %vm3752_vm8, %v5254_v5  ;;  %3490 = vmatprep.mubr.msk.bf16.mxu0 %vm3752_vm8, %v5254_v5 }
 0x22e   :  { %3391 = vmatmul.mubr.msk.bf16.gmra.mrb[88].mxu1 %vm527_vm4, %v946_v12  ;;  %3491 = vmatmul.mubr.msk.bf16.gmra.mrb[152].mxu0 %vm527_vm4, %v4413_v1 }
 0x22f   :  { %3394 = vmatprep.mubr.msk.bf16.mxu1 %vm3752_vm8, %v5254_v5  ;;  %3494 = vmatprep.mubr.msk.bf16.mxu0 %vm3752_vm8, %v5254_v5 }
 0x236   :  { %3395 = vmatmul.mubr.msk.bf16.gmra.mrb[92].mxu1 %vm527_vm4, %v947_v20  ;;  %3495 = vmatmul.mubr.msk.bf16.gmra.mrb[156].mxu0 %vm527_vm4, %v4446_v17 }
 0x237   :  { %3398 = vmatprep.mubr.msk.bf16.mxu1 %vm3752_vm8, %v5254_v5  ;;  %3498 = vmatprep.mubr.msk.bf16.mxu0 %vm3752_vm8, %v5254_v5 }
 0x23e   :  { %3399 = vmatmul.mubr.msk.bf16.gmra.mrb[96].mxu1 %vm527_vm4, %v948_v33  ;;  %3499 = vmatmul.mubr.msk.bf16.gmra.mrb[160].mxu0 %vm527_vm4, %v4440_v13 }
 0x23f   :  { %3502 = vmatprep.mubr.msk.bf16.mxu0 %vm3752_vm8, %v5254_v5  ;;  %3518 = vmatprep.mubr.msk.bf16.mxu1 %vm3752_vm8, %v5254_v5 }
 0x246   :  { %3503 = vmatmul.mubr.msk.bf16.gmra.mrb[164].mxu0 %vm527_vm4, %v4473_v27  ;;  %3519 = vmatmul.mubr.msk.bf16.vlgmr.msra.gmra.mrb[100].mxu1 %vm527_vm4, %v4239_v49 }
 0x247   :  { %3506 = vmatprep.mubr.msk.bf16.mxu0 %vm3752_vm8, %v5254_v5  ;;  %3522 = vmatprep.mubr.msk.bf16.mxu1 %vm3752_vm8, %v5254_v5 }
 0x249   :  { %v1080_v37 = vpop.f32.mrb[60].mxu0 }
 0x24a   :  { %v3296_v42 = vpop.f32.mrb[61].mxu0 }
 0x24b   :  { %v1083_v43 = vpop.f32.mrb[62].mxu0 }
 0x24c   :  { %v3297_v44 = vpop.f32.mrb[63].mxu0 }
 0x24e   :  { %3507 = vmatmul.mubr.msk.bf16.gmra.mrb[168].mxu0 %vm527_vm4, %v4467_v25  ;;  %3523 = vmatmul.mubr.msk.bf16.gmra.mrb[104].mxu1 %vm527_vm4, %v4254_v61 }
 0x24f   :  { %3510 = vmatprep.mubr.msk.bf16.mxu0 %vm3752_vm8, %v5254_v5  ;;  %3526 = vmatprep.mubr.msk.bf16.mxu1 %vm3752_vm8, %v5254_v5 }
 0x251   :  { %v1088_v49 = vpop.f32.mrb[64].mxu0  ;;  %v1096_v45 = vpop.f32.mrb[0].mxu1 }
 0x252   :  { %v3300_v47 = vpop.f32.mrb[65].mxu0  ;;  %v3304_v50 = vpop.f32.mrb[1].mxu1 }
 0x253   :  { %v1091_v51 = vpop.f32.mrb[66].mxu0  ;;  %v1099_v52 = vpop.f32.mrb[2].mxu1 }
 0x254   :  { %v3301_v53 = vpop.f32.mrb[67].mxu0  ;;  %v3305_v54 = vpop.f32.mrb[3].mxu1 }
 0x256   :  { %3511 = vmatmul.mubr.msk.bf16.gmra.mrb[172].mxu0 %vm527_vm4, %v4494_v36  ;;  %3527 = vmatmul.mubr.msk.bf16.gmra.mrb[108].mxu1 %vm527_vm4, %v4252_v59 }
 0x257   :  { %3530 = vmatprep.mubr.msk.bf16.mxu1 %vm3752_vm8, %v5254_v5 }
 0x259   :  { %v1104_v61 = vpop.f32.mrb[4].mxu1  ;;  %v1422_v56 = vpop.f32.mrb[68].mxu0 }
 0x25a   :  { %v4658_v58 = vadd.f32 %v1422_v56, %v1080_v37  ;;  %v3308_v60 = vpop.f32.mrb[5].mxu1  ;;  %v3408_v62 = vpop.f32.mrb[69].mxu0 }
 0x25b   :  { %v1107_v63 = vpop.f32.mrb[6].mxu1  ;;  %v1425_v0 = vpop.f32.mrb[70].mxu0 }
 0x25c   :  { %v4660_v2 = vadd.f32 %v1425_v0, %v1083_v43  ;;  %v3309_v6 = vpop.f32.mrb[7].mxu1  ;;  %v3409_v8 = vpop.f32.mrb[71].mxu0 }
 0x25e   :  { %3531 = vmatmul.mubr.msk.bf16.gmra.mrb[112].mxu1 %vm527_vm4, %v4268_v7 }
 0x25f   :  { %3534 = vmatprep.mubr.msk.bf16.mxu1 %vm3752_vm8, %v5254_v5 }
 0x261   :  { %v1112_v59 = vpop.f32.mrb[8].mxu1  ;;  %v1430_v10 = vpop.f32.mrb[72].mxu0 }
 0x262   :  { %v4666_v11 = vadd.f32 %v1430_v10, %v1088_v49  ;;  %v3312_v15 = vpop.f32.mrb[9].mxu1  ;;  %v3412_v18 = vpop.f32.mrb[73].mxu0 }
 0x263   :  { %v1115_v21 = vpop.f32.mrb[10].mxu1  ;;  %v1433_v28 = vpop.f32.mrb[74].mxu0 }
 0x264   :  { %v4668_v12 = vadd.f32 %v1433_v28, %v1091_v51  ;;  %v3313_v20 = vpop.f32.mrb[11].mxu1  ;;  %v3413_v33 = vpop.f32.mrb[75].mxu0 }
 0x266   :  { %3535 = vmatmul.mubr.msk.bf16.gmra.mrb[116].mxu1 %vm527_vm4, %v4266_v4 }
 0x267   :  { %3538 = vmatprep.mubr.msk.bf16.mxu1 %vm3752_vm8, %v5254_v5 }
 0x269   :  { %v1120_v7 = vpop.f32.mrb[12].mxu1  ;;  %v1438_v37 = vpop.f32.mrb[76].mxu0 }
 0x26a   :  { %v4674_v42 = vadd.f32 %v1438_v37, %v1096_v45  ;;  %v3316_v43 = vpop.f32.mrb[13].mxu1  ;;  %v3416_v44 = vpop.f32.mrb[77].mxu0 }
 0x26b   :  { %v1123_v49 = vpop.f32.mrb[14].mxu1  ;;  %v1441_v47 = vpop.f32.mrb[78].mxu0 }
 0x26c   :  { %v4676_v50 = vadd.f32 %v1441_v47, %v1099_v52  ;;  %v3317_v51 = vpop.f32.mrb[15].mxu1  ;;  %v3417_v53 = vpop.f32.mrb[79].mxu0 }
 0x26e   :  { %3539 = vmatmul.mubr.msk.bf16.gmra.mrb[120].mxu1 %vm527_vm4, %v4278_v16 }
 0x26f   :  { %3542 = vmatprep.mubr.msk.bf16.mxu1 %vm3752_vm8, %v5254_v5 }
 0x271   :  { %v1128_v4 = vpop.f32.mrb[16].mxu1  ;;  %v1446_v54 = vpop.f32.mrb[80].mxu0 }
 0x272   :  { %v4682_v56 = vadd.f32 %v1446_v54, %v1104_v61  ;;  %v3320_v45 = vpop.f32.mrb[17].mxu1  ;;  %v3420_v60 = vpop.f32.mrb[81].mxu0 }
 0x273   :  { %v1131_v62 = vpop.f32.mrb[18].mxu1  ;;  %v1449_v0 = vpop.f32.mrb[82].mxu0 }
 0x274   :  { %v4684_v6 = vadd.f32 %v1449_v0, %v1107_v63  ;;  %v3321_v52 = vpop.f32.mrb[19].mxu1  ;;  %v3421_v8 = vpop.f32.mrb[83].mxu0 }
 0x276   :  { %3543 = vmatmul.mubr.msk.bf16.gmra.mrb[124].mxu1 %vm527_vm4, %v4276_v14 }
 0x277   :  { %3546 = vmatprep.mubr.msk.bf16.mxu1 %vm3752_vm8, %v5254_v5 }
 0x279   :  { %v1136_v16 = vpop.f32.mrb[20].mxu1  ;;  %v1454_v10 = vpop.f32.mrb[84].mxu0 }
 0x27a   :  { %v4690_v15 = vadd.f32 %v1454_v10, %v1112_v59  ;;  %v3324_v61 = vpop.f32.mrb[21].mxu1  ;;  %v3424_v18 = vpop.f32.mrb[85].mxu0 }
 0x27b   :  { %v1139_v28 = vpop.f32.mrb[22].mxu1  ;;  %v1457_v20 = vpop.f32.mrb[86].mxu0 }
 0x27c   :  { %v4692_v33 = vadd.f32 %v1457_v20, %v1115_v21  ;;  %v3325_v63 = vpop.f32.mrb[23].mxu1  ;;  %v3425_v37 = vpop.f32.mrb[87].mxu0 }
 0x27e   :  { %3547 = vmatmul.mubr.msk.bf16.gmra.mrb[128].mxu1 %vm527_vm4, %v4291_v24 }
 0x27f   :  { %3550 = vmatprep.mubr.msk.bf16.mxu1 %vm3752_vm8, %v5254_v5 }
 0x281   :  { %v1144_v14 = vpop.f32.mrb[24].mxu1  ;;  %v1462_v43 = vpop.f32.mrb[88].mxu0 }
 0x282   :  { %v4698_v44 = vadd.f32 %v1462_v43, %v1120_v7  ;;  %v3328_v59 = vpop.f32.mrb[25].mxu1  ;;  %v3428_v47 = vpop.f32.mrb[89].mxu0 }
 0x283   :  { %v1147_v51 = vpop.f32.mrb[26].mxu1  ;;  %v1465_v53 = vpop.f32.mrb[90].mxu0 }
 0x284   :  { %v4700_v54 = vadd.f32 %v1465_v53, %v1123_v49  ;;  %v3329_v21 = vpop.f32.mrb[27].mxu1  ;;  %v3429_v45 = vpop.f32.mrb[91].mxu0 }
 0x286   :  { %3551 = vmatmul.mubr.msk.bf16.gmra.mrb[132].mxu1 %vm527_vm4, %v4289_v22 }
 0x287   :  { %3554 = vmatprep.mubr.msk.bf16.mxu1 %vm3752_vm8, %v5254_v5 }
 0x289   :  { %v1152_v24 = vpop.f32.mrb[28].mxu1  ;;  %v1470_v60 = vpop.f32.mrb[92].mxu0 }
 0x28a   :  { %v4706_v0 = vadd.f32 %v1470_v60, %v1128_v4  ;;  %v3332_v7 = vpop.f32.mrb[29].mxu1  ;;  %v3432_v52 = vpop.f32.mrb[93].mxu0 }
 0x28b   :  { %v1155_v8 = vpop.f32.mrb[30].mxu1  ;;  %v1473_v10 = vpop.f32.mrb[94].mxu0 }
 0x28c   :  { %v4708_v61 = vadd.f32 %v1473_v10, %v1131_v62  ;;  %v3333_v49 = vpop.f32.mrb[31].mxu1  ;;  %v3433_v18 = vpop.f32.mrb[95].mxu0 }
 0x28e   :  { %3555 = vmatmul.mubr.msk.bf16.gmra.mrb[136].mxu1 %vm527_vm4, %v4311_v32 }
 0x28f   :  { %3558 = vmatprep.mubr.msk.bf16.mxu1 %vm3752_vm8, %v5254_v5 }
 0x291   :  { %v1160_v22 = vpop.f32.mrb[32].mxu1  ;;  %v1478_v20 = vpop.f32.mrb[96].mxu0 }
 0x292   :  { %v4714_v63 = vadd.f32 %v1478_v20, %v1136_v16  ;;  %v3336_v4 = vpop.f32.mrb[33].mxu1  ;;  %v3436_v37 = vpop.f32.mrb[97].mxu0 }
 0x293   :  { %v1163_v43 = vpop.f32.mrb[34].mxu1  ;;  %v1481_v59 = vpop.f32.mrb[98].mxu0 }
 0x294   :  { %v4716_v47 = vadd.f32 %v1481_v59, %v1139_v28  ;;  %v3337_v62 = vpop.f32.mrb[35].mxu1  ;;  %v3437_v53 = vpop.f32.mrb[99].mxu0 }
 0x296   :  { %3559 = vmatmul.mubr.msk.bf16.gmra.mrb[140].mxu1 %vm527_vm4, %v4306_v30 }
 0x297   :  { %3562 = vmatprep.mubr.msk.bf16.mxu1 %vm3752_vm8, %v5254_v5 }
 0x299   :  { %v1168_v32 = vpop.f32.mrb[36].mxu1  ;;  %v1486_v21 = vpop.f32.mrb[100].mxu0 }
 0x29a   :  { %v4722_v45 = vadd.f32 %v1486_v21, %v1144_v14  ;;  %v3340_v16 = vpop.f32.mrb[37].mxu1  ;;  %v3440_v60 = vpop.f32.mrb[101].mxu0 }
 0x29b   :  { %v1171_v7 = vpop.f32.mrb[38].mxu1  ;;  %v1489_v52 = vpop.f32.mrb[102].mxu0 }
 0x29c   :  { %v4724_v10 = vadd.f32 %v1489_v52, %v1147_v51  ;;  %v3341_v28 = vpop.f32.mrb[39].mxu1  ;;  %v3441_v49 = vpop.f32.mrb[103].mxu0  ;;  %v3692_v52 = vld [vmem:[%s5267_s26] sm:$0xff]  }
 0x29d   :  { %3626 = vmatprep.subr.bf16.mxu0 %v3692_v52 }
 0x29e   :  { %3563 = vmatmul.mubr.msk.bf16.gmra.mrb[144].mxu1 %vm527_vm4, %v4338_v40  ;;  %3627 = vmatpush3.bf16.msra.mxu0 %v3692_v52 }
 0x29f   :  { %3566 = vmatprep.mubr.msk.bf16.mxu1 %vm3752_vm8, %v5254_v5  ;;  %3632 = vmatprep.subr.bf16.mxu0 %v5254_v5 }
 0x2a1   :  { %v1176_v30 = vpop.f32.mrb[40].mxu1  ;;  %v1494_v18 = vpop.f32.mrb[104].mxu0 }
 0x2a2   :  { %v4730_v20 = vadd.f32 %v1494_v18, %v1152_v24  ;;  %v3344_v14 = vpop.f32.mrb[41].mxu1  ;;  %v3444_v4 = vpop.f32.mrb[105].mxu0 }
 0x2a3   :  { %v1179_v37 = vpop.f32.mrb[42].mxu1  ;;  %v1497_v59 = vpop.f32.mrb[106].mxu0 }
 0x2a4   :  { %v4732_v62 = vadd.f32 %v1497_v59, %v1155_v8  ;;  %v3345_v51 = vpop.f32.mrb[43].mxu1  ;;  %v3445_v53 = vpop.f32.mrb[107].mxu0 }
 0x2a6   :  { %3567 = vmatmul.mubr.msk.bf16.gmra.mrb[148].mxu1 %vm527_vm4, %v4332_v38 }
 0x2a7   :  { %3570 = vmatprep.mubr.msk.bf16.mxu1 %vm3752_vm8, %v5254_v5 }
 0x2a9   :  { %v1184_v40 = vpop.f32.mrb[44].mxu1  ;;  %v1502_v21 = vpop.f32.mrb[108].mxu0 }
 0x2aa   :  { %v4738_v16 = vadd.f32 %v1502_v21, %v1160_v22  ;;  %v3348_v24 = vpop.f32.mrb[45].mxu1  ;;  %v3448_v60 = vpop.f32.mrb[109].mxu0 }
 0x2ab   :  { %v1187_v8 = vpop.f32.mrb[46].mxu1  ;;  %v1505_v28 = vpop.f32.mrb[110].mxu0 }
 0x2ac   :  { %v4743_v49 = vadd.f32 %v1505_v28, %v1163_v43  ;;  %v3349_v18 = vpop.f32.mrb[47].mxu1  ;;  %v3449_v14 = vpop.f32.mrb[111].mxu0 }
 0x2ae   :  { %3571 = vmatmul.mubr.msk.bf16.gmra.mrb[152].mxu1 %vm527_vm4, %v4365_v48 }
 0x2af   :  { %3574 = vmatprep.mubr.msk.bf16.mxu1 %vm3752_vm8, %v5254_v5 }
 0x2b1   :  { %v1192_v38 = vpop.f32.mrb[48].mxu1  ;;  %v1510_v22 = vpop.f32.mrb[112].mxu0 }
 0x2b2   :  { %v4750_v4 = vadd.f32 %v1510_v22, %v1168_v32  ;;  %v3352_v59 = vpop.f32.mrb[49].mxu1  ;;  %v3452_v51 = vpop.f32.mrb[113].mxu0 }
 0x2b3   :  { %v1195_v43 = vpop.f32.mrb[50].mxu1  ;;  %v1513_v53 = vpop.f32.mrb[114].mxu0 }
 0x2b4   :  { %v4752_v21 = vadd.f32 %v1513_v53, %v1171_v7  ;;  %v3353_v24 = vpop.f32.mrb[51].mxu1  ;;  %v3453_v60 = vpop.f32.mrb[115].mxu0 }
 0x2b6   :  { %3575 = vmatmul.mubr.msk.bf16.gmra.mrb[156].mxu1 %vm527_vm4, %v4359_v46 }
 0x2b7   :  { %3578 = vmatprep.mubr.msk.bf16.mxu1 %vm3752_vm8, %v5254_v5 }
 0x2b9   :  { %v1200_v48 = vpop.f32.mrb[52].mxu1  ;;  %v1518_v52 = vpop.f32.mrb[116].mxu0 }
 0x2ba   :  { %v4758_v28 = vadd.f32 %v1518_v52, %v1176_v30  ;;  %v3356_v32 = vpop.f32.mrb[53].mxu1  ;;  %v3456_v18 = vpop.f32.mrb[117].mxu0 }
 0x2bb   :  { %v1203_v14 = vpop.f32.mrb[54].mxu1  ;;  %v1521_v22 = vpop.f32.mrb[118].mxu0 }
 0x2bc   :  { %v4760_v59 = vadd.f32 %v1521_v22, %v1179_v37  ;;  %v3357_v7 = vpop.f32.mrb[55].mxu1  ;;  %v3457_v51 = vpop.f32.mrb[119].mxu0 }
 0x2be   :  { %3579 = vmatmul.mubr.msk.bf16.gmra.mrb[160].mxu1 %vm527_vm4, %v4392_v57 }
 0x2bf   :  { %3582 = vmatprep.mubr.msk.bf16.mxu1 %vm3752_vm8, %v5254_v5 }
 0x2c1   :  { %v1208_v46 = vpop.f32.mrb[56].mxu1  ;;  %v1526_v53 = vpop.f32.mrb[120].mxu0 }
 0x2c2   :  { %v4766_v24 = vadd.f32 %v1526_v53, %v1184_v40  ;;  %v3360_v30 = vpop.f32.mrb[57].mxu1  ;;  %v3460_v60 = vpop.f32.mrb[121].mxu0 }
 0x2c3   :  { %v1211_v52 = vpop.f32.mrb[58].mxu1  ;;  %v1529_v32 = vpop.f32.mrb[122].mxu0 }
 0x2c4   :  { %v4768_v18 = vadd.f32 %v1529_v32, %v1187_v8  ;;  %v3361_v37 = vpop.f32.mrb[59].mxu1  ;;  %v3461_v22 = vpop.f32.mrb[123].mxu0 }
 0x2c6   :  { %3583 = vmatmul.mubr.msk.bf16.gmra.mrb[164].mxu1 %vm527_vm4, %v4386_v55 }
 0x2c7   :  { %3586 = vmatprep.mubr.msk.bf16.mxu1 %vm3752_vm8, %v5254_v5 }
 0x2c9   :  { %v1216_v57 = vpop.f32.mrb[60].mxu1  ;;  %v1534_v7 = vpop.f32.mrb[124].mxu0 }
 0x2ca   :  { %v4774_v51 = vadd.f32 %v1534_v7, %v1192_v38  ;;  %v3364_v40 = vpop.f32.mrb[61].mxu1  ;;  %v3464_v53 = vpop.f32.mrb[125].mxu0 }
 0x2cb   :  { %v1219_v30 = vpop.f32.mrb[62].mxu1  ;;  %v1537_v60 = vpop.f32.mrb[126].mxu0 }
 0x2cc   :  { %v4776_v34 = vadd.f32 %v1537_v60, %v1195_v43  ;;  %v3365_v8 = vpop.f32.mrb[63].mxu1  ;;  %v3465_v32 = vpop.f32.mrb[127].mxu0 }
 0x2ce   :  { %3587 = vmatmul.mubr.msk.bf16.gmra.mrb[168].mxu1 %vm527_vm4, %v4419_v3 }
 0x2cf   :  { %3590 = vmatprep.mubr.msk.bf16.mxu1 %vm3752_vm8, %v5254_v5 }
 0x2d1   :  { %v1224_v55 = vpop.f32.mrb[64].mxu1  ;;  %v1542_v37 = vpop.f32.mrb[128].mxu0 }
 0x2d2   :  { %v4782_v22 = vadd.f32 %v1542_v37, %v1200_v48  ;;  %v3368_v38 = vpop.f32.mrb[65].mxu1  ;;  %v3468_v7 = vpop.f32.mrb[129].mxu0 }
 0x2d3   :  { %v1227_v40 = vpop.f32.mrb[66].mxu1  ;;  %v1545_v53 = vpop.f32.mrb[130].mxu0 }
 0x2d4   :  { %v4784_v41 = vadd.f32 %v1545_v53, %v1203_v14  ;;  %v3369_v43 = vpop.f32.mrb[67].mxu1  ;;  %v3469_v60 = vpop.f32.mrb[131].mxu0 }
 0x2d6   :  { %3591 = vmatmul.mubr.msk.bf16.gmra.mrb[172].mxu1 %vm527_vm4, %v4413_v1 }
 0x2d7   :  { %3594 = vmatprep.mubr.msk.bf16.mxu1 %vm3752_vm8, %v5254_v5 }
 0x2d9   :  { %v1232_v3 = vpop.f32.mrb[68].mxu1  ;;  %v1550_v8 = vpop.f32.mrb[132].mxu0 }
 0x2da   :  { %v4790_v32 = vadd.f32 %v1550_v8, %v1208_v46  ;;  %v3372_v48 = vpop.f32.mrb[69].mxu1  ;;  %v3472_v37 = vpop.f32.mrb[133].mxu0 }
 0x2db   :  { %v1235_v38 = vpop.f32.mrb[70].mxu1  ;;  %v1553_v7 = vpop.f32.mrb[134].mxu0 }
 0x2dc   :  { %v4792_v29 = vadd.f32 %v1553_v7, %v1211_v52  ;;  %v3373_v14 = vpop.f32.mrb[71].mxu1  ;;  %v3473_v53 = vpop.f32.mrb[135].mxu0 }
 0x2de   :  { %3595 = vmatmul.mubr.msk.bf16.gmra.mrb[176].mxu1 %vm527_vm4, %v4446_v17 }
 0x2df   :  { %3598 = vmatprep.mubr.msk.bf16.mxu1 %vm3752_vm8, %v5254_v5 }
 0x2e1   :  { %v1240_v1 = vpop.f32.mrb[72].mxu1  ;;  %v1558_v43 = vpop.f32.mrb[136].mxu0 }
 0x2e2   :  { %v4798_v60 = vadd.f32 %v1558_v43, %v1216_v57  ;;  %v3376_v46 = vpop.f32.mrb[73].mxu1  ;;  %v3476_v8 = vpop.f32.mrb[137].mxu0 }
 0x2e3   :  { %v1243_v48 = vpop.f32.mrb[74].mxu1  ;;  %v1561_v37 = vpop.f32.mrb[138].mxu0 }
 0x2e4   :  { %5268 = vst [vmem:[#allocation6_spill] sm:$0xff] %v4798_v60  ;;  %v4800_v9 = vadd.f32 %v1561_v37, %v1219_v30  ;;  %v3377_v52 = vpop.f32.mrb[75].mxu1  ;;  %v3477_v7 = vpop.f32.mrb[139].mxu0 }
 0x2e6   :  { %3599 = vmatmul.mubr.msk.bf16.gmra.mrb[180].mxu1 %vm527_vm4, %v4440_v13 }
 0x2e7   :  { %3602 = vmatprep.mubr.msk.bf16.mxu1 %vm3752_vm8, %v5254_v5 }
 0x2e9   :  { %v1248_v17 = vpop.f32.mrb[76].mxu1  ;;  %v1566_v14 = vpop.f32.mrb[140].mxu0 }
 0x2ea   :  { %v4806_v53 = vadd.f32 %v1566_v14, %v1224_v55  ;;  %v3380_v57 = vpop.f32.mrb[77].mxu1  ;;  %v3480_v43 = vpop.f32.mrb[141].mxu0 }
 0x2eb   :  { %v1251_v46 = vpop.f32.mrb[78].mxu1  ;;  %v1569_v8 = vpop.f32.mrb[142].mxu0 }
 0x2ec   :  { %5269 = vst [vmem:[#allocation7_spill] sm:$0xff] %v4806_v53  ;;  %v4808_v60 = vadd.f32 %v1569_v8, %v1227_v40  ;;  %v3381_v30 = vpop.f32.mrb[79].mxu1  ;;  %v3481_v37 = vpop.f32.mrb[143].mxu0 }
 0x2ee   :  { %3603 = vmatmul.mubr.msk.bf16.gmra.mrb[184].mxu1 %vm527_vm4, %v4473_v27 }
 0x2ef   :  { %3606 = vmatprep.mubr.msk.bf16.mxu1 %vm3752_vm8, %v5254_v5 }
 0x2f1   :  { %v1256_v13 = vpop.f32.mrb[80].mxu1  ;;  %v1574_v52 = vpop.f32.mrb[144].mxu0 }
 0x2f2   :  { %v4814_v7 = vadd.f32 %v1574_v52, %v1232_v3  ;;  %v3384_v55 = vpop.f32.mrb[81].mxu1  ;;  %v3484_v14 = vpop.f32.mrb[145].mxu0 }
 0x2f3   :  { %v1259_v57 = vpop.f32.mrb[82].mxu1  ;;  %v1577_v43 = vpop.f32.mrb[146].mxu0 }
 0x2f4   :  { %5270 = vst [vmem:[#allocation8_spill] sm:$0xff] %v4814_v7  ;;  %v4816_v53 = vadd.f32 %v1577_v43, %v1235_v38  ;;  %v3385_v40 = vpop.f32.mrb[83].mxu1  ;;  %v3485_v8 = vpop.f32.mrb[147].mxu0 }
 0x2f6   :  { %3607 = vmatmul.mubr.msk.bf16.gmra.mrb[188].mxu1 %vm527_vm4, %v4467_v25 }
 0x2f7   :  { %3610 = vmatprep.mubr.msk.bf16.mxu1 %vm3752_vm8, %v5254_v5 }
 0x2f9   :  { %v1264_v27 = vpop.f32.mrb[84].mxu1  ;;  %v1582_v30 = vpop.f32.mrb[148].mxu0 }
 0x2fa   :  { %v4822_v37 = vadd.f32 %v1582_v30, %v1240_v1  ;;  %v3388_v3 = vpop.f32.mrb[85].mxu1  ;;  %v3488_v52 = vpop.f32.mrb[149].mxu0 }
 0x2fb   :  { %v1267_v55 = vpop.f32.mrb[86].mxu1  ;;  %v1585_v14 = vpop.f32.mrb[150].mxu0 }
 0x2fc   :  { %5271 = vst [vmem:[#allocation9_spill] sm:$0xff] %v4822_v37  ;;  %v4824_v7 = vadd.f32 %v1585_v14, %v1243_v48  ;;  %v3389_v38 = vpop.f32.mrb[87].mxu1  ;;  %v3489_v43 = vpop.f32.mrb[151].mxu0 }
 0x2fd   :  { %v5273_v38 = vpack.c.bf16 %v4490_v19, %v4487_v31  ;;  %v5274_v31 = vpack.c.bf16 %v4517_v39, %v4509_v26  ;;  %v5276_v26 = vpack.c.bf16 %v4513_v35, %v4507_v23 }
 0x2fe   :  { %3611 = vmatmul.mubr.msk.bf16.gmra.mrb[192].mxu1 %vm527_vm4, %v4494_v36 }
 0x2ff   :  { %3614 = vmatprep.mubr.msk.bf16.mxu1 %vm3752_vm8, %v5254_v5 }
 0x301   :  { %v1272_v25 = vpop.f32.mrb[88].mxu1  ;;  %v1590_v40 = vpop.f32.mrb[152].mxu0 }
 0x302   :  { %v4830_v8 = vadd.f32 %v1590_v40, %v1248_v17  ;;  %v3392_v1 = vpop.f32.mrb[89].mxu1  ;;  %v3492_v30 = vpop.f32.mrb[153].mxu0 }
 0x303   :  { %v1275_v3 = vpop.f32.mrb[90].mxu1  ;;  %v1593_v52 = vpop.f32.mrb[154].mxu0 }
 0x304   :  { %5272 = vst [vmem:[#allocation10_spill] sm:$0xff] %v4830_v8  ;;  %v4832_v37 = vadd.f32 %v1593_v52, %v1251_v46  ;;  %v3393_v48 = vpop.f32.mrb[91].mxu1  ;;  %v3493_v14 = vpop.f32.mrb[155].mxu0 }
 0x306   :  { %3615 = vmatmul.mubr.msk.bf16.gmra.mrb[196].mxu1 %vm527_vm4, %v5273_v38 }
 0x307   :  { %3618 = vmatprep.mubr.msk.bf16.mxu1 %vm3752_vm8, %v5254_v5 }
 0x309   :  { %v1280_v36 = vpop.f32.mrb[92].mxu1  ;;  %v1598_v43 = vpop.f32.mrb[156].mxu0 }
 0x30a   :  { %v4840_v17 = vadd.f32 %v1598_v43, %v1256_v13  ;;  %v3396_v40 = vpop.f32.mrb[93].mxu1  ;;  %v3496_v1 = vpop.f32.mrb[157].mxu0 }
 0x30b   :  { %v1283_v30 = vpop.f32.mrb[94].mxu1  ;;  %v1601_v8 = vpop.f32.mrb[158].mxu0 }
 0x30c   :  { %v4842_v46 = vadd.f32 %v1601_v8, %v1259_v57  ;;  %v3397_v52 = vpop.f32.mrb[95].mxu1  ;;  %v3497_v48 = vpop.f32.mrb[159].mxu0 }
 0x30e   :  { %3619 = vmatmul.mubr.msk.bf16.gmra.mrb[200].mxu1 %vm527_vm4, %v5274_v31 }
 0x30f   :  { %3622 = vmatprep.mubr.msk.bf16.mxu1 %vm3752_vm8, %v5254_v5 }
 0x311   :  { %v1288_v19 = vpop.f32.mrb[96].mxu1  ;;  %v1606_v14 = vpop.f32.mrb[160].mxu0 }
 0x312   :  { %v4850_v13 = vadd.f32 %v1606_v14, %v1264_v27  ;;  %v3400_v38 = vpop.f32.mrb[97].mxu1  ;;  %v3500_v43 = vpop.f32.mrb[161].mxu0 }
 0x313   :  { %v1291_v40 = vpop.f32.mrb[98].mxu1  ;;  %v1609_v1 = vpop.f32.mrb[162].mxu0 }
 0x314   :  { %5275 = vst [vmem:[#allocation11_spill] sm:$0xff] %v4850_v13  ;;  %v4852_v57 = vadd.f32 %v1609_v1, %v1267_v55  ;;  %v3401_v8 = vpop.f32.mrb[99].mxu1  ;;  %v3501_v52 = vpop.f32.mrb[163].mxu0 }
 0x316   :  { %3623 = vmatmul.mubr.msk.bf16.gmra.mrb[204].mxu1 %vm527_vm4, %v5276_v26 }
 0x319   :  { %v1614_v39 = vpop.f32.mrb[164].mxu0  ;;  %v1699_v48 = vpop.f32.mrb[100].mxu1 }
 0x31a   :  { %v4858_v31 = vadd.f32 %v1614_v39, %v1272_v25  ;;  %v1914_v27 = vadd.f32 %v1699_v48, %v4658_v58  ;;  %v3504_v14 = vpop.f32.mrb[165].mxu0  ;;  %v3520_v38 = vpop.f32.mrb[101].mxu1 }
 0x31b   :  { %v1617_v43 = vpop.f32.mrb[166].mxu0  ;;  %v1702_v5 = vpop.f32.mrb[102].mxu1 }
 0x31c   :  { %5277 = vst [vmem:[#allocation12_spill] sm:$0xff] %v4858_v31  ;;  %v4861_v13 = vadd.f32 %v1617_v43, %v1275_v3  ;;  %v1915_v55 = vadd.f32 %v1702_v5, %v4660_v2  ;;  %v3505_v1 = vpop.f32.mrb[167].mxu0  ;;  %v3521_v8 = vpop.f32.mrb[103].mxu1 }
 0x321   :  { %v1622_v52 = vpop.f32.mrb[168].mxu0  ;;  %v1707_v23 = vpop.f32.mrb[104].mxu1 }
 0x322   :  { %v4864_v35 = vadd.f32 %v1622_v52, %v1280_v36  ;;  %v1916_v26 = vadd.f32 %v1707_v23, %v4666_v11  ;;  %v3508_v25 = vpop.f32.mrb[169].mxu0  ;;  %v3524_v39 = vpop.f32.mrb[105].mxu1 }
 0x323   :  { %v1625_v31 = vpop.f32.mrb[170].mxu0  ;;  %v1710_v58 = vpop.f32.mrb[106].mxu1 }
 0x324   :  { %v4867_v48 = vadd.f32 %v1625_v31, %v1283_v30  ;;  %v1917_v14 = vadd.f32 %v1710_v58, %v4668_v12  ;;  %v3509_v3 = vpop.f32.mrb[171].mxu0  ;;  %v3525_v38 = vpop.f32.mrb[107].mxu1  ;;  %v4879_v12 = vld [vmem:[%s5278_s1] ss:$0 sm:$0xff] }
 0x329   :  { %v1630_v43 = vpop.f32.mrb[172].mxu0  ;;  %v1715_v5 = vpop.f32.mrb[108].mxu1 }
 0x32a   :  { %v4870_v2 = vadd.f32 %v1630_v43, %v1288_v19  ;;  %v1918_v1 = vadd.f32 %v1715_v5, %v4674_v42  ;;  %v3512_v36 = vpop.f32.mrb[173].mxu0  ;;  %v3528_v8 = vpop.f32.mrb[109].mxu1  ;;  %v1975_v19 = vadd.f32 %v4879_v12, %v1914_v27  ;;  %v1976_v42 = vadd.f32 %v4879_v12, %v1915_v55 }
 0x32b   :  { %v1633_v52 = vpop.f32.mrb[174].mxu0  ;;  %v1718_v11 = vpop.f32.mrb[110].mxu1 }
 0x32c   :  { %v4873_v23 = vadd.f32 %v1633_v52, %v1291_v40  ;;  %v1919_v25 = vadd.f32 %v1718_v11, %v4676_v50  ;;  %v3513_v30 = vpop.f32.mrb[175].mxu0  ;;  %v3529_v31 = vpop.f32.mrb[111].mxu1  ;;  %v2029_v40 = vmax.f32 %v1975_v19, 0.0  ;;  %v2030_v36 = vmax.f32 %v1976_v42, 0.0 }
 0x32d   :  { %v1977_v11 = vadd.f32 %v4879_v12, %v1916_v26 }
 0x32e   :  { %v2084_v27 = vsel %vm2083_vm1, %v2029_v40, -inf  ;;  %v2117_v19 = vsel %vm2083_vm1, %v2030_v36, -inf }
 0x331   :  { %v1723_v39 = vpop.f32.mrb[112].mxu1 }
 0x332   :  { %v1920_v58 = vadd.f32 %v1723_v39, %v4682_v56  ;;  %v3532_v3 = vpop.f32.mrb[113].mxu1  ;;  %v1978_v39 = vadd.f32 %v4879_v12, %v1917_v14  ;;  %v1979_v14 = vadd.f32 %v4879_v12, %v1918_v1 }
 0x333   :  { %v1726_v38 = vpop.f32.mrb[114].mxu1 }
 0x334   :  { %v1981_v43 = vadd.f32 %v4879_v12, %v1920_v58  ;;  %v1921_v50 = vadd.f32 %v1726_v38, %v4684_v6  ;;  %v3533_v5 = vpop.f32.mrb[115].mxu1 }
 0x335   :  { %v2032_v5 = vmax.f32 %v1978_v39, 0.0 }
 0x336   :  { %v2035_v8 = vmax.f32 %v1981_v43, 0.0  ;;  %v1982_v52 = vadd.f32 %v4879_v12, %v1921_v50  ;;  %v2031_v43 = vmax.f32 %v1977_v11, 0.0 }
 0x337   :  { %v2085_v11 = vsel %vm2083_vm1, %v2032_v5, -inf }
 0x338   :  { %v2086_v55 = vsel %vm2083_vm1, %v2035_v8, -inf  ;;  %v2036_v56 = vmax.f32 %v1982_v52, 0.0  ;;  %v2150_v36 = vsel %vm2083_vm1, %v2031_v43, -inf }
 0x339   :  { %v2087_v30 = vmax.f32 %v2084_v27, %v2086_v55  ;;  %v1731_v31 = vpop.f32.mrb[116].mxu1 }
 0x33a   :  { %v2119_v6 = vsel %vm2083_vm1, %v2036_v56, -inf  ;;  %v1922_v42 = vadd.f32 %v1731_v31, %v4690_v15  ;;  %v3536_v58 = vpop.f32.mrb[117].mxu1  ;;  %v1980_v31 = vadd.f32 %v4879_v12, %v1919_v25 }
 0x33b   :  { %v2120_v3 = vmax.f32 %v2117_v19, %v2119_v6  ;;  %v1734_v38 = vpop.f32.mrb[118].mxu1  ;;  %v2033_v58 = vmax.f32 %v1979_v14, 0.0 }
 0x33c   :  { %v1983_v40 = vadd.f32 %v4879_v12, %v1922_v42  ;;  %v1923_v26 = vadd.f32 %v1734_v38, %v4692_v33  ;;  %v3537_v50 = vpop.f32.mrb[119].mxu1 }
 0x33d   :  { %v2118_v5 = vsel %vm2083_vm1, %v2033_v58, -inf }
 0x33e   :  { %v2037_v8 = vmax.f32 %v1983_v40, 0.0  ;;  %v1984_v52 = vadd.f32 %v4879_v12, %v1923_v26  ;;  %v2034_v40 = vmax.f32 %v1980_v31, 0.0 }
 0x340   :  { %v2152_v27 = vsel %vm2083_vm1, %v2037_v8, -inf  ;;  %v2038_v15 = vmax.f32 %v1984_v52, 0.0 }
 0x341   :  { %v2153_v55 = vmax.f32 %v2150_v36, %v2152_v27  ;;  %v1739_v56 = vpop.f32.mrb[120].mxu1  ;;  %v2151_v36 = vsel %vm2083_vm1, %v2034_v40, -inf }
 0x342   :  { %v2088_v33 = vsel %vm2083_vm1, %v2038_v15, -inf  ;;  %v1924_v19 = vadd.f32 %v1739_v56, %v4698_v44  ;;  %v3540_v39 = vpop.f32.mrb[121].mxu1 }
 0x343   :  { %v2089_v6 = vmax.f32 %v2085_v11, %v2088_v33  ;;  %v1742_v42 = vpop.f32.mrb[122].mxu1 }
 0x344   :  { %v1985_v38 = vadd.f32 %v4879_v12, %v1924_v19  ;;  %v1925_v1 = vadd.f32 %v1742_v42, %v4700_v54  ;;  %v3541_v43 = vpop.f32.mrb[123].mxu1 }
 0x346   :  { %v2039_v26 = vmax.f32 %v1985_v38, 0.0  ;;  %v1986_v50 = vadd.f32 %v4879_v12, %v1925_v1 }
 0x348   :  { %v2121_v25 = vsel %vm2083_vm1, %v2039_v26, -inf  ;;  %v2040_v8 = vmax.f32 %v1986_v50, 0.0 }
 0x349   :  { %v2122_v52 = vmax.f32 %v2118_v5, %v2121_v25  ;;  %v1747_v44 = vpop.f32.mrb[124].mxu1 }
 0x34a   :  { %v2154_v14 = vsel %vm2083_vm1, %v2040_v8, -inf  ;;  %v1926_v27 = vadd.f32 %v1747_v44, %v4706_v0  ;;  %v3544_v15 = vpop.f32.mrb[125].mxu1 }
 0x34b   :  { %v2155_v54 = vmax.f32 %v2151_v36, %v2154_v14  ;;  %v1750_v56 = vpop.f32.mrb[126].mxu1 }
 0x34c   :  { %v1987_v11 = vadd.f32 %v4879_v12, %v1926_v27  ;;  %v1927_v31 = vadd.f32 %v1750_v56, %v4708_v61  ;;  %v3545_v33 = vpop.f32.mrb[127].mxu1 }
 0x34e   :  { %v2041_v19 = vmax.f32 %v1987_v11, 0.0  ;;  %v1988_v39 = vadd.f32 %v4879_v12, %v1927_v31 }
 0x350   :  { %v2090_v42 = vsel %vm2083_vm1, %v2041_v19, -inf  ;;  %v2042_v58 = vmax.f32 %v1988_v39, 0.0 }
 0x351   :  { %v4916_v38 = vmax.f32 %v2087_v30, %v2090_v42  ;;  %v1755_v1 = vpop.f32.mrb[128].mxu1 }
 0x352   :  { %v2123_v43 = vsel %vm2083_vm1, %v2042_v58, -inf  ;;  %v1928_v0 = vadd.f32 %v1755_v1, %v4714_v63  ;;  %v3548_v40 = vpop.f32.mrb[129].mxu1 }
 0x353   :  { %v4920_v26 = vmax.f32 %v2120_v3, %v2123_v43  ;;  %v1758_v50 = vpop.f32.mrb[130].mxu1 }
 0x354   :  { %v1989_v61 = vadd.f32 %v4879_v12, %v1928_v0  ;;  %v1929_v5 = vadd.f32 %v1758_v50, %v4716_v47  ;;  %v3549_v25 = vpop.f32.mrb[131].mxu1 }
 0x356   :  { %v2043_v8 = vmax.f32 %v1989_v61, 0.0  ;;  %v1990_v44 = vadd.f32 %v4879_v12, %v1929_v5 }
 0x358   :  { %v2156_v30 = vsel %vm2083_vm1, %v2043_v8, -inf  ;;  %v2044_v36 = vmax.f32 %v1990_v44, 0.0 }
 0x359   :  { %v4926_v14 = vmax.f32 %v2153_v55, %v2156_v30  ;;  %v1763_v27 = vpop.f32.mrb[132].mxu1 }
 0x35a   :  { %v2092_v63 = vsel %vm2083_vm1, %v2044_v36, -inf  ;;  %v1930_v3 = vadd.f32 %v1763_v27, %v4722_v45  ;;  %v3552_v15 = vpop.f32.mrb[133].mxu1 }
 0x35b   :  { %v4930_v56 = vmax.f32 %v2089_v6, %v2092_v63  ;;  %v1766_v11 = vpop.f32.mrb[134].mxu1 }
 0x35c   :  { %v1991_v47 = vadd.f32 %v4879_v12, %v1930_v3  ;;  %v1931_v31 = vadd.f32 %v1766_v11, %v4724_v10  ;;  %v3553_v33 = vpop.f32.mrb[135].mxu1 }
 0x35e   :  { %v2045_v19 = vmax.f32 %v1991_v47, 0.0  ;;  %v1992_v39 = vadd.f32 %v4879_v12, %v1931_v31 }
 0x360   :  { %v2125_v55 = vsel %vm2083_vm1, %v2045_v19, -inf  ;;  %v2046_v42 = vmax.f32 %v1992_v39, 0.0 }
 0x361   :  { %v4936_v58 = vmax.f32 %v2122_v52, %v2125_v55  ;;  %v1771_v1 = vpop.f32.mrb[136].mxu1 }
 0x362   :  { %v2158_v45 = vsel %vm2083_vm1, %v2046_v42, -inf  ;;  %v1932_v6 = vadd.f32 %v1771_v1, %v4730_v20  ;;  %v3556_v43 = vpop.f32.mrb[137].mxu1 }
 0x363   :  { %v4940_v0 = vmax.f32 %v2155_v54, %v2158_v45  ;;  %v1774_v40 = vpop.f32.mrb[138].mxu1 }
 0x364   :  { %v1993_v10 = vadd.f32 %v4879_v12, %v1932_v6  ;;  %v1933_v50 = vadd.f32 %v1774_v40, %v4732_v62  ;;  %v3557_v61 = vpop.f32.mrb[139].mxu1 }
 0x366   :  { %v2047_v5 = vmax.f32 %v1993_v10, 0.0  ;;  %v1994_v25 = vadd.f32 %v4879_v12, %v1933_v50 }
 0x368   :  { %v2094_v52 = vsel %vm2083_vm1, %v2047_v5, -inf  ;;  %v2048_v8 = vmax.f32 %v1994_v25, 0.0 }
 0x369   :  { %v2095_v44 = vmax.f32 %v4916_v38, %v2094_v52  ;;  %v1779_v30 = vpop.f32.mrb[140].mxu1 }
 0x36a   :  { %v2127_v20 = vsel %vm2083_vm1, %v2048_v8, -inf  ;;  %v1934_v54 = vadd.f32 %v1779_v30, %v4738_v16  ;;  %v3560_v36 = vpop.f32.mrb[141].mxu1 }
 0x36b   :  { %v2128_v27 = vmax.f32 %v4920_v26, %v2127_v20  ;;  %v1782_v63 = vpop.f32.mrb[142].mxu1 }
 0x36c   :  { %v1995_v62 = vadd.f32 %v4879_v12, %v1934_v54  ;;  %v1935_v3 = vadd.f32 %v1782_v63, %v4743_v49  ;;  %v3561_v15 = vpop.f32.mrb[143].mxu1 }
 0x36e   :  { %v2049_v11 = vmax.f32 %v1995_v62, 0.0  ;;  %v1996_v47 = vadd.f32 %v4879_v12, %v1935_v3 }
 0x370   :  { %v2160_v31 = vsel %vm2083_vm1, %v2049_v11, -inf  ;;  %v2050_v38 = vmax.f32 %v1996_v47, 0.0 }
 0x371   :  { %v2161_v33 = vmax.f32 %v4926_v14, %v2160_v31  ;;  %v1787_v19 = vpop.f32.mrb[144].mxu1 }
 0x372   :  { %v2096_v16 = vsel %vm2083_vm1, %v2050_v38, -inf  ;;  %v1936_v39 = vadd.f32 %v1787_v19, %v4750_v4  ;;  %v3564_v26 = vpop.f32.mrb[145].mxu1 }
 0x373   :  { %v2097_v55 = vmax.f32 %v4930_v56, %v2096_v16  ;;  %v1790_v42 = vpop.f32.mrb[146].mxu1 }
 0x374   :  { %v1997_v49 = vadd.f32 %v4879_v12, %v1936_v39  ;;  %v1937_v1 = vadd.f32 %v1790_v42, %v4752_v21  ;;  %v3565_v45 = vpop.f32.mrb[147].mxu1 }
 0x376   :  { %v2051_v6 = vmax.f32 %v1997_v49, 0.0  ;;  %v1998_v43 = vadd.f32 %v4879_v12, %v1937_v1 }
 0x378   :  { %v2129_v40 = vsel %vm2083_vm1, %v2051_v6, -inf  ;;  %v2052_v14 = vmax.f32 %v1998_v43, 0.0 }
 0x379   :  { %v2130_v10 = vmax.f32 %v4936_v58, %v2129_v40  ;;  %v1795_v50 = vpop.f32.mrb[148].mxu1 }
 0x37a   :  { %v2162_v4 = vsel %vm2083_vm1, %v2052_v14, -inf  ;;  %v1938_v61 = vadd.f32 %v1795_v50, %v4758_v28  ;;  %v3568_v56 = vpop.f32.mrb[149].mxu1 }
 0x37b   :  { %v2163_v5 = vmax.f32 %v4940_v0, %v2162_v4  ;;  %v1798_v25 = vpop.f32.mrb[150].mxu1 }
 0x37c   :  { %v1999_v21 = vadd.f32 %v4879_v12, %v1938_v61  ;;  %v1939_v52 = vadd.f32 %v1798_v25, %v4760_v59  ;;  %v3569_v8 = vpop.f32.mrb[151].mxu1 }
 0x37e   :  { %v2053_v30 = vmax.f32 %v1999_v21, 0.0  ;;  %v2000_v20 = vadd.f32 %v4879_v12, %v1939_v52 }
 0x380   :  { %v2098_v54 = vsel %vm2083_vm1, %v2053_v30, -inf  ;;  %v2054_v58 = vmax.f32 %v2000_v20, 0.0 }
 0x381   :  { %v4970_v36 = vmax.f32 %v2095_v44, %v2098_v54  ;;  %v1803_v63 = vpop.f32.mrb[152].mxu1 }
 0x382   :  { %v2131_v28 = vsel %vm2083_vm1, %v2054_v58, -inf  ;;  %v1940_v62 = vadd.f32 %v1803_v63, %v4766_v24  ;;  %v3572_v0 = vpop.f32.mrb[153].mxu1 }
 0x383   :  { %v4974_v3 = vmax.f32 %v2128_v27, %v2131_v28  ;;  %v1806_v15 = vpop.f32.mrb[154].mxu1 }
 0x384   :  { %v2001_v59 = vadd.f32 %v4879_v12, %v1940_v62  ;;  %v1941_v11 = vadd.f32 %v1806_v15, %v4768_v18  ;;  %v3573_v47 = vpop.f32.mrb[155].mxu1 }
 0x386   :  { %v2055_v31 = vmax.f32 %v2001_v59, 0.0  ;;  %v2002_v38 = vadd.f32 %v4879_v12, %v1941_v11 }
 0x388   :  { %v2164_v44 = vsel %vm2083_vm1, %v2055_v31, -inf  ;;  %v2056_v19 = vmax.f32 %v2002_v38, 0.0  ;;  %v5279_v38 = vld [vmem:[#allocation6_spill] sm:$0xff] }
 0x389   :  { %v4980_v16 = vmax.f32 %v2161_v33, %v2164_v44  ;;  %v1811_v39 = vpop.f32.mrb[156].mxu1 }
 0x38a   :  { %v2100_v24 = vsel %vm2083_vm1, %v2056_v19, -inf  ;;  %v1942_v27 = vadd.f32 %v1811_v39, %v4774_v51  ;;  %v3576_v26 = vpop.f32.mrb[157].mxu1 }
 0x38b   :  { %v4984_v42 = vmax.f32 %v2097_v55, %v2100_v24  ;;  %v1814_v49 = vpop.f32.mrb[158].mxu1 }
 0x38c   :  { %v2003_v18 = vadd.f32 %v4879_v12, %v1942_v27  ;;  %v1943_v1 = vadd.f32 %v1814_v49, %v4776_v34  ;;  %v3577_v45 = vpop.f32.mrb[159].mxu1 }
 0x38e   :  { %v2057_v6 = vmax.f32 %v2003_v18, 0.0  ;;  %v2004_v43 = vadd.f32 %v4879_v12, %v1943_v1 }
 0x390   :  { %v2133_v33 = vsel %vm2083_vm1, %v2057_v6, -inf  ;;  %v2058_v40 = vmax.f32 %v2004_v43, 0.0  ;;  %v5280_v43 = vld [vmem:[#allocation7_spill] sm:$0xff] }
 0x391   :  { %v4990_v14 = vmax.f32 %v2130_v10, %v2133_v33  ;;  %v1819_v50 = vpop.f32.mrb[160].mxu1 }
 0x392   :  { %v2166_v51 = vsel %vm2083_vm1, %v2058_v40, -inf  ;;  %v1944_v55 = vadd.f32 %v1819_v50, %v4782_v22  ;;  %v3580_v4 = vpop.f32.mrb[161].mxu1 }
 0x393   :  { %v4994_v61 = vmax.f32 %v2163_v5, %v2166_v51  ;;  %v1822_v56 = vpop.f32.mrb[162].mxu1 }
 0x394   :  { %v2005_v34 = vadd.f32 %v4879_v12, %v1944_v55  ;;  %v1945_v25 = vadd.f32 %v1822_v56, %v4784_v41  ;;  %v3581_v21 = vpop.f32.mrb[163].mxu1 }
 0x396   :  { %v2059_v52 = vmax.f32 %v2005_v34, 0.0  ;;  %v2006_v8 = vadd.f32 %v4879_v12, %v1945_v25 }
 0x398   :  { %v2102_v10 = vsel %vm2083_vm1, %v2059_v52, -inf  ;;  %v2060_v30 = vmax.f32 %v2006_v8, 0.0  ;;  %v5281_v8 = vld [vmem:[#allocation8_spill] sm:$0xff] }
 0x399   :  { %v2103_v20 = vmax.f32 %v4970_v36, %v2102_v10  ;;  %v1827_v54 = vpop.f32.mrb[164].mxu1 }
 0x39a   :  { %v2135_v22 = vsel %vm2083_vm1, %v2060_v30, -inf  ;;  %v1946_v5 = vadd.f32 %v1827_v54, %v4790_v32  ;;  %v3584_v58 = vpop.f32.mrb[165].mxu1 }
 0x39b   :  { %v2136_v63 = vmax.f32 %v4974_v3, %v2135_v22  ;;  %v1830_v28 = vpop.f32.mrb[166].mxu1 }
 0x39c   :  { %v2007_v41 = vadd.f32 %v4879_v12, %v1946_v5  ;;  %v1947_v62 = vadd.f32 %v1830_v28, %v4792_v29  ;;  %v3585_v0 = vpop.f32.mrb[167].mxu1 }
 0x39e   :  { %v2061_v15 = vmax.f32 %v2007_v41, 0.0  ;;  %v2008_v59 = vadd.f32 %v4879_v12, %v1947_v62 }
 0x3a0   :  { %v2168_v11 = vsel %vm2083_vm1, %v2061_v15, -inf  ;;  %v2062_v36 = vmax.f32 %v2008_v59, 0.0  ;;  %v5282_v59 = vld [vmem:[#allocation9_spill] sm:$0xff] }
 0x3a1   :  { %v2169_v47 = vmax.f32 %v4980_v16, %v2168_v11  ;;  %v1835_v31 = vpop.f32.mrb[168].mxu1 }
 0x3a2   :  { %v2104_v32 = vsel %vm2083_vm1, %v2062_v36, -inf  ;;  %v1948_v44 = vadd.f32 %v1835_v31, %v5279_v38  ;;  %v3588_v3 = vpop.f32.mrb[169].mxu1 }
 0x3a3   :  { %v2105_v19 = vmax.f32 %v4984_v42, %v2104_v32  ;;  %v1838_v39 = vpop.f32.mrb[170].mxu1 }
 0x3a4   :  { %v2009_v29 = vadd.f32 %v4879_v12, %v1948_v44  ;;  %v1949_v24 = vadd.f32 %v1838_v39, %v4800_v9  ;;  %v3589_v27 = vpop.f32.mrb[171].mxu1 }
 0x3a6   :  { %v2063_v26 = vmax.f32 %v2009_v29, 0.0  ;;  %v2010_v49 = vadd.f32 %v4879_v12, %v1949_v24 }
 0x3a8   :  { %v2137_v18 = vsel %vm2083_vm1, %v2063_v26, -inf  ;;  %v2064_v16 = vmax.f32 %v2010_v49, 0.0  ;;  %v5283_v26 = vld [vmem:[#allocation10_spill] sm:$0xff] }
 0x3a9   :  { %v2138_v1 = vmax.f32 %v4990_v14, %v2137_v18  ;;  %v1843_v45 = vpop.f32.mrb[172].mxu1 }
 0x3aa   :  { %v2170_v6 = vsel %vm2083_vm1, %v2064_v16, -inf  ;;  %v1950_v33 = vadd.f32 %v1843_v45, %v5280_v43  ;;  %v3592_v42 = vpop.f32.mrb[173].mxu1 }
 0x3ab   :  { %v2171_v40 = vmax.f32 %v4994_v61, %v2170_v6  ;;  %v1846_v50 = vpop.f32.mrb[174].mxu1 }
 0x3ac   :  { %v2011_v9 = vadd.f32 %v4879_v12, %v1950_v33  ;;  %v1951_v51 = vadd.f32 %v1846_v50, %v4808_v60  ;;  %v3593_v55 = vpop.f32.mrb[175].mxu1 }
 0x3ae   :  { %v2065_v4 = vmax.f32 %v2011_v9, 0.0  ;;  %v2012_v56 = vadd.f32 %v4879_v12, %v1951_v51 }
 0x3b0   :  { %v2106_v34 = vsel %vm2083_vm1, %v2065_v4, -inf  ;;  %v2066_v14 = vmax.f32 %v2012_v56, 0.0 }
 0x3b1   :  { %v5024_v25 = vmax.f32 %v2103_v20, %v2106_v34  ;;  %v1851_v21 = vpop.f32.mrb[176].mxu1 }
 0x3b2   :  { %v2139_v52 = vsel %vm2083_vm1, %v2066_v14, -inf  ;;  %v1952_v10 = vadd.f32 %v1851_v21, %v5281_v8  ;;  %v3596_v61 = vpop.f32.mrb[177].mxu1 }
 0x3b3   :  { %v5028_v30 = vmax.f32 %v2136_v63, %v2139_v52  ;;  %v1854_v54 = vpop.f32.mrb[178].mxu1 }
 0x3b4   :  { %v2013_v60 = vadd.f32 %v4879_v12, %v1952_v10  ;;  %v1953_v22 = vadd.f32 %v1854_v54, %v4816_v53  ;;  %v3597_v5 = vpop.f32.mrb[179].mxu1  ;;  %v5284_v54 = vld [vmem:[#allocation11_spill] sm:$0xff] }
 0x3b6   :  { %v2067_v58 = vmax.f32 %v2013_v60, 0.0  ;;  %v2014_v28 = vadd.f32 %v4879_v12, %v1953_v22 }
 0x3b8   :  { %v2172_v20 = vsel %vm2083_vm1, %v2067_v58, -inf  ;;  %v2068_v41 = vmax.f32 %v2014_v28, 0.0 }
 0x3b9   :  { %v5034_v62 = vmax.f32 %v2169_v47, %v2172_v20  ;;  %v1859_v0 = vpop.f32.mrb[180].mxu1 }
 0x3ba   :  { %v2108_v15 = vsel %vm2083_vm1, %v2068_v41, -inf  ;;  %v1954_v63 = vadd.f32 %v1859_v0, %v5282_v59  ;;  %v3600_v11 = vpop.f32.mrb[181].mxu1 }
 0x3bb   :  { %v2109_v36 = vmax.f32 %v2105_v19, %v2108_v15  ;;  %v1862_v31 = vpop.f32.mrb[182].mxu1  ;;  %v5285_v11 = vld [vmem:[#allocation12_spill] sm:$0xff] }
 0x3bc   :  { %v2015_v32 = vadd.f32 %v4879_v12, %v1954_v63  ;;  %v1955_v53 = vadd.f32 %v1862_v31, %v4824_v7  ;;  %v3601_v38 = vpop.f32.mrb[183].mxu1 }
 0x3be   :  { %v2069_v44 = vmax.f32 %v2015_v32, 0.0  ;;  %v2016_v3 = vadd.f32 %v4879_v12, %v1955_v53 }
 0x3c0   :  { %v2141_v39 = vsel %vm2083_vm1, %v2069_v44, -inf  ;;  %v2070_v47 = vmax.f32 %v2016_v3, 0.0 }
 0x3c1   :  { %v2142_v29 = vmax.f32 %v2138_v1, %v2141_v39  ;;  %v1867_v24 = vpop.f32.mrb[184].mxu1 }
 0x3c2   :  { %v2174_v27 = vsel %vm2083_vm1, %v2070_v47, -inf  ;;  %v1956_v49 = vadd.f32 %v1867_v24, %v5283_v26  ;;  %v3604_v18 = vpop.f32.mrb[185].mxu1 }
 0x3c3   :  { %v2175_v19 = vmax.f32 %v2171_v40, %v2174_v27  ;;  %v1870_v16 = vpop.f32.mrb[186].mxu1 }
 0x3c4   :  { %v2017_v45 = vadd.f32 %v4879_v12, %v1956_v49  ;;  %v1957_v7 = vadd.f32 %v1870_v16, %v4832_v37  ;;  %v3605_v6 = vpop.f32.mrb[187].mxu1 }
 0x3c6   :  { %v2071_v43 = vmax.f32 %v2017_v45, 0.0  ;;  %v2018_v33 = vadd.f32 %v4879_v12, %v1957_v7 }
 0x3c8   :  { %v2110_v42 = vsel %vm2083_vm1, %v2071_v43, -inf  ;;  %v2072_v50 = vmax.f32 %v2018_v33, 0.0 }
 0x3c9   :  { %v2111_v1 = vmax.f32 %v5024_v25, %v2110_v42  ;;  %v1875_v9 = vpop.f32.mrb[188].mxu1 }
 0x3ca   :  { %v2143_v51 = vsel %vm2083_vm1, %v2072_v50, -inf  ;;  %v1958_v55 = vadd.f32 %v1875_v9, %v4840_v17  ;;  %v3608_v40 = vpop.f32.mrb[189].mxu1 }
 0x3cb   :  { %v2144_v4 = vmax.f32 %v5028_v30, %v2143_v51  ;;  %v1878_v56 = vpop.f32.mrb[190].mxu1 }
 0x3cc   :  { %v2019_v37 = vadd.f32 %v4879_v12, %v1958_v55  ;;  %v1959_v34 = vadd.f32 %v1878_v56, %v4842_v46  ;;  %v3609_v14 = vpop.f32.mrb[191].mxu1  ;;  %v5286_v55 = vld [vmem:[#allocation5_spill] sm:$0xff] }
 0x3cd   :  { %vm2198_vm2 = vcmp.ge.s32.totalorder %v5286_v55, 8  ;;  %vm2199_vm3 = vcmp.lt.s32.totalorder %v5286_v55, 16  ;;  %vm2184_vm5 = vcmp.lt.s32.totalorder %v5286_v55, 8 }
 0x3ce   :  { %v2073_v21 = vmax.f32 %v2019_v37, 0.0  ;;  %v2020_v52 = vadd.f32 %v4879_v12, %v1959_v34  ;;  %vm5082_vm6 = vmand %vm2198_vm2, %vm2199_vm3 }
 0x3d0   :  { %v2176_v8 = vsel %vm2083_vm1, %v2073_v21, -inf  ;;  %v2074_v25 = vmax.f32 %v2020_v52, 0.0 }
 0x3d1   :  { %v2177_v10 = vmax.f32 %v5034_v62, %v2176_v8  ;;  %v1883_v61 = vpop.f32.mrb[192].mxu1 }
 0x3d2   :  { %v2112_v17 = vsel %vm2083_vm1, %v2074_v25, -inf  ;;  %v1960_v60 = vadd.f32 %v1883_v61, %v5284_v54  ;;  %v3612_v30 = vpop.f32.mrb[193].mxu1 }
 0x3d3   :  { %v2113_v22 = vmax.f32 %v2109_v36, %v2112_v17  ;;  %v1886_v5 = vpop.f32.mrb[194].mxu1 }
 0x3d4   :  { %v2021_v58 = vadd.f32 %v4879_v12, %v1960_v60  ;;  %v1961_v46 = vadd.f32 %v1886_v5, %v4852_v57  ;;  %v3613_v28 = vpop.f32.mrb[195].mxu1  ;;  %v2210_v60 = vpop.permute.xlu0 %2209 }
 0x3d6   :  { %v2075_v20 = vmax.f32 %v2021_v58, 0.0  ;;  %v2022_v41 = vadd.f32 %v4879_v12, %v1961_v46  ;;  %v2215_v46 = vpop.permute.xlu1 %2214 }
 0x3d8   :  { %v2145_v0 = vsel %vm2083_vm1, %v2075_v20, -inf  ;;  %v2076_v15 = vmax.f32 %v2022_v41, 0.0 }
 0x3d9   :  { %v2146_v62 = vmax.f32 %v2142_v29, %v2145_v0  ;;  %v1891_v59 = vpop.f32.mrb[196].mxu1 }
 0x3da   :  { %v2178_v63 = vsel %vm2083_vm1, %v2076_v15, -inf  ;;  %v1962_v31 = vadd.f32 %v1891_v59, %v5285_v11  ;;  %v3616_v32 = vpop.f32.mrb[197].mxu1  ;;  %v2220_v15 = vpop.permute.xlu0 %2219 }
 0x3db   :  { %v2179_v36 = vmax.f32 %v2175_v19, %v2178_v63  ;;  %v1894_v53 = vpop.f32.mrb[198].mxu1  ;;  %v3061_v32 = vld [vmem:[%s5232_s6] ss:$0 sm:$0xff] }
 0x3dc   :  { %v2023_v38 = vadd.f32 %v4879_v12, %v1962_v31  ;;  %v1963_v57 = vadd.f32 %v1894_v53, %v4861_v13  ;;  %v3617_v44 = vpop.f32.mrb[199].mxu1  ;;  %v5289_v31 = vmov 0.0  }
 0x3de   :  { %v2077_v3 = vmax.f32 %v2023_v38, 0.0  ;;  %v2024_v39 = vadd.f32 %v4879_v12, %v1963_v57 }
 0x3e0   :  { %v2114_v47 = vsel %vm2083_vm1, %v2077_v3, -inf  ;;  %v2078_v24 = vmax.f32 %v2024_v39, 0.0 }
 0x3e1   :  { %v2115_v29 = vmax.f32 %v2111_v1, %v2114_v47  ;;  %v1899_v27 = vpop.f32.mrb[200].mxu1 }
 0x3e2   :  { %v2147_v26 = vsel %vm2083_vm1, %v2078_v24, -inf  ;;  %v1964_v49 = vadd.f32 %v1899_v27, %v4864_v35  ;;  %v3620_v18 = vpop.f32.mrb[201].mxu1 }
 0x3e3   :  { %v2116_v19 = vmax.f32 %v2115_v29, %v2113_v22  ;;  %v2148_v16 = vmax.f32 %v2144_v4, %v2147_v26  ;;  %v1902_v45 = vpop.f32.mrb[202].mxu1 }
 0x3e4   :  { %v2025_v7 = vadd.f32 %v4879_v12, %v1964_v49  ;;  %v1965_v13 = vadd.f32 %v1902_v45, %v4867_v48  ;;  %v3621_v6 = vpop.f32.mrb[203].mxu1 }
 0x3e5   :  { %v2149_v43 = vmax.f32 %v2148_v16, %v2146_v62  ;;  %v2186_v25 = vsel %vm2184_vm5, %v2116_v19, 0.0 }
 0x3e6   :  { %v2079_v33 = vmax.f32 %v2025_v7, 0.0  ;;  %v2026_v42 = vadd.f32 %v4879_v12, %v1965_v13 }
 0x3e7   :  { %v2187_v58 = vsel %vm2184_vm5, %v2149_v43, 0.0 }
 0x3e8   :  { %v2180_v50 = vsel %vm2083_vm1, %v2079_v33, -inf  ;;  %v2080_v1 = vmax.f32 %v2026_v42, 0.0 }
 0x3e9   :  { %v2181_v9 = vmax.f32 %v2177_v10, %v2180_v50  ;;  %v1907_v51 = vpop.f32.mrb[204].mxu1 }
 0x3ea   :  { %v2189_v35 = vsel %vm2083_vm1, %v2080_v1, -inf  ;;  %v1966_v40 = vadd.f32 %v1907_v51, %v4870_v2  ;;  %v3624_v4 = vpop.f32.mrb[205].mxu1 }
 0x3eb   :  { %v2182_v48 = vmax.f32 %v2181_v9, %v2179_v36  ;;  %v2190_v56 = vmax.f32 %v2113_v22, %v2189_v35  ;;  %v1910_v37 = vpop.f32.mrb[206].mxu1 }
 0x3ec   :  { %v2027_v34 = vadd.f32 %v4879_v12, %v1966_v40  ;;  %v1967_v14 = vadd.f32 %v1910_v37, %v4873_v23  ;;  %v3625_v52 = vpop.f32.mrb[207].mxu1 }
 0x3ed   :  { %v2191_v8 = vmax.f32 %v2115_v29, %v2190_v56  ;;  %v2188_v20 = vsel %vm2184_vm5, %v2182_v48, 0.0 }
 0x3ee   :  { %v2081_v2 = vmax.f32 %v2027_v34, 0.0  ;;  %v2028_v10 = vadd.f32 %v4879_v12, %v1967_v14 }
 0x3ef   :  { %v2201_v61 = vsel %vm5082_vm6, %v2191_v8, %v2186_v25 }
 0x3f0   :  { %v2192_v17 = vsel %vm2083_vm1, %v2081_v2, -inf  ;;  %v2082_v54 = vmax.f32 %v2028_v10, 0.0  ;;  %v2222_v41 = vmul.f32 %v2210_v60, %v2201_v61 }
 0x3f1   :  { %v2193_v23 = vmax.f32 %v2146_v62, %v2192_v17 }
 0x3f2   :  { %v2195_v30 = vsel %vm2083_vm1, %v2082_v54, -inf }
 0x3f3   :  { %v2194_v22 = vmax.f32 %v2148_v16, %v2193_v23  ;;  %v2196_v5 = vmax.f32 %v2179_v36, %v2195_v30 }
 0x3f5   :  { %v2197_v28 = vmax.f32 %v2181_v9, %v2196_v5  ;;  %v2202_v12 = vsel %vm5082_vm6, %v2194_v22, %v2187_v58 }
 0x3f6   :  { %v2223_v0 = vmul.f32 %v2215_v46, %v2202_v12  ;;  %v3693_v12 = vld [vmem:[%s5237_s11 + $0x8] sm:$0xff]  }
 0x3f7   :  { %v2203_v62 = vsel %vm5082_vm6, %v2197_v28, %v2188_v20  ;;  %v3694_v20 = vld [vmem:[%s5237_s11 + $0x10] sm:$0xff]  }
 0x3f8   :  { %v2224_v59 = vmul.f32 %v2220_v15, %v2203_v62  ;;  %v2225_v63 = vpack.c.bf16 %v2223_v0, %v2222_v41  ;;  %v2398_v41 = vld [vmem:[%s5235_s9] sm:$0xff] }
 0x3f9   :  { %v2399_v0 = vpack.c.bf16 %v2398_v41, %v2398_v41  ;;  %v3695_v15 = vld [vmem:[%s5237_s11] sm:$0xff]  }
 0x3fa   :  { %v2226_v11 = vpack.c.bf16 %v2224_v59, %v2224_v59  ;;  %3628 = vmatprep.mubr.msk.bf16.mxu0 %vm2083_vm1, %v2225_v63 }
 0x3fc   :  { %3629 = vmatmul.mubr.msk.bf16.vlgmr.msra.gmra.mrb[176].mxu0 %vm2083_vm1, %v2226_v11 }
 0x3fd   :  { %3636 = vmatprep.mubr.msk.bf16.mxu0 %vm3752_vm8, %v5289_v31  ;;  %3633 = vmatpush3.bf16.msra.mxu0 %v3693_v12 }
 0x3fe   :  { %3634 = vmatprep.subr.bf16.mxu0 %v5289_v31 }
 0x401   :  { %3635 = vmatpush3.bf16.msra.mxu0 %v3694_v20 }
 0x402   :  { %3640 = vmatprep.subr.bf16.mxu0 %v5289_v31 }
 0x404   :  { %3637 = vmatmul.mubr.msk.bf16.vlgmr.msra.gmra.mrb[180].mxu0 %vm527_vm4, %v2399_v0 }
 0x405   :  { %3642 = vmatprep.mubr.msk.bf16.mxu0 %vm3752_vm8, %v5289_v31  ;;  %3641 = vmatpush3.bf16.msra.mxu0 %v3695_v15 }
 0x406   :  { %3646 = vmatprep.subr.bf16.mxu0 %v5289_v31 }
 0x4cf   :  { %v3630_v36 = vpop.f32.mrb[176].mxu0 }
 0x4d0   :  { %v2291_v53 = vadd.f32 %v3630_v36, %v3061_v32  ;;  %v2282_v38 = vpop.f32.mrb[177].mxu0 }
 0x4d1   :  { %v2283_v57 = vadd.f32 %v3061_v32, %v2282_v38  ;;  %v3631_v44 = vpop.f32.mrb[178].mxu0 }
 0x4d2   :  { %v2301_v3 = vmul.f32 0.044715, %v2291_v53  ;;  %v2285_v39 = vpop.f32.mrb[179].mxu0  ;;  %v2298_v34 = vmul.f32 0.5, %v2291_v53  ;;  %v3065_v44 = vld [vmem:[%s5233_s7] ss:$0 sm:$0xff] }
 0x4d3   :  { %v2299_v47 = vmul.f32 0.044715, %v2283_v57  ;;  %v2286_v24 = vadd.f32 %v3061_v32, %v2285_v39  ;;  %v2296_v1 = vmul.f32 0.5, %v2283_v57 }
 0x4d4   :  { %v2304_v29 = vmul.f32 %v2301_v3, %v2291_v53 }
 0x4d5   :  { %v2300_v27 = vmul.f32 0.044715, %v2286_v24  ;;  %v2302_v26 = vmul.f32 %v2299_v47, %v2283_v57  ;;  %v2297_v40 = vmul.f32 0.5, %v2286_v24 }
 0x4d6   :  { %v2307_v49 = vmul.f32 %v2304_v29, %v2291_v53 }
 0x4d7   :  { %v2305_v18 = vmul.f32 %v2302_v26, %v2283_v57  ;;  %v2303_v19 = vmul.f32 %v2300_v27, %v2286_v24 }
 0x4d8   :  { %v2310_v16 = vadd.f32 %v2307_v49, %v2291_v53  ;;  %v3696_v49 = vld [vmem:[%s5237_s11 + $0x18] sm:$0xff]  }
 0x4d9   :  { %v2308_v45 = vadd.f32 %v2305_v18, %v2283_v57  ;;  %v2306_v7 = vmul.f32 %v2303_v19, %v2286_v24 }
 0x4da   :  { %v2313_v13 = vmul.f32 0.7978846, %v2310_v16 }
 0x4db   :  { %v2311_v6 = vmul.f32 0.7978846, %v2308_v45  ;;  %v2309_v43 = vadd.f32 %v2306_v7, %v2286_v24  ;;  %v3066_v24 = vld [vmem:[%s5234_s8] ss:$0 sm:$0xff] }
 0x4dc   :  { %3702 = vtanh.f32 %v2313_v13  ;;  %v3697_v45 = vld [vmem:[%s5237_s11 + $0x20] sm:$0xff]  }
 0x4dd   :  { %3704 = vtanh.f32 %v2311_v6  ;;  %v2312_v33 = vmul.f32 0.7978846, %v2309_v43  ;;  %v3698_v6 = vld [vmem:[%s5237_s11 + $0x28] sm:$0xff]   ;;  %v2555_v43 = vld [vmem:[%s5236_s10] sm:$0xff] }
 0x4df   :  { %3706 = vtanh.f32 %v2312_v33 }
 0x4e6   :  { %v3703_v42 = vpop.eup %3702 }
 0x4e7   :  { %v3705_v50 = vpop.eup %3704  ;;  %v2319_v48 = vadd.f32 1.0, %v3703_v42  ;;  %v2556_v42 = vpack.c.bf16 %v2555_v43, %v2555_v43 }
 0x4e8   :  { %v2317_v9 = vadd.f32 1.0, %v3705_v50  ;;  %v3699_v50 = vld [vmem:[%s5237_s11 + $0x30] sm:$0xff]  }
 0x4e9   :  { %v3707_v51 = vpop.eup %3706  ;;  %v2322_v21 = vmul.f32 %v2319_v48, %v2298_v34 }
 0x4ea   :  { %v2320_v35 = vmul.f32 %v2317_v9, %v2296_v1  ;;  %v2318_v4 = vadd.f32 1.0, %v3707_v51 }
 0x4eb   :  { %v2331_v52 = vsel %vm2083_vm1, %v2322_v21, 0.0 }
 0x4ec   :  { %v2325_v56 = vsel %vm2083_vm1, %v2320_v35, 0.0  ;;  %v2321_v37 = vmul.f32 %v2318_v4, %v2297_v40 }
 0x4ed   :  { %2326 = vadd.xlane.f32.xlu1 %v2325_v56 }
 0x4ee   :  { %v2328_v14 = vsel %vm2083_vm1, %v2321_v37, 0.0 }
 0x4ef   :  { %2329 = vadd.xlane.f32.xlu0 %v2328_v14 }
 0x4f3   :  { %2332 = vadd.xlane.f32.xlu0 %v2331_v52 }
 0x57a   :  { %v2327_v8 = vpop.xlane.xlu1 %2326 }
 0x57b   :  { %v2335_v25 = vmul.f32 0.0625, %v2327_v8 }
 0x57c   :  { %v2330_v2 = vpop.xlane.xlu0 %2329 }
 0x57d   :  { %v2338_v10 = vsub.f32 %v2320_v35, %v2335_v25  ;;  %v2336_v61 = vmul.f32 0.0625, %v2330_v2  ;;  %v2449_v35 = vpop.f32.mrb[180].mxu0 }
 0x57e   :  { %v3638_v40 = vpop.f32.mrb[181].mxu0 }
 0x57f   :  { %v2339_v17 = vsub.f32 %v2321_v37, %v2336_v61  ;;  %v2341_v54 = vmul.f32 %v2338_v10, %v2338_v10  ;;  %v2452_v4 = vpop.f32.mrb[182].mxu0 }
 0x580   :  { %v2333_v60 = vpop.xlane.xlu0 %2332  ;;  %v3639_v48 = vpop.f32.mrb[183].mxu0 }
 0x581   :  { %v2337_v23 = vmul.f32 0.0625, %v2333_v60  ;;  %v2344_v30 = vsel %vm2083_vm1, %v2341_v54, 0.0  ;;  %v2342_v22 = vmul.f32 %v2339_v17, %v2339_v17 }
 0x582   :  { %2345 = vadd.xlane.f32.xlu1 %v2344_v30 }
 0x583   :  { %v2340_v5 = vsub.f32 %v2322_v21, %v2337_v23  ;;  %v2347_v58 = vsel %vm2083_vm1, %v2342_v22, 0.0  ;;  %v3079_v22 = vld [vmem:[%s5238_s12] ss:$0 sm:$0xff] }
 0x584   :  { %2348 = vadd.xlane.f32.xlu0 %v2347_v58 }
 0x585   :  { %v2343_v46 = vmul.f32 %v2340_v5, %v2340_v5 }
 0x587   :  { %v2350_v28 = vsel %vm2083_vm1, %v2343_v46, 0.0 }
 0x588   :  { %2351 = vadd.xlane.f32.xlu1 %v2350_v28 }
 0x60f   :  { %v2346_v62 = vpop.xlane.xlu1 %2345 }
 0x610   :  { %v2353_v59 = vmul.f32 0.0625, %v2346_v62 }
 0x611   :  { %v2349_v63 = vpop.xlane.xlu0 %2348 }
 0x612   :  { %v2356_v11 = vadd.f32 1e-12, %v2353_v59  ;;  %v2354_v32 = vmul.f32 0.0625, %v2349_v63 }
 0x614   :  { %3708 = vrsqrt.f32 %v2356_v11  ;;  %v2357_v36 = vadd.f32 1e-12, %v2354_v32 }
 0x615   :  { %v2352_v53 = vpop.xlane.xlu1 %2351 }
 0x616   :  { %3710 = vrsqrt.f32 %v2357_v36  ;;  %v2355_v38 = vmul.f32 0.0625, %v2352_v53 }
 0x618   :  { %v2358_v47 = vadd.f32 1e-12, %v2355_v38 }
 0x61a   :  { %3712 = vrsqrt.f32 %v2358_v47  ;;  %v3701_v47 = vld [vmem:[%s5241_s15 + $0x8] sm:$0xff]  }
 0x61e   :  { %v3709_v57 = vpop.eup %3708 }
 0x61f   :  { %v2362_v3 = vmul.f32 %v3709_v57, %v2338_v10 }
 0x620   :  { %v3711_v39 = vpop.eup %3710 }
 0x621   :  { %v2363_v29 = vmul.f32 %v3711_v39, %v2339_v17  ;;  %v2371_v27 = vmul.f32 %v3065_v44, %v2362_v3  ;;  %v3700_v39 = vld [vmem:[%s5241_s15] sm:$0xff]  }
 0x623   :  { %v2380_v26 = vadd.f32 %v3066_v24, %v2371_v27  ;;  %v2372_v19 = vmul.f32 %v3065_v44, %v2363_v29 }
 0x624   :  { %v3713_v13 = vpop.eup %3712 }
 0x625   :  { %v2397_v18 = vpack.c.bf16 %v2380_v26, %v2380_v26  ;;  %v2381_v16 = vadd.f32 %v3066_v24, %v2372_v19  ;;  %v2364_v33 = vmul.f32 %v3713_v13, %v2340_v5  ;;  %v3081_v19 = vld [vmem:[%s5240_s14] ss:$0 sm:$0xff] }
 0x626   :  { %v3082_v13 = vld [vmem:[%s5242_s16] ss:$0 sm:$0xff] }
 0x627   :  { %3643 = vmatmul.mubr.msk.bf16.vlgmr.msra.gmra.mrb[184].mxu0 %vm2083_vm1, %v2397_v18  ;;  %v2504_v7 = vpack.c.bf16 %v2381_v16, %v2381_v16  ;;  %v2373_v1 = vmul.f32 %v3065_v44, %v2364_v33 }
 0x628   :  { %3647 = vmatpush3.bf16.msra.mxu0 %v3696_v49  ;;  %3648 = vmatprep.mubr.msk.bf16.mxu0 %vm3752_vm8, %v5289_v31  ;;  %v3080_v49 = vld [vmem:[%s5239_s13] ss:$0 sm:$0xff] }
 0x629   :  { %3652 = vmatprep.subr.bf16.mxu0 %v5289_v31  ;;  %v2382_v9 = vadd.f32 %v3066_v24, %v2373_v1 }
 0x62b   :  { %v2613_v51 = vpack.c.bf16 %v2382_v9, %v2382_v9 }
 0x62f   :  { %3649 = vmatmul.mubr.msk.bf16.vlgmr.msra.gmra.mrb[188].mxu0 %vm2083_vm1, %v2504_v7 }
 0x630   :  { %3653 = vmatpush3.bf16.msra.mxu0 %v3697_v45  ;;  %3656 = vmatprep.mubr.msk.bf16.mxu0 %vm3752_vm8, %v5289_v31 }
 0x631   :  { %3654 = vmatprep.subr.bf16.mxu0 %v5289_v31 }
 0x634   :  { %3655 = vmatpush3.bf16.msra.mxu0 %v3698_v6 }
 0x635   :  { %3660 = vmatprep.subr.bf16.mxu0 %v5289_v31 }
 0x637   :  { %3657 = vmatmul.mubr.msk.bf16.vlgmr.msra.gmra.mrb[192].mxu0 %vm527_vm4, %v2556_v42 }
 0x638   :  { %3661 = vmatpush3.bf16.msra.mxu0 %v3699_v50  ;;  %3662 = vmatprep.mubr.msk.bf16.mxu0 %vm3752_vm8, %v5289_v31 }
 0x639   :  { %3666 = vmatprep.subr.bf16.mxu0 %v5289_v31 }
 0x63f   :  { %3663 = vmatmul.mubr.msk.bf16.vlgmr.msra.gmra.mrb[196].mxu0 %vm2083_vm1, %v2613_v51 }
 0x640   :  { %3670 = vmatprep.mubr.msk.bf16.mxu0 %vm3752_vm8, %v5289_v31  ;;  %3667 = vmatpush3.bf16.msra.mxu0 %v3700_v39 }
 0x641   :  { %3668 = vmatprep.subr.bf16.mxu0 %v5289_v31 }
 0x644   :  { %3669 = vmatpush3.bf16.msra.mxu0 %v3701_v47 }
 0x6fa   :  { %v2498_v56 = vpop.f32.mrb[184].mxu0 }
 0x6fb   :  { %v2499_v37 = vadd.f32 %v2498_v56, %v2449_v35  ;;  %v3644_v34 = vpop.f32.mrb[185].mxu0 }
 0x6fc   :  { %v2501_v14 = vpop.f32.mrb[186].mxu0 }
 0x6fd   :  { %v3645_v21 = vpop.f32.mrb[187].mxu0  ;;  %v3086_v14 = vld [vmem:[%s5243_s17] ss:$0 sm:$0xff]  ;;  %s3753_s17 = smov [#allocation2]  }
 0x702   :  { %v2548_v52 = vpop.f32.mrb[188].mxu0 }
 0x703   :  { %v2554_v8 = vadd.f32 %v2548_v52, %v2499_v37  ;;  %v3650_v25 = vpop.f32.mrb[189].mxu0  ;;  %v3087_v52 = vld [vmem:[%s5244_s18] ss:$0 sm:$0xff]  ;;  %s2871_s18 = sshll.u32 %s3753_s17, 4  ;;  %s2872_s18 = int_to_ptr.vmem [resolvable:$true] %s2871_s18 }
 0x704   :  { %v2551_v2 = vpop.f32.mrb[190].mxu0  ;;  %s3730_s7 = scalar_lea.vmem %s2872_s18, 32  ;;  %p3731_p1 = scmp.lt.s32.totalorder %s2872_s18, %s2872_s18 }
 0x705   :  { %v3651_v10 = vpop.f32.mrb[191].mxu0 }
 0x706   :  { %v2821_v10 = vld [vmem:[%s5245_s19] sm:$0xff]  ;;  %s3726_s19 = scalar_lea.vmem %s2872_s18, 16 }
 0x707   :  { %p3727_p0 = scmp.ne.s32.totalorder %s2872_s18, %s3726_s19  ;;  %p3732_p2 = scmp.lt.s32.totalorder %s3730_s7, %s3726_s19 }
 0x709   :  { %p3733_p3 = por %p3732_p2, %p3731_p1 }
 0x70a   :  { %v2606_v61 = vpop.f32.mrb[192].mxu0 }
 0x70b   :  { %v2612_v17 = vadd.f32 %v2606_v61, %v2554_v8  ;;  %v3658_v54 = vpop.f32.mrb[193].mxu0  ;;  %p3734_p4 = pnand %p3733_p3, %p3727_p0 }
 0x70c   :  { %v2609_v60 = vpop.f32.mrb[194].mxu0 }
 0x70d   :  { %v3659_v23 = vpop.f32.mrb[195].mxu0 }
 0x712   :  { %v2657_v30 = vpop.f32.mrb[196].mxu0 }
 0x713   :  { %v2663_v5 = vadd.f32 %v2657_v30, %v2612_v17  ;;  %v3664_v58 = vpop.f32.mrb[197].mxu0 }
 0x714   :  { %v2660_v46 = vpop.f32.mrb[198].mxu0 }
 0x715   :  { %v2671_v28 = vadd.f32 %v3079_v22, %v2663_v5  ;;  %v3665_v12 = vpop.f32.mrb[199].mxu0 }
 0x717   :  { %v2673_v20 = vmul.f32 0.044715, %v2671_v28  ;;  %v2672_v63 = vmul.f32 0.5, %v2671_v28 }
 0x719   :  { %v2674_v41 = vmul.f32 %v2673_v20, %v2671_v28 }
 0x71b   :  { %v2675_v0 = vmul.f32 %v2674_v41, %v2671_v28 }
 0x71d   :  { %v2676_v15 = vadd.f32 %v2675_v0, %v2671_v28 }
 0x71f   :  { %v2677_v62 = vmul.f32 0.7978846, %v2676_v15  ;;  %v2853_v15 = vcvt.s32.f32 %v5286_v55 }
 0x721   :  { %3714 = vtanh.f32 %v2677_v62 }
 0x72b   :  { %v3715_v59 = vpop.eup %3714 }
 0x72c   :  { %v2679_v11 = vadd.f32 1.0, %v3715_v59 }
 0x72e   :  { %v2680_v32 = vmul.f32 %v2679_v11, %v2672_v63 }
 0x730   :  { %v2683_v36 = vsel %vm527_vm4, %v2680_v32, 0.0 }
 0x731   :  { %2684 = vadd.xlane.f32.xlu0 %v2683_v36 }
 0x7be   :  { %v2685_v53 = vpop.xlane.xlu0 %2684 }
 0x7bf   :  { %v2687_v38 = vmul.f32 0.03125, %v2685_v53 }
 0x7c1   :  { %v2688_v57 = vsub.f32 %v2680_v32, %v2687_v38 }
 0x7c3   :  { %v2689_v44 = vmul.f32 %v2688_v57, %v2688_v57 }
 0x7c5   :  { %v2690_v3 = vsel %vm527_vm4, %v2689_v44, 0.0 }
 0x7c6   :  { %2691 = vadd.xlane.f32.xlu1 %v2690_v3 }
 0x853   :  { %v2692_v24 = vpop.xlane.xlu1 %2691 }
 0x854   :  { %v2693_v29 = vmul.f32 0.03125, %v2692_v24 }
 0x856   :  { %v2694_v27 = vadd.f32 1e-12, %v2693_v29 }
 0x858   :  { %3716 = vrsqrt.f32 %v2694_v27 }
 0x862   :  { %v3717_v26 = vpop.eup %3716 }
 0x863   :  { %v2696_v18 = vmul.f32 %v3717_v26, %v2688_v57 }
 0x865   :  { %v2703_v16 = vmul.f32 %v3080_v49, %v2696_v18 }
 0x867   :  { %v2710_v45 = vadd.f32 %v3081_v19, %v2703_v16 }
 0x869   :  { %v2711_v7 = vpack.c.bf16 %v2710_v45, %v2710_v45 }
 0x86b   :  { %3671 = vmatmul.mubr.msk.bf16.vlgmr.msra.gmra.mrb[200].mxu0 %vm527_vm4, %v2711_v7 }
 0x93e   :  { %v2772_v6 = vpop.f32.mrb[200].mxu0 }
 0x93f   :  { %v2773_v43 = vadd.f32 %v3082_v13, %v2772_v6  ;;  %v3672_v33 = vpop.f32.mrb[201].mxu0 }
 0x940   :  { %v2775_v42 = vpop.f32.mrb[202].mxu0 }
 0x941   :  { %v3673_v50 = vpop.f32.mrb[203].mxu0  ;;  %v2781_v1 = vsel %vm2780_vm7, %v2773_v43, 0.0 }
 0x942   :  { %2782 = vadd.xlane.f32.xlu0 %v2781_v1 }
 0x9cf   :  { %v2783_v9 = vpop.xlane.xlu0 %2782 }
 0x9d0   :  { %v2785_v51 = vmul.f32 0.2, %v2783_v9 }
 0x9d2   :  { %v2786_v35 = vsub.f32 %v2773_v43, %v2785_v51 }
 0x9d4   :  { %v2787_v40 = vmul.f32 %v2786_v35, %v2786_v35 }
 0x9d6   :  { %v2788_v4 = vsel %vm2780_vm7, %v2787_v40, 0.0 }
 0x9d7   :  { %2789 = vadd.xlane.f32.xlu1 %v2788_v4 }
 0xa64   :  { %v2790_v48 = vpop.xlane.xlu1 %2789 }
 0xa65   :  { %v2791_v56 = vmul.f32 0.2, %v2790_v48 }
 0xa67   :  { %v2792_v37 = vadd.f32 1e-12, %v2791_v56 }
 0xa69   :  { %3718 = vrsqrt.f32 %v2792_v37 }
 0xa73   :  { %v3719_v34 = vpop.eup %3718 }
 0xa74   :  { %v2794_v21 = vmul.f32 %v3719_v34, %v2786_v35 }
 0xa76   :  { %v2801_v8 = vmul.f32 %v3086_v14, %v2794_v21 }
 0xa78   :  { %v2808_v25 = vadd.f32 %v3087_v52, %v2801_v8 }
 0xa7a   :  { %v2809_v2 = vsel %vm2780_vm7, %v2808_v25, -inf }
 0xa7b   :  { %2810 = vmax.xlane.f32.xlu0 %v2809_v2 }
 0xa91   :  { %2823 = vperm.xlu0 %3684, %v2821_v10  }
 0xb08   :  { %v2811_v61 = vpop.xlane.xlu0 %2810 }
 0xb09   :  { %v2812_v17 = vsub.f32 %v2808_v25, %v2811_v61 }
 0xb0b   :  { %v2813_v54 = vmul.f32 1.442695, %v2812_v17 }
 0xb0d   :  { %3720 = vpow2.f32 %v2813_v54 }
 0xb10   :  { %v2824_v5 = vpop.permute.xlu0 %2823 }
 0xb11   :  { %vm2825_vm4 = vcmp.eq.s32.totalorder %v2824_v5, %v5286_v55 }
 0xb12   :  { %v3088_v12 = vsel %vm2825_vm4, 1.0, %v5289_v31 }
 0xb13   :  { %v2839_v20 = vsel %vm2780_vm7, %v3088_v12, 0.0 }
 0xb17   :  { %v3721_v60 = vpop.eup %3720 }
 0xb18   :  { %v2815_v23 = vsel %vm2780_vm7, %v3721_v60, 0.0 }
 0xb19   :  { %2816 = vadd.xlane.f32.xlu1 %v2815_v23 }
 0xba6   :  { %v2817_v30 = vpop.xlane.xlu1 %2816 }
 0xba7   :  { %3722 = vlog2.f32 %v2817_v30 }
 0xbb1   :  { %v3723_v22 = vpop.eup %3722 }
 0xbb2   :  { %v2819_v58 = vmul.f32 0.6931472, %v3723_v22 }
 0xbb4   :  { %v2820_v46 = vsub.f32 %v2812_v17, %v2819_v58 }
 0xbb6   :  { %v2854_v28 = vsel %vm2780_vm7, %v2820_v46, -inf  ;;  %v2828_v41 = vmul.f32 %v3088_v12, %v2820_v46 }
 0xbb7   :  { %2855 = vmax.xlane.f32.xlu1 %v2854_v28 }
 0xbb8   :  { %v2829_v0 = vsel %vm2780_vm7, %v2828_v41, 0.0 }
 0xbbb   :  { %2840 = vadd.xlane.f32.xlu1 %v2839_v20 }
 0xbbf   :  { %2830 = vadd.xlane.f32.xlu1 %v2829_v0 }
 0xc44   :  { %v2856_v62 = vpop.xlane.xlu1 %2855 }
 0xc45   :  { %vm2857_vm8 = vcmp.ge.f32.partialorder %v2820_v46, %v2856_v62 }
 0xc46   :  { %v2858_v59 = vsel %vm2857_vm8, %v2853_v15, 5.0 }
 0xc47   :  { %v2859_v63 = vsel %vm2780_vm7, %v2858_v59, inf }
 0xc48   :  { %v2841_v11 = vpop.xlane.xlu1 %2840  ;;  %2860 = vmin.xlane.f32.xlu1 %v2859_v63 }
 0xc49   :  { %v2842_v32 = vrot.slane %v2841_v11, 4 }
 0xc4b   :  { %v2843_v36 = vadd.f32 %v2842_v32, %v2841_v11 }
 0xc4c   :  { %v2831_v53 = vpop.xlane.xlu1 %2830 }
 0xc4d   :  { %v2844_v31 = vrot.slane %v2843_v36, 2  ;;  %v2832_v38 = vsub.f32 0.0, %v2831_v53 }
 0xc4f   :  { %v2845_v57 = vadd.f32 %v2844_v31, %v2843_v36  ;;  %v2833_v44 = vrot.slane %v2832_v38, 4 }
 0xc51   :  { %v2846_v3 = vrot.slane %v2845_v57, 1  ;;  %v2834_v39 = vadd.f32 %v2833_v44, %v2832_v38 }
 0xc53   :  { %v2847_v47 = vadd.f32 %v2846_v3, %v2845_v57  ;;  %v2835_v24 = vrot.slane %v2834_v39, 2 }
 0xc55   :  { %v2848_v29 = vmax.f32 %v2847_v47, 1.0  ;;  %v2836_v55 = vadd.f32 %v2835_v24, %v2834_v39 }
 0xc57   :  { %3724 = vrcp.f32 %v2848_v29  ;;  %v2837_v27 = vrot.slane %v2836_v55, 1 }
 0xc59   :  { %v2838_v26 = vadd.f32 %v2837_v27, %v2836_v55 }
 0xc61   :  { %v3725_v49 = vpop.eup %3724 }
 0xc62   :  { %v2850_v18 = vmul.f32 %v3725_v49, %v2838_v26 }
 0xc64   :  { %2852 = vst.msk [vmem:[#allocation2] sm:$0x1] %vm2851_vm9, %v2850_v18 }
 0xc65   :  { %3737 = shalt.err (!%p3734_p4)
}
 0xc66   :  { %s3738_s24 = scalar_lea.hbm %s5246_s20, 16 }
 0xc67   :  { %p3739_p5 = scmp.ne.s32.totalorder %s5246_s20, %s3738_s24  ;;  %p3742_p6 = scmp.lt.u32.totalorder %s3738_s24, %s5246_s20 }
 0xc69   :  { %p3744_p7 = pnand %p3742_p6, %p3739_p5 }
 0xc6b   :  { %3747 = shalt.err (!%p3744_p7)
}
 0xc6c   :  { %2874 = dma.vmem_to_hbm [thread:$0]  %s2872_s18, 16, %s5246_s20, [#allocation3]   ;;  %vm2863_vm10 = vcmask 7168  }
 0xcd5   :  { %v2861_v19 = vpop.xlane.xlu1 %2860 }
 0xcd6   :  { %v3678_v16 = vtrunc.f32 %v2861_v19 }
 0xcd8   :  { %v3679_v45 = vcvt.f32.s32 %v3678_v16 }
 0xcda   :  { %2864 = vst.msk [vmem:[%s5247_s21] sm:$0xff] %vm2863_vm10, %v3679_v45 }
 0xcdb   :  { %3748 = dma.done.wait [#allocation3], 16  }
 0xcdc   :  { %3749 = vsyncadd [#allocation3], 4294967280 }
 0xcdd   :  { %2882 = vsyncpa [#allocation3], 1 }

</bundles_post_ra>
